<compile_context>
chip_gen: v7x
topology: tpu7x:2x2x1
jax: 0.10.0
libtpu: 0.0.40
codegen_flags: <defaults>
</compile_context>

<pallas_src>
import functools

import jax
import jax.numpy as jnp
from jax.experimental import pallas as pl
from jax.experimental.pallas import tpu as pltpu


def _leaky_relu(v):
    # PyTorch nn.LeakyReLU default negative_slope = 0.01
    return jnp.where(v > 0, v, 0.01 * v)


# ---------------------------------------------------------------------------
# Parameter layout: weights stored PyTorch-style (fan_out, fan_in), packed into
# a single (total_rows, 128) bf16 blob (row offsets padded to multiples of 8).
# Layer 4 is the full psi[0] weight (128, enc+1) incl. the tt column.
# Layer 7 (psi[3], logically (1, 50)) is stored as a (50, 1) column so the final
# layer can be a broadcast-multiply + sublane reduce.
# Biases are packed as columns of a (128, 8) f32 blob.
# ---------------------------------------------------------------------------
def make_layout(in_features, enc):
    shapes = [(32, in_features), (32, 32), (28, 32), (enc, 28),
              (128, enc + 1), (128, 128), (50, 128), (50, 1)]
    offs, off = [], 0
    for (o, _i) in shapes:
        offs.append(off)
        off += ((o + 7) // 8) * 8
    return shapes, offs, off  # off == total packed rows (multiple of 8)


def init_params(key, in_features, encoded_features):
    """PyTorch-default-style init: U(-1/sqrt(fan_in), 1/sqrt(fan_in)).
    Returns list of (W (fan_out, fan_in) f32, b (fan_out,) f32) per layer."""
    dims = [(in_features, 32), (32, 32), (32, 28), (28, encoded_features),
            (encoded_features + 1, 128), (128, 128), (128, 50), (50, 1)]
    keys = jax.random.split(key, len(dims))
    params = []
    for k, (fi, fo) in zip(keys, dims):
        kw, kb = jax.random.split(k)
        bound = 1.0 / (fi ** 0.5)
        w = jax.random.uniform(kw, (fo, fi), jnp.float32, -bound, bound)
        b = jax.random.uniform(kb, (fo,), jnp.float32, -bound, bound)
        params.append((w, b))
    return params


def pack_params(params, in_features, encoded_features):
    shapes, offs, total = make_layout(in_features, encoded_features)
    assert in_features <= 128 and encoded_features + 1 <= 128
    wblob = jnp.zeros((total, 128), jnp.bfloat16)
    bblob = jnp.zeros((128, len(shapes)), jnp.float32)
    for j, ((w, b), (o, i), off) in enumerate(zip(params, shapes, offs)):
        wj = w if j != 7 else w.T          # last layer stored as a (50, 1) column
        wblob = wblob.at[off:off + o, 0:i].set(wj.astype(jnp.bfloat16))
        bblob = bblob.at[0:b.shape[0], j].set(b)
    return wblob, bblob


# ---------------------------------------------------------------------------
# Kernel
# ---------------------------------------------------------------------------
def make_net_kernel(in_features, enc, shapes, offs):
    bf16 = jnp.bfloat16

    def dense(w_ref, b_ref, act_f32, j):
        o, i = shapes[j]
        off = offs[j]
        w = w_ref[off:off + o, 0:i]                         # (o, i) bf16
        b = b_ref[0:o, j:j + 1]                             # (o, 1) f32
        return jnp.dot(w, act_f32.astype(bf16),
                       preferred_element_type=jnp.float32) + b

    def kernel(x_ref, w_ref, b_ref, out_ref):
        # x_ref: (in_features + 1, TILE_B) f32; last row is tt.
        x = x_ref[0:in_features, :]                          # (in, T)
        tt = x_ref[in_features:in_features + 1, :]           # (1, T)

        # ---- phi ----
        h = _leaky_relu(dense(w_ref, b_ref, x, 0))           # (32, T)
        h = jnp.maximum(dense(w_ref, b_ref, h, 1), 0.0)      # (32, T)
        h = _leaky_relu(dense(w_ref, b_ref, h, 2))           # (28, T)
        phi = dense(w_ref, b_ref, h, 3)                      # (enc, T)

        # ---- psi layer 0, with cat([phi, tt]) folded in ----
        off4 = offs[4]
        p0a = w_ref[off4:off4 + 128, 0:enc]                  # (128, enc) bf16
        p0t = w_ref[off4:off4 + 128, enc:enc + 1].astype(jnp.float32)  # (128, 1)
        g = jnp.dot(p0a, phi.astype(bf16), preferred_element_type=jnp.float32)
        g = g + p0t * tt + b_ref[0:128, 4:5]
        g = _leaky_relu(g)                                   # (128, T)

        g = _leaky_relu(dense(w_ref, b_ref, g, 5))           # (128, T)
        g = jnp.maximum(dense(w_ref, b_ref, g, 6), 0.0)      # (50, T)

        # ---- final 50 -> 1 layer: broadcast-mul + sublane reduce (no MXU) ----
        off7 = offs[7]
        p3 = w_ref[off7:off7 + 50, 0:1].astype(jnp.float32)  # (50, 1)
        z = jnp.sum(g * p3, axis=0, keepdims=True) + b_ref[0:1, 7:8]  # (1, T)

        out_ref[...] = 1.0 / (1.0 + jnp.exp(-z))             # lane-dense store

    return kernel


@functools.partial(jax.jit,
                   static_argnames=("in_features", "encoded_features", "tile_b"))
def net_forward(x, tt, wblob, bblob, *, in_features, encoded_features,
                tile_b=512):
    assert tile_b % 128 == 0
    B = x.shape[0]
    enc = encoded_features
    shapes, offs, total_rows = make_layout(in_features, enc)

    nb = pl.cdiv(B, tile_b)
    Bp = nb * tile_b

    # Build feature-major input with tt as the last row: (in_features + 1, Bp).
    xa = jnp.concatenate(
        [x.astype(jnp.float32), tt.reshape(-1, 1).astype(jnp.float32)], axis=1).T
    if Bp != B:
        xa = jnp.pad(xa, ((0, 0), (0, Bp - B)))

    kernel = make_net_kernel(in_features, enc, shapes, offs)
    nrow = in_features + 1

    flops = int(2 * sum(o * i for (o, i) in shapes) * Bp)
    bytes_accessed = int(xa.size * 4 + wblob.size * 2 + bblob.size * 4 + Bp * 4)

    out = pl.pallas_call(
        kernel,
        out_shape=jax.ShapeDtypeStruct((1, Bp), jnp.float32),
        grid_spec=pltpu.PrefetchScalarGridSpec(
            num_scalar_prefetch=0,
            grid=(nb,),
            in_specs=[
                # x tile: pipelined over the batch grid.
                pl.BlockSpec((nrow, tile_b), lambda i: (0, i)),
                # packed weights / biases: constant index map -> VMEM-resident.
                pl.BlockSpec((total_rows, 128), lambda i: (0, 0)),
                pl.BlockSpec((128, len(shapes)), lambda i: (0, 0)),
            ],
            out_specs=pl.BlockSpec((1, tile_b), lambda i: (0, i)),
        ),
        compiler_params=pltpu.CompilerParams(
            dimension_semantics=("parallel",),
            vmem_limit_bytes=32 * 1024 * 1024),
        cost_estimate=pl.CostEstimate(
            flops=flops, transcendentals=int(Bp), bytes_accessed=bytes_accessed),
    )(xa, wblob, bblob)

    return out[0, :B].reshape(B, 1)


# ---------------------------------------------------------------------------
# Pure-JAX reference (unpacked f32 params; mirrors the kernel's bf16 MXU
# operands + f32 accumulation so only accumulation-order noise remains).
# ---------------------------------------------------------------------------
def ref_forward(x, tt, params):
    bf = jnp.bfloat16
    lrelu = lambda v: jnp.where(v > 0, v, 0.01 * v)

    def lin(a, w, b):  # a: (B, in) f32, w: (out, in) f32, b: (out,)
        return jnp.dot(a.astype(bf), w.astype(bf).T,
                       preferred_element_type=jnp.float32) + b

    (w0, b0), (w1, b1), (w2, b2), (w3, b3), \
        (p0, pb0), (p1, pb1), (p2, pb2), (p3, pb3) = params

    h = lrelu(lin(x, w0, b0))
    h = jnp.maximum(lin(h, w1, b1), 0.0)
    h = lrelu(lin(h, w2, b2))
    phi = lin(h, w3, b3)
    xt = jnp.concatenate([phi, tt.reshape(-1, 1)], axis=1)
    g = lrelu(lin(xt, p0, pb0))
    g = lrelu(lin(g, p1, pb1))
    g = jnp.maximum(lin(g, p2, pb2), 0.0)
    z = lin(g, p3, pb3)
    return 1.0 / (1.0 + jnp.exp(-z))


if __name__ == "__main__":
    IN_FEATURES = 16
    ENCODED_FEATURES = 8
    BATCH = 1000          # not a multiple of the tile -> exercises padding path
    TILE_B = 512

    key = jax.random.PRNGKey(0)
    k_params, k_x, k_t = jax.random.split(key, 3)

    params = init_params(k_params, IN_FEATURES, ENCODED_FEATURES)
    wblob, bblob = pack_params(params, IN_FEATURES, ENCODED_FEATURES)

    x = jax.random.normal(k_x, (BATCH, IN_FEATURES), jnp.float32)
    tt = jax.random.uniform(k_t, (BATCH,), jnp.float32)

    out = net_forward(x, tt, wblob, bblob,
                      in_features=IN_FEATURES,
                      encoded_features=ENCODED_FEATURES,
                      tile_b=TILE_B)
    out = jax.block_until_ready(out)

    expected = ref_forward(x, tt, params)
    assert out.shape == (BATCH, 1)
    assert jnp.allclose(out, expected, atol=5e-3, rtol=5e-3), \
        float(jnp.max(jnp.abs(out - expected)))
    print("KERNEL_OK")
</pallas_src>

<mosaic_0001>
module attributes {stable_mosaic.version = 11 : i64} {
  func.func @kernel(%arg0: i32, %arg1: memref<17x512xf32, #tpu.memory_space<vmem>>, %arg2: memref<472x128xbf16, #tpu.memory_space<vmem>>, %arg3: memref<128x8xf32, #tpu.memory_space<vmem>>, %arg4: memref<1x512xf32, #tpu.memory_space<vmem>>) attributes {dimension_semantics = [#tpu.dimension_semantics<parallel>], iteration_bounds = array<i64: 2>, scalar_prefetch = 0 : i64, scratch_operands = 0 : i64, tpu.core_type = #tpu.core_type<tc>, window_params = [{transform_indices = @transform_0, window_bounds = array<i64: 17, 512>}, {pipeline_mode = #tpu.pipeline_mode<synchronous>, transform_indices = @transform_1, window_bounds = array<i64: 472, 128>}, {pipeline_mode = #tpu.pipeline_mode<synchronous>, transform_indices = @transform_2, window_bounds = array<i64: 128, 8>}, {transform_indices = @transform_3, window_bounds = array<i64: 1, 512>}]} {
    %c0 = arith.constant 0 : index
    %c0_0 = arith.constant 0 : index
    %0 = vector.load %arg1[%c0, %c0_0] : memref<17x512xf32, #tpu.memory_space<vmem>>, vector<16x512xf32>
    %c16 = arith.constant 16 : index
    %c0_1 = arith.constant 0 : index
    %1 = vector.load %arg1[%c16, %c0_1] : memref<17x512xf32, #tpu.memory_space<vmem>>, vector<1x512xf32>
    %c0_2 = arith.constant 0 : index
    %c0_3 = arith.constant 0 : index
    %2 = vector.load %arg2[%c0_2, %c0_3] : memref<472x128xbf16, #tpu.memory_space<vmem>>, vector<32x16xbf16>
    %c0_4 = arith.constant 0 : index
    %c0_5 = arith.constant 0 : index
    %3 = vector.load %arg3[%c0_4, %c0_5] : memref<128x8xf32, #tpu.memory_space<vmem>>, vector<32x1xf32>
    %4 = arith.truncf %0 : vector<16x512xf32> to vector<16x512xbf16>
    %cst = arith.constant dense<0.000000e+00> : vector<32x512xf32>
    %5 = tpu.matmul %2, %4, %cst {dimension_numbers = #tpu.dot_dimension_numbers<[1], [0], [0], [1], [0, 0, 1, 1], [], []>} : vector<32x16xbf16>, vector<16x512xbf16>, vector<32x512xf32> -> vector<32x512xf32>
    %6 = vector.broadcast %3 : vector<32x1xf32> to vector<32x512xf32>
    %7 = arith.addf %5, %6 : vector<32x512xf32>
    %cst_6 = arith.constant 0.000000e+00 : f32
    %8 = vector.broadcast %cst_6 : f32 to vector<32x512xf32>
    %9 = arith.cmpf ogt, %7, %8 : vector<32x512xf32>
    %cst_7 = arith.constant 0.00999999977 : f32
    %10 = vector.broadcast %cst_7 : f32 to vector<32x512xf32>
    %11 = arith.mulf %10, %7 : vector<32x512xf32>
    %12 = arith.select %9, %7, %11 : vector<32x512xi1>, vector<32x512xf32>
    %c32 = arith.constant 32 : index
    %c0_8 = arith.constant 0 : index
    %13 = vector.load %arg2[%c32, %c0_8] : memref<472x128xbf16, #tpu.memory_space<vmem>>, vector<32x32xbf16>
    %c0_9 = arith.constant 0 : index
    %c1 = arith.constant 1 : index
    %14 = vector.load %arg3[%c0_9, %c1] : memref<128x8xf32, #tpu.memory_space<vmem>>, vector<32x1xf32>
    %15 = arith.truncf %12 : vector<32x512xf32> to vector<32x512xbf16>
    %cst_10 = arith.constant dense<0.000000e+00> : vector<32x512xf32>
    %16 = tpu.matmul %13, %15, %cst_10 {dimension_numbers = #tpu.dot_dimension_numbers<[1], [0], [0], [1], [0, 0, 1, 1], [], []>} : vector<32x32xbf16>, vector<32x512xbf16>, vector<32x512xf32> -> vector<32x512xf32>
    %17 = vector.broadcast %14 : vector<32x1xf32> to vector<32x512xf32>
    %18 = arith.addf %16, %17 : vector<32x512xf32>
    %cst_11 = arith.constant 0.000000e+00 : f32
    %19 = vector.broadcast %cst_11 : f32 to vector<32x512xf32>
    %20 = arith.maximumf %18, %19 : vector<32x512xf32>
    %c64 = arith.constant 64 : index
    %c0_12 = arith.constant 0 : index
    %21 = vector.load %arg2[%c64, %c0_12] : memref<472x128xbf16, #tpu.memory_space<vmem>>, vector<28x32xbf16>
    %c0_13 = arith.constant 0 : index
    %c2 = arith.constant 2 : index
    %22 = vector.load %arg3[%c0_13, %c2] : memref<128x8xf32, #tpu.memory_space<vmem>>, vector<28x1xf32>
    %23 = arith.truncf %20 : vector<32x512xf32> to vector<32x512xbf16>
    %cst_14 = arith.constant dense<0.000000e+00> : vector<28x512xf32>
    %24 = tpu.matmul %21, %23, %cst_14 {dimension_numbers = #tpu.dot_dimension_numbers<[1], [0], [0], [1], [0, 0, 1, 1], [], []>} : vector<28x32xbf16>, vector<32x512xbf16>, vector<28x512xf32> -> vector<28x512xf32>
    %25 = vector.broadcast %22 : vector<28x1xf32> to vector<28x512xf32>
    %26 = arith.addf %24, %25 : vector<28x512xf32>
    %cst_15 = arith.constant 0.000000e+00 : f32
    %27 = vector.broadcast %cst_15 : f32 to vector<28x512xf32>
    %28 = arith.cmpf ogt, %26, %27 : vector<28x512xf32>
    %cst_16 = arith.constant 0.00999999977 : f32
    %29 = vector.broadcast %cst_16 : f32 to vector<28x512xf32>
    %30 = arith.mulf %29, %26 : vector<28x512xf32>
    %31 = arith.select %28, %26, %30 : vector<28x512xi1>, vector<28x512xf32>
    %c96 = arith.constant 96 : index
    %c0_17 = arith.constant 0 : index
    %32 = vector.load %arg2[%c96, %c0_17] : memref<472x128xbf16, #tpu.memory_space<vmem>>, vector<8x28xbf16>
    %c0_18 = arith.constant 0 : index
    %c3 = arith.constant 3 : index
    %33 = vector.load %arg3[%c0_18, %c3] : memref<128x8xf32, #tpu.memory_space<vmem>>, vector<8x1xf32>
    %34 = arith.truncf %31 : vector<28x512xf32> to vector<28x512xbf16>
    %cst_19 = arith.constant dense<0.000000e+00> : vector<8x512xf32>
    %35 = tpu.matmul %32, %34, %cst_19 {dimension_numbers = #tpu.dot_dimension_numbers<[1], [0], [0], [1], [0, 0, 1, 1], [], []>} : vector<8x28xbf16>, vector<28x512xbf16>, vector<8x512xf32> -> vector<8x512xf32>
    %36 = vector.broadcast %33 : vector<8x1xf32> to vector<8x512xf32>
    %37 = arith.addf %35, %36 : vector<8x512xf32>
    %c104 = arith.constant 104 : index
    %c0_20 = arith.constant 0 : index
    %38 = vector.load %arg2[%c104, %c0_20] : memref<472x128xbf16, #tpu.memory_space<vmem>>, vector<128x8xbf16>
    %c104_21 = arith.constant 104 : index
    %c8 = arith.constant 8 : index
    %39 = vector.load %arg2[%c104_21, %c8] : memref<472x128xbf16, #tpu.memory_space<vmem>>, vector<128x1xbf16>
    %40 = arith.extf %39 : vector<128x1xbf16> to vector<128x1xf32>
    %41 = arith.truncf %37 : vector<8x512xf32> to vector<8x512xbf16>
    %cst_22 = arith.constant dense<0.000000e+00> : vector<128x512xf32>
    %42 = tpu.matmul %38, %41, %cst_22 {dimension_numbers = #tpu.dot_dimension_numbers<[1], [0], [0], [1], [0, 0, 1, 1], [], []>} : vector<128x8xbf16>, vector<8x512xbf16>, vector<128x512xf32> -> vector<128x512xf32>
    %43 = vector.broadcast %40 : vector<128x1xf32> to vector<128x512xf32>
    %44 = vector.broadcast %1 : vector<1x512xf32> to vector<128x512xf32>
    %45 = arith.mulf %43, %44 : vector<128x512xf32>
    %46 = arith.addf %42, %45 : vector<128x512xf32>
    %c0_23 = arith.constant 0 : index
    %c4 = arith.constant 4 : index
    %47 = vector.load %arg3[%c0_23, %c4] : memref<128x8xf32, #tpu.memory_space<vmem>>, vector<128x1xf32>
    %48 = vector.broadcast %47 : vector<128x1xf32> to vector<128x512xf32>
    %49 = arith.addf %46, %48 : vector<128x512xf32>
    %cst_24 = arith.constant 0.000000e+00 : f32
    %50 = vector.broadcast %cst_24 : f32 to vector<128x512xf32>
    %51 = arith.cmpf ogt, %49, %50 : vector<128x512xf32>
    %cst_25 = arith.constant 0.00999999977 : f32
    %52 = vector.broadcast %cst_25 : f32 to vector<128x512xf32>
    %53 = arith.mulf %52, %49 : vector<128x512xf32>
    %54 = arith.select %51, %49, %53 : vector<128x512xi1>, vector<128x512xf32>
    %c232 = arith.constant 232 : index
    %c0_26 = arith.constant 0 : index
    %55 = vector.load %arg2[%c232, %c0_26] : memref<472x128xbf16, #tpu.memory_space<vmem>>, vector<128x128xbf16>
    %c0_27 = arith.constant 0 : index
    %c5 = arith.constant 5 : index
    %56 = vector.load %arg3[%c0_27, %c5] : memref<128x8xf32, #tpu.memory_space<vmem>>, vector<128x1xf32>
    %57 = arith.truncf %54 : vector<128x512xf32> to vector<128x512xbf16>
    %cst_28 = arith.constant dense<0.000000e+00> : vector<128x512xf32>
    %58 = tpu.matmul %55, %57, %cst_28 {dimension_numbers = #tpu.dot_dimension_numbers<[1], [0], [0], [1], [0, 0, 1, 1], [], []>} : vector<128x128xbf16>, vector<128x512xbf16>, vector<128x512xf32> -> vector<128x512xf32>
    %59 = vector.broadcast %56 : vector<128x1xf32> to vector<128x512xf32>
    %60 = arith.addf %58, %59 : vector<128x512xf32>
    %cst_29 = arith.constant 0.000000e+00 : f32
    %61 = vector.broadcast %cst_29 : f32 to vector<128x512xf32>
    %62 = arith.cmpf ogt, %60, %61 : vector<128x512xf32>
    %cst_30 = arith.constant 0.00999999977 : f32
    %63 = vector.broadcast %cst_30 : f32 to vector<128x512xf32>
    %64 = arith.mulf %63, %60 : vector<128x512xf32>
    %65 = arith.select %62, %60, %64 : vector<128x512xi1>, vector<128x512xf32>
    %c360 = arith.constant 360 : index
    %c0_31 = arith.constant 0 : index
    %66 = vector.load %arg2[%c360, %c0_31] : memref<472x128xbf16, #tpu.memory_space<vmem>>, vector<50x128xbf16>
    %c0_32 = arith.constant 0 : index
    %c6 = arith.constant 6 : index
    %67 = vector.load %arg3[%c0_32, %c6] : memref<128x8xf32, #tpu.memory_space<vmem>>, vector<50x1xf32>
    %68 = arith.truncf %65 : vector<128x512xf32> to vector<128x512xbf16>
    %cst_33 = arith.constant dense<0.000000e+00> : vector<50x512xf32>
    %69 = tpu.matmul %66, %68, %cst_33 {dimension_numbers = #tpu.dot_dimension_numbers<[1], [0], [0], [1], [0, 0, 1, 1], [], []>} : vector<50x128xbf16>, vector<128x512xbf16>, vector<50x512xf32> -> vector<50x512xf32>
    %70 = vector.broadcast %67 : vector<50x1xf32> to vector<50x512xf32>
    %71 = arith.addf %69, %70 : vector<50x512xf32>
    %cst_34 = arith.constant 0.000000e+00 : f32
    %72 = vector.broadcast %cst_34 : f32 to vector<50x512xf32>
    %73 = arith.maximumf %71, %72 : vector<50x512xf32>
    %c416 = arith.constant 416 : index
    %c0_35 = arith.constant 0 : index
    %74 = vector.load %arg2[%c416, %c0_35] : memref<472x128xbf16, #tpu.memory_space<vmem>>, vector<50x1xbf16>
    %75 = arith.extf %74 : vector<50x1xbf16> to vector<50x1xf32>
    %76 = vector.broadcast %75 : vector<50x1xf32> to vector<50x512xf32>
    %77 = arith.mulf %73, %76 : vector<50x512xf32>
    %cst_36 = arith.constant dense<0.000000e+00> : vector<512xf32>
    %78 = vector.multi_reduction <add>, %77, %cst_36 [0] : vector<50x512xf32> to vector<512xf32>
    %79 = vector.shape_cast %78 : vector<512xf32> to vector<1x512xf32>
    %c0_37 = arith.constant 0 : index
    %c7 = arith.constant 7 : index
    %80 = vector.load %arg3[%c0_37, %c7] : memref<128x8xf32, #tpu.memory_space<vmem>>, vector<1x1xf32>
    %81 = vector.broadcast %80 : vector<1x1xf32> to vector<1x512xf32>
    %82 = arith.addf %79, %81 : vector<1x512xf32>
    %cst_38 = arith.constant 0.000000e+00 : f32
    %83 = vector.broadcast %cst_38 : f32 to vector<1x512xf32>
    %84 = arith.subf %83, %82 : vector<1x512xf32>
    %85 = math.exp %84 : vector<1x512xf32>
    %cst_39 = arith.constant 1.000000e+00 : f32
    %86 = vector.broadcast %cst_39 : f32 to vector<1x512xf32>
    %87 = arith.addf %86, %85 : vector<1x512xf32>
    %cst_40 = arith.constant 1.000000e+00 : f32
    %88 = vector.broadcast %cst_40 : f32 to vector<1x512xf32>
    %89 = arith.divf %88, %87 : vector<1x512xf32>
    %c0_41 = arith.constant 0 : index
    %c0_42 = arith.constant 0 : index
    %90 = vector.load %arg4[%c0_41, %c0_42] : memref<1x512xf32, #tpu.memory_space<vmem>>, vector<1x512xf32>
    tpu.vector_store %arg4[%c0_41, %c0_42], %89 {strides = array<i32>} : memref<1x512xf32, #tpu.memory_space<vmem>>, vector<1x512xf32>,
    return
  }
  func.func @transform_0(%arg0: i32) -> (i32, i32) {
    %c0_i32 = arith.constant 0 : i32
    %c0_i32_0 = arith.constant 0 : i32
    return %c0_i32, %arg0 : i32, i32
  }
  func.func @transform_1(%arg0: i32) -> (i32, i32) {
    %c0_i32 = arith.constant 0 : i32
    %c0_i32_0 = arith.constant 0 : i32
    %c0_i32_1 = arith.constant 0 : i32
    return %c0_i32, %c0_i32_0 : i32, i32
  }
  func.func @transform_2(%arg0: i32) -> (i32, i32) {
    %c0_i32 = arith.constant 0 : i32
    %c0_i32_0 = arith.constant 0 : i32
    %c0_i32_1 = arith.constant 0 : i32
    return %c0_i32, %c0_i32_0 : i32, i32
  }
  func.func @transform_3(%arg0: i32) -> (i32, i32) {
    %c0_i32 = arith.constant 0 : i32
    %c0_i32_0 = arith.constant 0 : i32
    return %c0_i32, %arg0 : i32, i32
  }
}

</mosaic_0001>

<bundles_post_ra>
// kernel: net_forward.1
= control target key start
LH: loop header
LB: loop body
LE: loop exit
PB: predicated region body
PF: predicated region fallthrough
CT: control target
= control target key end

     0   :  { %s3198_s12 = smov 0   ;;  %s3200_s13 = smov 0   ;;  %s4638_s0 = inlined_call_operand.vmem [shape: f32[17,1024], index: 0, kind: input, shape index: {}]   ;;  %s4639_s1 = inlined_call_operand.vmem [shape: bf16[472,128], index: 1, kind: input, shape index: {}]   ;;  %s4640_s2 = inlined_call_operand.vmem [shape: f32[128,8], index: 2, kind: input, shape index: {}]   ;;  %s4641_s3 = inlined_call_operand.vmem [shape: f32[1,1024], index: 3, kind: output, shape index: {}]  }
   0x1   :  { %s3202_s14 = smov 0  }
   0x2 LB: > { %s2876_s15 = sadd.s32 4294967295, %s3166_s14   ;;  %s3215_s16 = sadd.s32 1, %s3166_s14   ;;  %s3166_s14 = sphi %s3202_s14, %s4731_s14   ;;  %s3162_s13 = sphi %s3200_s13, %s4730_s13   ;;  %s3158_s12 = sphi %s3198_s12, %s4729_s12  }
   0x3   : > { %s17_s17 = ssub.s32 %s3166_s14, %s3215_s16  ;;  %s20_s18 = sadd.s32 1, %s3162_s13 }
   0x4   : > { %p18_p0 = scmp.eq.s32.totalorder %s17_s17, 0  ;;  %p27_p1 = scmp.ne.s32.totalorder %s3162_s13, %s3158_s12 }
   0x5   : > { %p28_p2 = scmp.eq.s32.totalorder %s3166_s14, 0  ;;  %p2879_p4 = scmp.ge.s32.totalorder %s3166_s14, 2 }
   0x6   : > { %s3224_s19 = scalar_select %p18_p0, %s3162_s13, %s20_s18  }
   0x7   : > { %p29_p3 = por %p28_p2, %p27_p1  ;;  %127 = sbr.rel (%p2879_p4) target bundleno = 25 (0x19), region = 24 }
   0xe   : > { %130 = sbr.rel (!%p29_p3) target bundleno = 25 (0x19), region = 28  ;;  %s132_s20 = sand.u32 (%p29_p3), 1, %s3162_s13  }
   0xf   : > { %s2947_s21 = sshll.u32 (%p29_p3), %s3166_s14, 5  ;;  %s2963_s22 = smul.u32 (%p29_p3), 96, %s132_s20 }
  0x10   : > { %s137_s25 = scalar_lea.vmem (%p29_p3), %s4638_s0, %s2947_s21 }
  0x11   : > { %v150_v0 = vld [vmem:[%s137_s25] sm:$0xff] (%p29_p3)  ;;  %v152_v1 = vld [vmem:[%s137_s25 + $0x8] sm:$0xff] (%p29_p3)  ;;  %v154_v2 = vld [vmem:[%s137_s25 + $0x10] sm:$0xff] (%p29_p3)  ;;  %s134_s26 = scalar_lea.vmem (%p29_p3), [#allocation2], %s2963_s22 }
  0x12   : > { %v156_v3 = vld [vmem:[%s137_s25 + $0x18] sm:$0xff] (%p29_p3)  ;;  %v158_v4 = vld [vmem:[%s137_s25 + $0x40] sm:$0xff] (%p29_p3)  ;;  %v160_v5 = vld [vmem:[%s137_s25 + $0x48] sm:$0xff] (%p29_p3)  ;;  %151 = vst [vmem:[%s134_s26] sm:$0xff] (%p29_p3), %v150_v0 }
  0x13   : > { %153 = vst [vmem:[%s134_s26 + $0x8] sm:$0xff] (%p29_p3), %v152_v1  ;;  %155 = vst [vmem:[%s134_s26 + $0x10] sm:$0xff] (%p29_p3), %v154_v2  ;;  %v162_v6 = vld [vmem:[%s137_s25 + $0x50] sm:$0xff] (%p29_p3)  ;;  %v164_v7 = vld [vmem:[%s137_s25 + $0x58] sm:$0xff] (%p29_p3) }
  0x14   : > { %157 = vst [vmem:[%s134_s26 + $0x18] sm:$0xff] (%p29_p3), %v156_v3  ;;  %159 = vst [vmem:[%s134_s26 + $0x20] sm:$0xff] (%p29_p3), %v158_v4  ;;  %v166_v8 = vld [vmem:[%s137_s25 + $0x80] sm:$0xff] (%p29_p3)  ;;  %v168_v9 = vld [vmem:[%s137_s25 + $0x88] sm:$0xff] (%p29_p3) }
  0x15   : > { %161 = vst [vmem:[%s134_s26 + $0x28] sm:$0xff] %v160_v5  ;;  %163 = vst [vmem:[%s134_s26 + $0x30] sm:$0xff] %v162_v6  ;;  %v170_v10 = vld [vmem:[%s137_s25 + $0x90] sm:$0xff]  ;;  %v172_v11 = vld [vmem:[%s137_s25 + $0x98] sm:$0xff] }
  0x16   : > { %165 = vst [vmem:[%s134_s26 + $0x38] sm:$0xff] %v164_v7  ;;  %167 = vst [vmem:[%s134_s26 + $0x40] sm:$0xff] %v166_v8 }
  0x17   : > { %169 = vst [vmem:[%s134_s26 + $0x48] sm:$0xff] %v168_v9  ;;  %171 = vst [vmem:[%s134_s26 + $0x50] sm:$0xff] %v170_v10 }
  0x18   : > { %173 = vst [vmem:[%s134_s26 + $0x58] sm:$0xff] %v172_v11 }
  0x19 PF: > { %p2882_p5 = scmp.ge.s32.totalorder %s3166_s14, 1  ;;  %p178_p6 = scmp.lt.s32.totalorder %s3166_s14, 3 }
  0x1b   : > { %p179_p7 = pnand %p2882_p5, %p178_p6 }
  0x1d   : > { %182 = sbr.rel (%p179_p7) target bundleno = 1875 (0x753), region = 51 }
  0x24   : > { %s185_s27 = sand.u32 1, %s3158_s12   ;;  %v4643_v12 = vmov 0   ;;  %v3241_v13 = vld [vmem:[%s4640_s2] sm:$0xff]  ;;  %v3248_v14 = vld [vmem:[%s4640_s2 + $0x8] sm:$0xff]  ;;  %v3253_v15 = vld [vmem:[%s4640_s2 + $0x10] sm:$0xff]  ;;  %vm266_vm0 = vcmask 130048  }
  0x25   : > { %s2964_s28 = smul.u32 96, %s185_s27  ;;  %305 = vmatprep.mubr.bf16.mxu0 %v4643_v12  ;;  %358 = vmatprep.mubr.bf16.mxu1 %v4643_v12  ;;  %v3263_v18 = vld [vmem:[%s4640_s2 + $0x18] sm:$0xff]  ;;  %v3083_v27 = vld [vmem:[%s4639_s1] sm:$0xff]   ;;  %v3084_v30 = vld [vmem:[%s4639_s1 + $0x8] sm:$0xff]   ;;  %v3169_v31 = vmov 1   ;;  %s2883_s6 = sshll.u32 %s2876_s15, 2 }
  0x26   : > { %2999 = vset.pattern.permute.xlu0 %v4643_v12  ;;  %3000 = vset.pattern.permute.xlu1 %v4643_v12  ;;  %p209_p8 = scmp.lt.s32.totalorder %s2883_s6, 7 }
  0x27   : > { %238 = vperm.xlu0 %2999, %v3241_v13   ;;  %s3255_s8 = scalar_lea.vmem [#allocation2], %s2964_s28  ;;  %248 = vperm.xlu1 %3000, %v3253_v15  }
  0x28   : > { %v215_v16 = vld [vmem:[%s3255_s8 + $0x8] sm:$0xff]  ;;  %v217_v20 = vld [vmem:[%s3255_s8 + $0x18] sm:$0xff]  ;;  %v214_v22 = vld [vmem:[%s3255_s8] sm:$0xff]  ;;  %s4733_s6 = smov (!%p209_p8, %s2883_s6), 7 }
  0x29   : > { %v219_v17 = vld [vmem:[%s3255_s8 + $0x28] sm:$0xff]  ;;  %v221_v21 = vld [vmem:[%s3255_s8 + $0x38] sm:$0xff]  ;;  %v218_v24 = vld [vmem:[%s3255_s8 + $0x20] sm:$0xff]  ;;  %s211_s14 = scalar_lea.vmem %s4641_s3, %s4733_s6 }
  0x2a   : > { %v233_v19 = vpack.c.bf16 %v219_v17, %v215_v16  ;;  %v235_v23 = vpack.c.bf16 %v221_v21, %v217_v20  ;;  %v216_v25 = vld [vmem:[%s3255_s8 + $0x10] sm:$0xff]  ;;  %v232_v28 = vpack.c.bf16 %v218_v24, %v214_v22 }
  0x2b   : > { %v220_v26 = vld [vmem:[%s3255_s8 + $0x30] sm:$0xff]  ;;  %243 = vperm.xlu0 %2999, %v3248_v14   ;;  %253 = vperm.xlu1 %3000, %v3263_v18  }
  0x2c   : > { %273 = vmatprep.subr.bf16.mxu0 %v233_v19  ;;  %326 = vmatprep.subr.bf16.mxu1 %v235_v23  ;;  %v234_v29 = vpack.c.bf16 %v220_v26, %v216_v25 }
  0x2d   : > { %274 = vmatpush1.bf16.msra.mxu0 %v232_v28 }
  0x2e   : > { %327 = vmatpush1.bf16.msra.mxu1 %v234_v29 }
  0x2f   : > { %3002 = vset.pattern.permute.xlu1 %v3169_v31  ;;  %3001 = vset.pattern.permute.xlu0 %v3169_v31 }
  0x30   : > { %2887 = vmatmul.mubr.msk.bf16.vlgmr.msra.gmra.mrb[0].mxu0 %vm266_vm0, %v3083_v27  ;;  %444 = vperm.xlu1 %3002, %v3248_v14  }
  0x31   : > { %2889 = vmatmul.mubr.msk.bf16.vlgmr.msra.gmra.mrb[0].mxu1 %vm266_vm0, %v3083_v27  ;;  %315 = vmatprep.mubr.bf16.mxu0 %v4643_v12 }
  0x32   : > { %368 = vmatprep.mubr.bf16.mxu1 %v4643_v12  ;;  %440 = vperm.xlu0 %3001, %v3241_v13  }
  0x34   : > { %448 = vperm.xlu1 %3002, %v3253_v15  }
  0x36   : > { %452 = vperm.xlu0 %3001, %v3263_v18  }
  0x38   : > { %2888 = vmatmul.mubr.msk.bf16.gmra.mrb[4].mxu0 %vm266_vm0, %v3084_v30 }
  0x39   : > { %2890 = vmatmul.mubr.msk.bf16.gmra.mrb[4].mxu1 %vm266_vm0, %v3084_v30  ;;  %504 = vmatprep.mubr.bf16.mxu0 %v4643_v12 }
  0x3a   : > { %557 = vmatprep.mubr.bf16.mxu1 %v4643_v12 }
  0xa6   : > { %v239_v32 = vpop.permute.xlu0 %238  ;;  %v249_v56 = vpop.permute.xlu1 %248 }
  0xaa   : > { %v244_v33 = vpop.permute.xlu0 %243  ;;  %v254_v20 = vpop.permute.xlu1 %253 }
 0x103   : > { %v307_v34 = vpop.f32.mrb[0].mxu0 }
 0x104   : > { %v308_v35 = vadd.f32 %v307_v34, %v239_v32  ;;  %v360_v36 = vpop.f32.mrb[0].mxu1  ;;  %v309_v37 = vpop.f32.mrb[1].mxu0 }
 0x105   : > { %v361_v38 = vadd.f32 %v360_v36, %v239_v32  ;;  %v310_v39 = vadd.f32 %v309_v37, %v239_v32  ;;  %v362_v40 = vpop.f32.mrb[1].mxu1  ;;  %v311_v41 = vpop.f32.mrb[2].mxu0 }
 0x106   : > { %v395_v42 = vmul.f32 0.01, %v308_v35  ;;  %v363_v43 = vadd.f32 %v362_v40, %v239_v32  ;;  %v312_v44 = vadd.f32 %v311_v41, %v244_v33  ;;  %v364_v45 = vpop.f32.mrb[2].mxu1  ;;  %v313_v46 = vpop.f32.mrb[3].mxu0  ;;  %vm379_vm1 = vcmp.gt.f32.partialorder %v308_v35, 0.0 }
 0x107   : > { %vm381_vm2 = vcmp.gt.f32.partialorder %v361_v38, 0.0  ;;  %v397_v47 = vmul.f32 0.01, %v361_v38  ;;  %v396_v48 = vmul.f32 0.01, %v310_v39  ;;  %vm380_vm3 = vcmp.gt.f32.partialorder %v310_v39, 0.0 }
 0x108   : > { %v398_v49 = vmul.f32 0.01, %v363_v43  ;;  %vm383_vm4 = vcmp.gt.f32.partialorder %v312_v44, 0.0  ;;  %v366_v50 = vpop.f32.mrb[3].mxu1  ;;  %vm382_vm5 = vcmp.gt.f32.partialorder %v363_v43, 0.0  ;;  %v365_v52 = vadd.f32 %v364_v45, %v244_v33 }
 0x109   : > { %v399_v51 = vmul.f32 0.01, %v312_v44  ;;  %v314_v53 = vadd.f32 %v313_v46, %v244_v33  ;;  %v411_v54 = vsel %vm379_vm1, %v308_v35, %v395_v42  ;;  %v3287_v55 = vsel %vm381_vm2, %v361_v38, %v397_v47 }
 0x10a   : > { %v367_v57 = vadd.f32 %v366_v50, %v244_v33  ;;  %vm385_vm6 = vcmp.gt.f32.partialorder %v365_v52, 0.0  ;;  %v401_v59 = vmul.f32 0.01, %v365_v52  ;;  %v412_v61 = vsel %vm380_vm3, %v310_v39, %v396_v48  ;;  %v3086_v50 = vld [vmem:[%s4639_s1 + $0x18] sm:$0xff]  }
 0x10b   : > { %v415_v58 = vsel %vm383_vm4, %v312_v44, %v399_v51  ;;  %v317_v60 = vpop.f32.mrb[4].mxu0  ;;  %vm384_vm7 = vcmp.gt.f32.partialorder %v314_v53, 0.0  ;;  %v400_v63 = vmul.f32 0.01, %v314_v53  ;;  %v414_v1 = vsel %vm382_vm5, %v363_v43, %v398_v49  ;;  %v3085_v49 = vld [vmem:[%s4639_s1 + $0x10] sm:$0xff]  }
 0x10c   : > { %v431_v62 = vpack.c.bf16 %v415_v58, %v411_v54  ;;  %v370_v0 = vpop.f32.mrb[4].mxu1  ;;  %v417_v2 = vsel %vm385_vm6, %v365_v52, %v401_v59  ;;  %vm386_vm8 = vcmp.gt.f32.partialorder %v367_v57, 0.0  ;;  %v318_v3 = vadd.f32 %v317_v60, %v249_v56  ;;  %v319_v5 = vpop.f32.mrb[5].mxu0  ;;  %v601_v52 = vld [vmem:[%s4640_s2 + $0x18] sm:$0xf] }
 0x10d   : > { %v371_v4 = vadd.f32 %v370_v0, %v249_v56  ;;  %v372_v6 = vpop.f32.mrb[5].mxu1  ;;  %v433_v7 = vpack.c.bf16 %v417_v2, %v3287_v55  ;;  %v402_v8 = vmul.f32 0.01, %v367_v57  ;;  %v320_v9 = vadd.f32 %v319_v5, %v249_v56  ;;  %v321_v11 = vpop.f32.mrb[6].mxu0 }
 0x10e   : > { %v373_v10 = vadd.f32 %v372_v6, %v249_v56  ;;  %v374_v16 = vpop.f32.mrb[6].mxu1  ;;  %vm387_vm9 = vcmp.gt.f32.partialorder %v318_v3, 0.0  ;;  %v403_v17 = vmul.f32 0.01, %v318_v3  ;;  %v416_v19 = vsel %vm384_vm7, %v314_v53, %v400_v63  ;;  %v323_v27 = vpop.f32.mrb[7].mxu0 }
 0x10f   : > { %vm389_vm10 = vcmp.gt.f32.partialorder %v371_v4, 0.0  ;;  %v405_v21 = vmul.f32 0.01, %v371_v4  ;;  %vm388_vm11 = vcmp.gt.f32.partialorder %v320_v9, 0.0  ;;  %v404_v22 = vmul.f32 0.01, %v320_v9  ;;  %v441_v53 = vpop.permute.xlu0 %440  ;;  %v445_v54 = vpop.permute.xlu1 %444 }
 0x110   : > { %vm390_vm12 = vcmp.gt.f32.partialorder %v373_v10, 0.0  ;;  %v419_v23 = vsel %vm387_vm9, %v318_v3, %v403_v17  ;;  %v406_v24 = vmul.f32 0.01, %v373_v10  ;;  %v322_v25 = vadd.f32 %v321_v11, %v254_v20  ;;  %v376_v28 = vpop.f32.mrb[7].mxu1 }
 0x111   : > { %v375_v26 = vadd.f32 %v374_v16, %v254_v20  ;;  %v324_v29 = vadd.f32 %v323_v27, %v254_v20  ;;  %v377_v30 = vadd.f32 %v376_v28, %v254_v20  ;;  %v432_v31 = vpack.c.bf16 %v416_v19, %v412_v61 }
 0x112   : > { %v418_v32 = vsel %vm386_vm8, %v367_v57, %v402_v8  ;;  %vm391_vm13 = vcmp.gt.f32.partialorder %v322_v25, 0.0  ;;  %v407_v33 = vmul.f32 0.01, %v322_v25  ;;  %v421_v37 = vsel %vm389_vm10, %v371_v4, %v405_v21 }
 0x113   : > { %vm393_vm14 = vcmp.gt.f32.partialorder %v375_v26, 0.0  ;;  %v409_v34 = vmul.f32 0.01, %v375_v26  ;;  %vm392_vm15 = vcmp.gt.f32.partialorder %v324_v29, 0.0  ;;  %v408_v35 = vmul.f32 0.01, %v324_v29  ;;  %472 = vmatprep.subr.bf16.mxu0 %v432_v31 }
 0x114   : > { %vm394_vm0 = vcmp.gt.f32.partialorder %v377_v30, 0.0  ;;  %v410_v36 = vmul.f32 0.01, %v377_v30  ;;  %v423_v38 = vsel %vm391_vm13, %v322_v25, %v407_v33  ;;  %v434_v40 = vpack.c.bf16 %v418_v32, %v414_v1  ;;  %473 = vmatpush1.bf16.msra.mxu0 %v431_v62  ;;  %v453_v25 = vpop.permute.xlu0 %452 }
 0x115   : > { %v425_v39 = vsel %vm393_vm14, %v375_v26, %v409_v34  ;;  %v435_v41 = vpack.c.bf16 %v423_v38, %v419_v23  ;;  %v420_v43 = vsel %vm388_vm11, %v320_v9, %v404_v22  ;;  %v424_v44 = vsel %vm392_vm15, %v324_v29, %v408_v35  ;;  %v449_v9 = vpop.permute.xlu1 %448 }
 0x116   : > { %v437_v42 = vpack.c.bf16 %v425_v39, %v421_v37  ;;  %525 = vmatprep.subr.bf16.mxu1 %v434_v40  ;;  %v436_v45 = vpack.c.bf16 %v424_v44, %v420_v43  ;;  %v422_v46 = vsel %vm390_vm12, %v373_v10, %v406_v24  ;;  %v426_v47 = vsel %vm394_vm0, %v377_v30, %v410_v36 }
 0x117   : > { %526 = vmatpush1.bf16.msra.mxu1 %v433_v7  ;;  %v438_v48 = vpack.c.bf16 %v426_v47, %v422_v46  ;;  %vm465_vm1 = vcmask 261120   ;;  %v3170_v51 = vmov 2   ;;  %vm819_vm10 = vcmask 1045504  }
 0x118   : > { %474 = vmatprep.subr.bf16.mxu0 %v436_v45  ;;  %3003 = vset.pattern.permute.xlu1 %v3170_v51 }
 0x119   : > { %527 = vmatprep.subr.bf16.mxu1 %v438_v48  ;;  %475 = vmatpush1.bf16.msra.mxu0 %v435_v41 }
 0x11a   : > { %3004 = vset.pattern.permute.xlu0 %v3170_v51  ;;  %612 = vperm.xlu1 %3003, %v3241_v13  }
 0x11b   : > { %528 = vmatpush1.bf16.msra.mxu1 %v437_v42  ;;  %617 = vperm.xlu0 %3004, %v3248_v14  }
 0x11c   : > { %2893 = vmatmul.mubr.msk.bf16.vlgmr.msra.gmra.mrb[8].mxu0 %vm465_vm1, %v3085_v49 }
 0x11d   : > { %514 = vmatprep.mubr.bf16.mxu0 %v4643_v12 }
 0x11e   : > { %2895 = vmatmul.mubr.msk.bf16.vlgmr.msra.gmra.mrb[8].mxu1 %vm465_vm1, %v3085_v49  ;;  %622 = vperm.xlu1 %3003, %v3253_v15  }
 0x11f   : > { %567 = vmatprep.mubr.bf16.mxu1 %v4643_v12 }
 0x122   : > { %627 = vperm.xlu1 %3003, %v601_v52  }
 0x124   : > { %2894 = vmatmul.mubr.msk.bf16.gmra.mrb[12].mxu0 %vm465_vm1, %v3086_v50 }
 0x125   : > { %678 = vmatprep.mubr.bf16.mxu0 %v4643_v12 }
 0x126   : > { %2896 = vmatmul.mubr.msk.bf16.gmra.mrb[12].mxu1 %vm465_vm1, %v3086_v50 }
 0x127   : > { %731 = vmatprep.mubr.bf16.mxu1 %v4643_v12 }
 0x1ef   : > { %v506_v55 = vpop.f32.mrb[8].mxu0 }
 0x1f0   : > { %v507_v56 = vadd.f32 %v506_v55, %v441_v53  ;;  %v508_v57 = vpop.f32.mrb[9].mxu0  ;;  %v3088_v55 = vld [vmem:[%s4639_s1 + $0x28] sm:$0x3f]  }
 0x1f1   : > { %v559_v58 = vpop.f32.mrb[8].mxu1  ;;  %v509_v59 = vadd.f32 %v508_v57, %v441_v53  ;;  %v510_v60 = vpop.f32.mrb[10].mxu0 }
 0x1f2   : > { %v560_v61 = vadd.f32 %v559_v58, %v441_v53  ;;  %v561_v62 = vpop.f32.mrb[9].mxu1  ;;  %v511_v63 = vadd.f32 %v510_v60, %v445_v54  ;;  %v512_v0 = vpop.f32.mrb[11].mxu0  ;;  %v578_v4 = vmax.f32 %v507_v56, 0.0  ;;  %v3171_v56 = vmov 3  }
 0x1f3   : > { %v562_v1 = vadd.f32 %v561_v62, %v441_v53  ;;  %v563_v2 = vpop.f32.mrb[10].mxu1  ;;  %v513_v3 = vadd.f32 %v512_v0, %v445_v54  ;;  %v579_v8 = vmax.f32 %v509_v59, 0.0  ;;  %3005 = vset.pattern.permute.xlu0 %v3171_v56  ;;  %v613_v57 = vpop.permute.xlu1 %612 }
 0x1f4   : > { %v582_v5 = vmax.f32 %v511_v63, 0.0  ;;  %v564_v6 = vadd.f32 %v563_v2, %v445_v54  ;;  %v565_v7 = vpop.f32.mrb[11].mxu1  ;;  %v580_v16 = vmax.f32 %v560_v61, 0.0  ;;  %812 = vperm.xlu0 %3005, %v3241_v13   ;;  %v618_v59 = vpop.permute.xlu0 %617 }
 0x1f5   : > { %v583_v10 = vmax.f32 %v513_v3, 0.0  ;;  %v566_v11 = vadd.f32 %v565_v7, %v445_v54  ;;  %v581_v20 = vmax.f32 %v562_v1, 0.0  ;;  %v3087_v54 = vld [vmem:[%s4639_s1 + $0x20] sm:$0xff]  }
 0x1f6   : > { %v602_v17 = vpack.c.bf16 %v582_v5, %v578_v4  ;;  %v584_v19 = vmax.f32 %v564_v6, 0.0 }
 0x1f7   : > { %v603_v21 = vpack.c.bf16 %v583_v10, %v579_v8  ;;  %v585_v22 = vmax.f32 %v566_v11, 0.0  ;;  %v516_v23 = vpop.f32.mrb[12].mxu0  ;;  %v623_v60 = vpop.permute.xlu1 %622 }
 0x1f8   : > { %v604_v24 = vpack.c.bf16 %v584_v19, %v580_v16  ;;  %v517_v26 = vadd.f32 %v516_v23, %v449_v9  ;;  %v518_v27 = vpop.f32.mrb[13].mxu0 }
 0x1f9   : > { %v605_v28 = vpack.c.bf16 %v585_v22, %v581_v20  ;;  %v569_v29 = vpop.f32.mrb[12].mxu1  ;;  %v519_v30 = vadd.f32 %v518_v27, %v449_v9  ;;  %v520_v31 = vpop.f32.mrb[14].mxu0  ;;  %646 = vmatprep.subr.bf16.mxu0 %v603_v21 }
 0x1fa   : > { %v570_v32 = vadd.f32 %v569_v29, %v449_v9  ;;  %v571_v33 = vpop.f32.mrb[13].mxu1  ;;  %v521_v34 = vadd.f32 %v520_v31, %v453_v25  ;;  %v522_v35 = vpop.f32.mrb[15].mxu0  ;;  %647 = vmatpush1.bf16.msra.mxu0 %v602_v17  ;;  %v586_v39 = vmax.f32 %v517_v26, 0.0 }
 0x1fb   : > { %v572_v36 = vadd.f32 %v571_v33, %v449_v9  ;;  %v573_v37 = vpop.f32.mrb[14].mxu1  ;;  %699 = vmatprep.subr.bf16.mxu1 %v605_v28  ;;  %v523_v38 = vadd.f32 %v522_v35, %v453_v25  ;;  %v587_v43 = vmax.f32 %v519_v30, 0.0  ;;  %v628_v29 = vpop.permute.xlu1 %627 }
 0x1fc   : > { %v590_v40 = vmax.f32 %v521_v34, 0.0  ;;  %v574_v41 = vadd.f32 %v573_v37, %v453_v25  ;;  %v575_v42 = vpop.f32.mrb[15].mxu1  ;;  %700 = vmatpush1.bf16.msra.mxu1 %v604_v24  ;;  %v588_v46 = vmax.f32 %v570_v32, 0.0 }
 0x1fd   : > { %v591_v44 = vmax.f32 %v523_v38, 0.0  ;;  %v576_v45 = vadd.f32 %v575_v42, %v453_v25  ;;  %v589_v49 = vmax.f32 %v572_v36, 0.0 }
 0x1fe   : > { %v606_v47 = vpack.c.bf16 %v590_v40, %v586_v39  ;;  %v592_v48 = vmax.f32 %v574_v41, 0.0 }
 0x1ff   : > { %v607_v50 = vpack.c.bf16 %v591_v44, %v587_v43  ;;  %v593_v51 = vmax.f32 %v576_v45, 0.0 }
 0x200   : > { %v608_v52 = vpack.c.bf16 %v592_v48, %v588_v46 }
 0x201   : > { %v609_v53 = vpack.c.bf16 %v593_v51, %v589_v49  ;;  %648 = vmatprep.subr.bf16.mxu0 %v607_v50 }
 0x202   : > { %649 = vmatpush1.bf16.msra.mxu0 %v606_v47 }
 0x203   : > { %701 = vmatprep.subr.bf16.mxu1 %v609_v53 }
 0x204   : > { %702 = vmatpush1.bf16.msra.mxu1 %v608_v52 }
 0x205   : > { %2899 = vmatmul.mubr.msk.bf16.vlgmr.msra.gmra.mrb[16].mxu0 %vm465_vm1, %v3087_v54 }
 0x206   : > { %688 = vmatprep.mubr.bf16.mxu0 %v4643_v12 }
 0x207   : > { %2901 = vmatmul.mubr.msk.bf16.vlgmr.msra.gmra.mrb[16].mxu1 %vm465_vm1, %v3087_v54 }
 0x208   : > { %741 = vmatprep.mubr.bf16.mxu1 %v4643_v12 }
 0x20d   : > { %2900 = vmatmul.mubr.msk.bf16.gmra.mrb[20].mxu0 %vm465_vm1, %v3088_v55 }
 0x20e   : > { %864 = vmatprep.mubr.bf16.mxu0 %v4643_v12 }
 0x20f   : > { %2902 = vmatmul.mubr.msk.bf16.gmra.mrb[20].mxu1 %vm465_vm1, %v3088_v55 }
 0x210   : > { %905 = vmatprep.mubr.bf16.mxu1 %v4643_v12 }
 0x2d8   : > { %v680_v58 = vpop.f32.mrb[16].mxu0 }
 0x2d9   : > { %v681_v61 = vadd.f32 %v680_v58, %v613_v57  ;;  %v682_v62 = vpop.f32.mrb[17].mxu0 }
 0x2da   : > { %v733_v63 = vpop.f32.mrb[16].mxu1  ;;  %v683_v0 = vadd.f32 %v682_v62, %v613_v57  ;;  %v684_v1 = vpop.f32.mrb[18].mxu0 }
 0x2db   : > { %v768_v2 = vmul.f32 0.01, %v681_v61  ;;  %v734_v3 = vadd.f32 %v733_v63, %v613_v57  ;;  %v735_v4 = vpop.f32.mrb[17].mxu1  ;;  %v685_v5 = vadd.f32 %v684_v1, %v618_v59  ;;  %v686_v6 = vpop.f32.mrb[19].mxu0  ;;  %vm752_vm2 = vcmp.gt.f32.partialorder %v681_v61, 0.0 }
 0x2dc   : > { %v736_v7 = vadd.f32 %v735_v4, %v613_v57  ;;  %v737_v8 = vpop.f32.mrb[18].mxu1  ;;  %v687_v9 = vadd.f32 %v686_v6, %v618_v59  ;;  %vm753_vm3 = vcmp.gt.f32.partialorder %v683_v0, 0.0  ;;  %v769_v16 = vmul.f32 0.01, %v683_v0 }
 0x2dd   : > { %v770_v10 = vmul.f32 0.01, %v734_v3  ;;  %vm756_vm4 = vcmp.gt.f32.partialorder %v685_v5, 0.0  ;;  %v739_v11 = vpop.f32.mrb[19].mxu1  ;;  %vm754_vm5 = vcmp.gt.f32.partialorder %v734_v3, 0.0  ;;  %v738_v19 = vadd.f32 %v737_v8, %v618_v59 }
 0x2de   : > { %v772_v17 = vmul.f32 0.01, %v685_v5  ;;  %v784_v20 = vsel %vm752_vm2, %v681_v61, %v768_v2  ;;  %vm755_vm6 = vcmp.gt.f32.partialorder %v736_v7, 0.0  ;;  %v771_v21 = vmul.f32 0.01, %v736_v7 }
 0x2df   : > { %v740_v22 = vadd.f32 %v739_v11, %v618_v59  ;;  %vm758_vm7 = vcmp.gt.f32.partialorder %v738_v19, 0.0  ;;  %v774_v24 = vmul.f32 0.01, %v738_v19  ;;  %v773_v25 = vmul.f32 0.01, %v687_v9 }
 0x2e0   : > { %v788_v23 = vsel %vm756_vm4, %v685_v5, %v772_v17  ;;  %v690_v26 = vpop.f32.mrb[20].mxu0  ;;  %v786_v27 = vsel %vm754_vm5, %v734_v3, %v770_v10  ;;  %vm757_vm8 = vcmp.gt.f32.partialorder %v687_v9, 0.0  ;;  %v785_v36 = vsel %vm753_vm3, %v683_v0, %v769_v16  ;;  %v800_v16 = vld [vmem:[%s4639_s1 + $0x30] sm:$0xf]  ;;  %v3350_v17 = vld [vmem:[%s4639_s1 + $0x34] sm:$0xff]  }
 0x2e1   : > { %v802_v28 = vpack.c.bf16 %v788_v23, %v784_v20  ;;  %v691_v30 = vadd.f32 %v690_v26, %v623_v60  ;;  %v692_v31 = vpop.f32.mrb[21].mxu0  ;;  %v790_v32 = vsel %vm758_vm7, %v738_v19, %v774_v24  ;;  %vm759_vm9 = vcmp.gt.f32.partialorder %v740_v22, 0.0  ;;  %v3355_v19 = vld [vmem:[%s4639_s1 + $0x4c] sm:$0xff]   ;;  %v3360_v20 = vld [vmem:[%s4639_s1 + $0x3c] sm:$0xff]  }
 0x2e2   : > { %v743_v33 = vpop.f32.mrb[20].mxu1  ;;  %v693_v34 = vadd.f32 %v692_v31, %v623_v60  ;;  %v694_v35 = vpop.f32.mrb[22].mxu0  ;;  %v804_v37 = vpack.c.bf16 %v790_v32, %v786_v27  ;;  %v775_v42 = vmul.f32 0.01, %v740_v22  ;;  %v789_v46 = vsel %vm757_vm8, %v687_v9, %v773_v25 }
 0x2e3   : > { %vm760_vm11 = vcmp.gt.f32.partialorder %v691_v30, 0.0  ;;  %v776_v38 = vmul.f32 0.01, %v691_v30  ;;  %v744_v39 = vadd.f32 %v743_v33, %v623_v60  ;;  %v745_v40 = vpop.f32.mrb[21].mxu1  ;;  %v696_v41 = vpop.f32.mrb[23].mxu0  ;;  %v695_v44 = vadd.f32 %v694_v35, %v628_v29  ;;  %v3380_v35 = vld [vmem:[%s4639_s1 + $0x44] sm:$0xff]  }
 0x2e4   : > { %v746_v43 = vadd.f32 %v745_v40, %v623_v60  ;;  %v747_v45 = vpop.f32.mrb[22].mxu1  ;;  %vm761_vm12 = vcmp.gt.f32.partialorder %v693_v34, 0.0  ;;  %v787_v50 = vsel %vm755_vm6, %v736_v7, %v771_v21  ;;  %v777_v52 = vmul.f32 0.01, %v693_v34  ;;  %v3365_v21 = vld [vmem:[%s4639_s1 + $0x54] sm:$0xff]  }
 0x2e5   : > { %v778_v47 = vmul.f32 0.01, %v744_v39  ;;  %v748_v48 = vadd.f32 %v747_v45, %v628_v29  ;;  %v749_v49 = vpop.f32.mrb[23].mxu1  ;;  %v792_v51 = vsel %vm760_vm11, %v691_v30, %v776_v38  ;;  %vm762_vm13 = vcmp.gt.f32.partialorder %v744_v39, 0.0  ;;  %v3391_v40 = vld [vmem:[%s4640_s2 + $0x38] sm:$0xff] }
 0x2e6   : > { %vm764_vm14 = vcmp.gt.f32.partialorder %v695_v44, 0.0  ;;  %vm763_vm15 = vcmp.gt.f32.partialorder %v746_v43, 0.0  ;;  %v780_v53 = vmul.f32 0.01, %v695_v44  ;;  %v779_v55 = vmul.f32 0.01, %v746_v43 }
 0x2e7   : > { %vm766_vm0 = vcmp.gt.f32.partialorder %v748_v48, 0.0  ;;  %v782_v54 = vmul.f32 0.01, %v748_v48  ;;  %v697_v56 = vadd.f32 %v696_v41, %v628_v29  ;;  %v750_v57 = vadd.f32 %v749_v49, %v628_v29  ;;  %4653 = vst [vmem:[#allocation3_spill] sm:$0xff] %v3391_v40  ;;  %v1429_v41 = vld [vmem:[%s4640_s2 + $0x50] sm:$0xff]  ;;  %v3422_v45 = vld [vmem:[%s4639_s1 + $0x5c] sm:$0xff]  }
 0x2e8   : > { %v803_v58 = vpack.c.bf16 %v789_v46, %v785_v36  ;;  %v794_v59 = vsel %vm762_vm13, %v744_v39, %v778_v47  ;;  %v796_v60 = vsel %vm764_vm14, %v695_v44, %v780_v53  ;;  %v791_v62 = vsel %vm759_vm9, %v740_v22, %v775_v42  ;;  %v3428_v46 = vld [vmem:[%s4640_s2 + $0x30] sm:$0xff] }
 0x2e9   : > { %v798_v61 = vsel %vm766_vm0, %v748_v48, %v782_v54  ;;  %vm765_vm1 = vcmp.gt.f32.partialorder %v697_v56, 0.0  ;;  %v781_v63 = vmul.f32 0.01, %v697_v56  ;;  %vm767_vm2 = vcmp.gt.f32.partialorder %v750_v57, 0.0  ;;  %4655 = vst [vmem:[#allocation5_spill] sm:$0xff] %v3428_v46  ;;  %v1433_v49 = vld [vmem:[%s4640_s2 + $0x70] sm:$0xff] }
 0x2ea   : > { %v783_v0 = vmul.f32 0.01, %v750_v57  ;;  %832 = vmatprep.subr.bf16.mxu0 %v803_v58  ;;  %v805_v1 = vpack.c.bf16 %v791_v62, %v787_v50  ;;  %v806_v2 = vpack.c.bf16 %v796_v60, %v792_v51  ;;  %v808_v3 = vpack.c.bf16 %v798_v61, %v794_v59  ;;  %v3441_v51 = vld [vmem:[%s4639_s1 + $0x64] sm:$0xff]   ;;  %v813_v58 = vpop.permute.xlu0 %812 }
 0x2eb   : > { %833 = vmatpush1.bf16.msra.mxu0 %v802_v28  ;;  %v793_v4 = vsel %vm761_vm12, %v693_v34, %v777_v52  ;;  %v795_v5 = vsel %vm763_vm15, %v746_v43, %v779_v55  ;;  %v797_v6 = vsel %vm765_vm1, %v697_v56, %v781_v63  ;;  %vm815_vm3 = vcmask 228352   ;;  %v3446_v52 = vld [vmem:[%s4640_s2 + $0x40] sm:$0xff]  ;;  %v1430_v56 = vld [vmem:[%s4640_s2 + $0x58] sm:$0xff]  ;;  %v1432_v62 = vld [vmem:[%s4640_s2 + $0x68] sm:$0xff] }
 0x2ec   : > { %v799_v7 = vsel %vm767_vm2, %v750_v57, %v783_v0  ;;  %v807_v8 = vpack.c.bf16 %v797_v6, %v793_v4  ;;  %873 = vmatprep.subr.bf16.mxu1 %v805_v1  ;;  %v821_v10 = vsel %vm819_vm10, %v806_v2, 0  ;;  %v827_v11 = vsel %vm819_vm10, %v808_v3, 0  ;;  %4656 = vst [vmem:[#allocation6_spill] sm:$0xff] %v3446_v52  ;;  %v1431_v57 = vld [vmem:[%s4640_s2 + $0x60] sm:$0xff] }
 0x2ed   : > { %v809_v9 = vpack.c.bf16 %v799_v7, %v795_v5  ;;  %874 = vmatpush1.bf16.msra.mxu1 %v804_v37  ;;  %v936_v22 = vunpack.c.l.bf16 %v3355_v19  ;;  %v937_v23 = vunpack.c.h.bf16 %v3355_v19  ;;  %v930_v24 = vunpack.c.l.bf16 %v3350_v17 }
 0x2ee   : > { %2903 = vmatprep.subr.msk.bf16.mxu0 %vm819_vm10, %v807_v8  ;;  %v3172_v25 = vmov 8   ;;  %v931_v26 = vunpack.c.h.bf16 %v3350_v17  ;;  %v938_v27 = vunpack.c.l.bf16 %v3365_v21  ;;  %v939_v28 = vunpack.c.h.bf16 %v3365_v21 }
 0x2ef   : > { %2905 = vmatprep.subr.msk.bf16.mxu1 %vm819_vm10, %v809_v9  ;;  %835 = vmatpush1.bf16.msra.mxu0 %v821_v10  ;;  %v932_v29 = vunpack.c.l.bf16 %v3360_v20  ;;  %v3026_v30 = vpack.i.bf16 %v937_v23, %v936_v22  ;;  %v933_v31 = vunpack.c.h.bf16 %v3360_v20  ;;  %v934_v36 = vunpack.c.l.bf16 %v3380_v35 }
 0x2f0   : > { %3025 = vset.pattern.permute.xlu0 %v3172_v25  ;;  %3006 = vset.pattern.permute.xlu1 %v3172_v25  ;;  %v3007_v32 = vpack.i.bf16 %v931_v26, %v930_v24  ;;  %v3031_v33 = vpack.i.bf16 %v939_v28, %v938_v27  ;;  %v935_v37 = vunpack.c.h.bf16 %v3380_v35  ;;  %v3173_v38 = vmov 4  }
 0x2f1   : > { %876 = vmatpush1.bf16.msra.mxu1 %v827_v11  ;;  %3027 = vperm.xlu0 %3025, %v3026_v30   ;;  %v3012_v34 = vpack.i.bf16 %v933_v31, %v932_v29  ;;  %v940_v47 = vunpack.c.l.bf16 %v3422_v45  ;;  %v941_v48 = vunpack.c.h.bf16 %v3422_v45  ;;  %v942_v53 = vunpack.c.l.bf16 %v3441_v51 }
 0x2f2   : > { %2904 = vmatmul.mubr.msk.bf16.vlgmr.msra.gmra.mrb[24].mxu0 %vm815_vm3, %v800_v16  ;;  %3008 = vperm.xlu1 %3006, %v3007_v32   ;;  %v3019_v39 = vpack.i.bf16 %v935_v37, %v934_v36  ;;  %v943_v54 = vunpack.c.h.bf16 %v3441_v51  ;;  %vm1180_vm4 = vcmask 1043456   ;;  %vm1155_vm5 = vcmask 64512  }
 0x2f3   : > { %1225 = vmatprep.mubr.bf16.mxu0 %v4643_v12  ;;  %v3038_v50 = vpack.i.bf16 %v941_v48, %v940_v47  ;;  %v4642_v28 = vlaneseq }
 0x2f4   : > { %2906 = vmatmul.mubr.msk.bf16.vlgmr.msra.gmra.mrb[24].mxu1 %vm815_vm3, %v800_v16  ;;  %v3045_v55 = vpack.i.bf16 %v943_v54, %v942_v53  ;;  %v1434_v16 = vld [vmem:[%s4640_s2 + $0x78] sm:$0xff] }
 0x2f5   : > { %1338 = vmatprep.mubr.bf16.mxu1 %v4643_v12  ;;  %3032 = vperm.xlu0 %3025, %v3031_v33   ;;  %v3525_v30 = vshrl.u32 %v4642_v28, 7 }
 0x2f6   : > { %3013 = vperm.xlu1 %3006, %v3012_v34   ;;  %v2884_v34 = vld [vmem:[%s3255_s8 + $0x40] ss:$8 sm:$0xf] }
 0x2f7   : > { %4657 = vst [vmem:[#allocation7_spill] sm:$0xff] %v3525_v30  ;;  %v1033_v33 = vsub.s32 0, %v3525_v30  ;;  %v1041_v36 = vsub.s32 2, %v3525_v30  ;;  %v1045_v37 = vsub.s32 3, %v3525_v30 }
 0x2f9   : > { %3036 = vset.pattern.permute.xlu0 %v3173_v38 }
 0x2fa   : > { %1437 = vperm.xlu0 %3036, %v3241_v13   ;;  %3017 = vset.pattern.permute.xlu1 %v3173_v38  ;;  %v1428_v13 = vld [vmem:[%s4640_s2 + $0x48] sm:$0xff] }
 0x2fb   : > { %1442 = vperm.xlu1 %3017, %v3248_v14   ;;  %v3401_v14 = vld [vmem:[%s4639_s1 + $0x6c] sm:$0xff]  }
 0x2fc   : > { %v944_v42 = vunpack.c.l.bf16 %v3401_v14  ;;  %v945_v43 = vunpack.c.h.bf16 %v3401_v14 }
 0x2fe   : > { %1447 = vperm.xlu0 %3036, %v3253_v15   ;;  %v3406_v15 = vld [vmem:[%s4640_s2 + $0x20] sm:$0xff]  ;;  %v3052_v44 = vpack.i.bf16 %v945_v43, %v944_v42  ;;  %v3544_v42 = vrot.slane %v2884_v34, %v1041_v36  ;;  %v3546_v43 = vrot.slane %v2884_v34, %v1045_v37 }
 0x2ff   : > { %3018 = vset.pattern.permute.xlu1 %v3172_v25 }
 0x300   : > { %3020 = vperm.xlu1 %3018, %v3019_v39  }
 0x302   : > { %1472 = vperm.xlu0 %3036, %v3391_v40  }
 0x304   : > { %3024 = vset.pattern.permute.xlu1 %v3173_v38 }
 0x305   : > { %1452 = vperm.xlu1 %3024, %v3263_v18   ;;  %v3417_v18 = vld [vmem:[%s4640_s2 + $0x28] sm:$0xff] }
 0x306   : > { %1482 = vperm.xlu0 %3036, %v1428_v13   ;;  %4654 = vst [vmem:[#allocation4_spill] sm:$0xff] %v3417_v18  ;;  %v3540_v13 = vrot.slane %v2884_v34, %v1033_v33 }
 0x309   : > { %1457 = vperm.xlu1 %3024, %v3406_v15  }
 0x30a   : > { %1487 = vperm.xlu0 %3036, %v1429_v41  }
 0x30d   : > { %1462 = vperm.xlu1 %3024, %v3417_v18  }
 0x30e   : > { %3051 = vset.pattern.permute.xlu0 %v3172_v25 }
 0x30f   : > { %3053 = vperm.xlu0 %3051, %v3052_v44  }
 0x311   : > { %1467 = vperm.xlu1 %3024, %v3428_v46  }
 0x313   : > { %3057 = vset.pattern.permute.xlu0 %v3173_v38 }
 0x314   : > { %1507 = vperm.xlu0 %3057, %v1433_v49  }
 0x315   : > { %3037 = vset.pattern.permute.xlu1 %v3172_v25 }
 0x316   : > { %3039 = vperm.xlu1 %3037, %v3038_v50  }
 0x31a   : > { %3043 = vset.pattern.permute.xlu1 %v3173_v38 }
 0x31b   : > { %1477 = vperm.xlu1 %3043, %v3446_v52  }
 0x31f   : > { %3044 = vset.pattern.permute.xlu1 %v3172_v25 }
 0x320   : > { %3046 = vperm.xlu1 %3044, %v3045_v55  }
 0x324   : > { %3050 = vset.pattern.permute.xlu1 %v3173_v38 }
 0x325   : > { %1492 = vperm.xlu1 %3050, %v1430_v56  }
 0x329   : > { %1497 = vperm.xlu1 %3050, %v1431_v57  }
 0x32d   : > { %1502 = vperm.xlu1 %3050, %v1432_v62  }
 0x331   : > { %1512 = vperm.xlu1 %3050, %v1434_v16  }
 0x370   : > { %v3028_v24 = vpop.permute.xlu0 %3027 }
 0x371   : > { %v3030_v47 = vunpack.i.h.bf16 %v3028_v24  ;;  %v3029_v48 = vunpack.i.l.bf16 %v3028_v24 }
 0x373   : > { %v3634_v37 = vmul.f32 %v3029_v48, %v3546_v43 }
 0x374   : > { %v3033_v26 = vpop.permute.xlu0 %3032 }
 0x375   : > { %v3034_v53 = vunpack.i.l.bf16 %v3033_v26 }
 0x379   : > { %v3522_v29 = vpop.permute.xlu0 %1437 }
 0x37d   : > { %v3529_v32 = vpop.permute.xlu0 %1447 }
 0x381   : > { %v3538_v39 = vpop.permute.xlu0 %1472 }
 0x385   : > { %v3551_v56 = vpop.permute.xlu0 %1482 }
 0x386   : > { %4658 = vst [vmem:[#allocation8_spill] sm:$0xff] %v3551_v56 }
 0x3c5   : > { %v866_v59 = vpop.f32.mrb[24].mxu0 }
 0x3c6   : > { %v867_v60 = vadd.f32 %v866_v59, %v813_v58  ;;  %v868_v61 = vpop.f32.mrb[25].mxu0 }
 0x3c7   : > { %v907_v63 = vpop.f32.mrb[24].mxu1  ;;  %v869_v0 = vadd.f32 %v868_v61, %v813_v58  ;;  %v870_v1 = vpop.f32.mrb[26].mxu0 }
 0x3c8   : > { %v946_v2 = vpack.c.bf16 %v867_v60, %v867_v60  ;;  %v908_v3 = vadd.f32 %v907_v63, %v813_v58  ;;  %v909_v4 = vpop.f32.mrb[25].mxu1  ;;  %v871_v5 = vpop.f32.mrb[27].mxu0 }
 0x3c9   : > { %v947_v6 = vpack.c.bf16 %v869_v0, %v869_v0  ;;  %v910_v7 = vadd.f32 %v909_v4, %v813_v58  ;;  %v911_v8 = vpop.f32.mrb[26].mxu1 }
 0x3ca   : > { %v1182_v9 = vsel %vm1180_vm4, %v946_v2, 0  ;;  %v948_v10 = vpack.c.bf16 %v908_v3, %v908_v3  ;;  %v912_v11 = vpop.f32.mrb[27].mxu1 }
 0x3cb   : > { %v949_v22 = vpack.c.bf16 %v910_v7, %v910_v7  ;;  %2915 = vmatprep.subr.msk.bf16.mxu0 %vm1180_vm4, %v947_v6 }
 0x3cc   : > { %v1188_v23 = vsel %vm1180_vm4, %v948_v10, 0  ;;  %1194 = vmatpush1.bf16.msra.mxu0 %v1182_v9 }
 0x3cd   : > { %2924 = vmatprep.subr.msk.bf16.mxu1 %vm1180_vm4, %v949_v22 }
 0x3ce   : > { %1307 = vmatpush1.bf16.msra.mxu1 %v1188_v23  ;;  %v3610_v23 = vpop.permute.xlu0 %1487 }
 0x3cf   : > { %2916 = vmatmul.mubr.msk.bf16.vlgmr.msra.gmra.mrb[28].mxu0 %vm1155_vm5, %v3350_v17  ;;  %4660 = vst [vmem:[#allocation10_spill] sm:$0xff] %v3610_v23 }
 0x3d0   : > { %1235 = vmatprep.mubr.bf16.mxu0 %v4643_v12 }
 0x3d1   : > { %2925 = vmatmul.mubr.msk.bf16.vlgmr.msra.gmra.mrb[28].mxu1 %vm1155_vm5, %v3350_v17  ;;  %v3009_v17 = vpop.permute.xlu1 %3008 }
 0x3d2   : > { %1348 = vmatprep.mubr.bf16.mxu1 %v4643_v12  ;;  %v3054_v23 = vpop.permute.xlu0 %3053 }
 0x3d7   : > { %2917 = vmatmul.mubr.msk.bf16.gmra.mrb[32].mxu0 %vm1155_vm5, %v3360_v20 }
 0x3d8   : > { %1245 = vmatprep.mubr.bf16.mxu0 %v4643_v12 }
 0x3d9   : > { %2926 = vmatmul.mubr.msk.bf16.gmra.mrb[32].mxu1 %vm1155_vm5, %v3360_v20 }
 0x3da   : > { %1358 = vmatprep.mubr.bf16.mxu1 %v4643_v12 }
 0x3df   : > { %2918 = vmatmul.mubr.msk.bf16.gmra.mrb[36].mxu0 %vm1155_vm5, %v3380_v35 }
 0x3e0   : > { %1255 = vmatprep.mubr.bf16.mxu0 %v4643_v12 }
 0x3e1   : > { %2927 = vmatmul.mubr.msk.bf16.gmra.mrb[36].mxu1 %vm1155_vm5, %v3380_v35  ;;  %v1037_v35 = vsub.s32 1, %v3525_v30  ;;  %v3658_v30 = vmul.f32 %v3034_v53, %v3546_v43 }
 0x3e2   : > { %1368 = vmatprep.mubr.bf16.mxu1 %v4643_v12 }
 0x3e3   : > { %v3542_v41 = vrot.slane %v2884_v34, %v1037_v35  ;;  %v3625_v34 = vmul.f32 %v3029_v48, %v3540_v13  ;;  %v3628_v35 = vmul.f32 %v3029_v48, %v3544_v42  ;;  %4663 = vst [vmem:[#allocation13_spill] sm:$0xff] %v3658_v30 }
 0x3e5   : > { %v3631_v36 = vmul.f32 %v3029_v48, %v3542_v41 }
 0x3e7   : > { %2919 = vmatmul.mubr.msk.bf16.gmra.mrb[40].mxu0 %vm1155_vm5, %v3355_v19 }
 0x3e8   : > { %1265 = vmatprep.mubr.bf16.mxu0 %v4643_v12 }
 0x3e9   : > { %2928 = vmatmul.mubr.msk.bf16.gmra.mrb[40].mxu1 %vm1155_vm5, %v3355_v19  ;;  %v3014_v19 = vpop.permute.xlu1 %3013 }
 0x3ea   : > { %1378 = vmatprep.mubr.bf16.mxu1 %v4643_v12  ;;  %v3015_v49 = vunpack.i.l.bf16 %v3014_v19  ;;  %v3016_v54 = vunpack.i.h.bf16 %v3014_v19 }
 0x3ec   : > { %v3573_v1 = vmul.f32 %v3015_v49, %v3540_v13  ;;  %v3576_v2 = vmul.f32 %v3015_v49, %v3544_v42  ;;  %v3579_v3 = vmul.f32 %v3015_v49, %v3542_v41  ;;  %v3582_v4 = vmul.f32 %v3015_v49, %v3546_v43 }
 0x3ed   : > { %v3516_v20 = vpop.permute.xlu1 %1442  ;;  %v3587_v6 = vmul.f32 %v3016_v54, %v3540_v13  ;;  %v3590_v7 = vmul.f32 %v3016_v54, %v3544_v42  ;;  %v3593_v8 = vmul.f32 %v3016_v54, %v3542_v41  ;;  %v3596_v9 = vmul.f32 %v3016_v54, %v3546_v43 }
 0x3ee   : > { %v3646_v49 = vmul.f32 %v3030_v47, %v3546_v43 }
 0x3ef   : > { %2920 = vmatmul.mubr.msk.bf16.gmra.mrb[44].mxu0 %vm1155_vm5, %v3365_v21 }
 0x3f0   : > { %1275 = vmatprep.mubr.bf16.mxu0 %v4643_v12 }
 0x3f1   : > { %2929 = vmatmul.mubr.msk.bf16.gmra.mrb[44].mxu1 %vm1155_vm5, %v3365_v21  ;;  %v3021_v21 = vpop.permute.xlu1 %3020 }
 0x3f2   : > { %1388 = vmatprep.mubr.bf16.mxu1 %v4643_v12  ;;  %v3023_v55 = vunpack.i.h.bf16 %v3021_v21  ;;  %v3022_v57 = vunpack.i.l.bf16 %v3021_v21 }
 0x3f4   : > { %v3599_v10 = vmul.f32 %v3022_v57, %v3540_v13  ;;  %v3602_v11 = vmul.f32 %v3022_v57, %v3544_v42  ;;  %v3605_v16 = vmul.f32 %v3022_v57, %v3542_v41  ;;  %v3608_v22 = vmul.f32 %v3022_v57, %v3546_v43 }
 0x3f5   : > { %v3518_v25 = vpop.permute.xlu1 %1452  ;;  %v3616_v19 = vmul.f32 %v3023_v55, %v3544_v42  ;;  %v3619_v21 = vmul.f32 %v3023_v55, %v3542_v41  ;;  %v3622_v24 = vmul.f32 %v3023_v55, %v3546_v43  ;;  %v3652_v57 = vmul.f32 %v3034_v53, %v3544_v42 }
 0x3f7   : > { %2921 = vmatmul.mubr.msk.bf16.gmra.mrb[48].mxu0 %vm1155_vm5, %v3422_v45  ;;  %4661 = vst [vmem:[#allocation11_spill] sm:$0xff] %v3652_v57 }
 0x3f8   : > { %1285 = vmatprep.mubr.bf16.mxu0 %v4643_v12 }
 0x3f9   : > { %2930 = vmatmul.mubr.msk.bf16.gmra.mrb[48].mxu1 %vm1155_vm5, %v3422_v45  ;;  %v3520_v27 = vpop.permute.xlu1 %1457  ;;  %v3011_v45 = vunpack.i.h.bf16 %v3009_v17 }
 0x3fa   : > { %1398 = vmatprep.mubr.bf16.mxu1 %v4643_v12 }
 0x3fb   : > { %v3561_v61 = vmul.f32 %v3011_v45, %v3540_v13  ;;  %v3564_v62 = vmul.f32 %v3011_v45, %v3544_v42  ;;  %v3567_v63 = vmul.f32 %v3011_v45, %v3542_v41  ;;  %v3570_v0 = vmul.f32 %v3011_v45, %v3546_v43 }
 0x3fc   : > { %v3640_v45 = vmul.f32 %v3030_v47, %v3544_v42 }
 0x3fd   : > { %v3527_v31 = vpop.permute.xlu1 %1462 }
 0x3ff   : > { %2922 = vmatmul.mubr.msk.bf16.gmra.mrb[52].mxu0 %vm1155_vm5, %v3441_v51 }
 0x400   : > { %1295 = vmatprep.mubr.bf16.mxu0 %v4643_v12 }
 0x401   : > { %2931 = vmatmul.mubr.msk.bf16.gmra.mrb[52].mxu1 %vm1155_vm5, %v3441_v51  ;;  %v3536_v38 = vpop.permute.xlu1 %1467  ;;  %v3035_v51 = vunpack.i.h.bf16 %v3033_v26 }
 0x402   : > { %1408 = vmatprep.mubr.bf16.mxu1 %v4643_v12 }
 0x403   : > { %v3661_v40 = vmul.f32 %v3035_v51, %v3540_v13  ;;  %v3667_v52 = vmul.f32 %v3035_v51, %v3542_v41  ;;  %v3670_v18 = vmul.f32 %v3035_v51, %v3546_v43 }
 0x405   : > { %v3040_v44 = vpop.permute.xlu1 %3039  ;;  %4664 = vst [vmem:[#allocation14_spill] sm:$0xff] %v3661_v40  ;;  %4666 = vst [vmem:[#allocation16_spill] sm:$0xff] %v3667_v52 }
 0x406   : > { %v3042_v26 = vunpack.i.h.bf16 %v3040_v44  ;;  %v3041_v33 = vunpack.i.l.bf16 %v3040_v44  ;;  %v3643_v44 = vmul.f32 %v3030_v47, %v3542_v41  ;;  %4667 = vst [vmem:[#allocation17_spill] sm:$0xff] %v3670_v18 }
 0x407   : > { %2923 = vmatmul.mubr.msk.bf16.gmra.mrb[56].mxu0 %vm1155_vm5, %v3401_v14 }
 0x408   : > { %1963 = vmatprep.mubr.bf16.mxu0 %v4643_v12  ;;  %v3673_v46 = vmul.f32 %v3041_v33, %v3540_v13  ;;  %v3679_v56 = vmul.f32 %v3041_v33, %v3542_v41  ;;  %v3685_v40 = vmul.f32 %v3042_v26, %v3540_v13  ;;  %v3691_v18 = vmul.f32 %v3042_v26, %v3542_v41 }
 0x409   : > { %2932 = vmatmul.mubr.msk.bf16.gmra.mrb[56].mxu1 %vm1155_vm5, %v3401_v14  ;;  %v3010_v14 = vunpack.i.l.bf16 %v3009_v17  ;;  %v3584_v5 = vpop.permute.xlu1 %1477  ;;  %v3613_v17 = vmul.f32 %v3023_v55, %v3540_v13  ;;  %v3649_v55 = vmul.f32 %v3034_v53, %v3540_v13 }
 0x40a   : > { %2076 = vmatprep.mubr.bf16.mxu1 %v4643_v12  ;;  %4659 = vst [vmem:[#allocation9_spill] sm:$0xff] %v3584_v5  ;;  %v3655_v12 = vmul.f32 %v3034_v53, %v3542_v41  ;;  %4668 = vst [vmem:[#allocation18_spill] sm:$0xff] %v3673_v46  ;;  %v3676_v53 = vmul.f32 %v3041_v33, %v3544_v42  ;;  %v3682_v5 = vmul.f32 %v3041_v33, %v3546_v43 }
 0x40b   : > { %v3549_v50 = vmul.f32 %v3010_v14, %v3540_v13  ;;  %v3554_v58 = vmul.f32 %v3010_v14, %v3544_v42  ;;  %v1052_v59 = vmul.f32 %v3010_v14, %v3542_v41  ;;  %v3558_v60 = vmul.f32 %v3010_v14, %v3546_v43  ;;  %4670 = vst [vmem:[#allocation20_spill] sm:$0xff] %v3679_v56 }
 0x40c   : > { %v3637_v14 = vmul.f32 %v3030_v47, %v3540_v13  ;;  %4662 = vst [vmem:[#allocation12_spill] sm:$0xff] %v3655_v12  ;;  %v3664_v47 = vmul.f32 %v3035_v51, %v3544_v42  ;;  %4669 = vst [vmem:[#allocation19_spill] sm:$0xff] %v3676_v53  ;;  %v3688_v51 = vmul.f32 %v3042_v26, %v3544_v42  ;;  %v3055_v46 = vunpack.i.l.bf16 %v3054_v23 }
 0x40d   : > { %v3047_v54 = vpop.permute.xlu1 %3046  ;;  %4671 = vst [vmem:[#allocation21_spill] sm:$0xff] %v3682_v5  ;;  %4672 = vst [vmem:[#allocation22_spill] sm:$0xff] %v3685_v40  ;;  %v3695_v56 = vmul.f32 %v3042_v26, %v3546_v43 }
 0x40e   : > { %v3049_v48 = vunpack.i.h.bf16 %v3047_v54  ;;  %v3048_v28 = vunpack.i.l.bf16 %v3047_v54  ;;  %4665 = vst [vmem:[#allocation15_spill] sm:$0xff] %v3664_v47  ;;  %4673 = vst [vmem:[#allocation23_spill] sm:$0xff] %v3688_v51 }
 0x40f   : > { %4674 = vst [vmem:[#allocation24_spill] sm:$0xff] %v3691_v18  ;;  %4675 = vst [vmem:[#allocation25_spill] sm:$0xff] %v3695_v56 }
 0x410   : > { %v3698_v33 = vmul.f32 %v3048_v28, %v3540_v13  ;;  %v3701_v5 = vmul.f32 %v3048_v28, %v3544_v42  ;;  %v3704_v57 = vmul.f32 %v3048_v28, %v3542_v41  ;;  %v3707_v18 = vmul.f32 %v3048_v28, %v3546_v43 }
 0x411   : > { %v3722_v28 = vmul.f32 %v3049_v48, %v3546_v43 }
 0x412   : > { %4676 = vst [vmem:[#allocation26_spill] sm:$0xff] %v3698_v33  ;;  %4677 = vst [vmem:[#allocation27_spill] sm:$0xff] %v3701_v5  ;;  %v3712_v33 = vmul.f32 %v3049_v48, %v3540_v13  ;;  %v3715_v5 = vmul.f32 %v3049_v48, %v3544_v42 }
 0x413   : > { %4678 = vst [vmem:[#allocation28_spill] sm:$0xff] %v3704_v57  ;;  %v3719_v57 = vmul.f32 %v3049_v48, %v3542_v41  ;;  %4681 = vst [vmem:[#allocation31_spill] sm:$0xff] %v3722_v28  ;;  %v3740_v48 = vmul.f32 %v3055_v46, %v3546_v43 }
 0x414   : > { %4679 = vst [vmem:[#allocation29_spill] sm:$0xff] %v3715_v5 }
 0x415   : > { %4680 = vst [vmem:[#allocation30_spill] sm:$0xff] %v3719_v57  ;;  %4685 = vst [vmem:[#allocation35_spill] sm:$0xff] %v3740_v48 }
 0x4a2   : > { %v1227_v54 = vpop.f32.mrb[28].mxu0 }
 0x4a3   : > { %v1229_v47 = vpop.f32.mrb[29].mxu0  ;;  %v1228_v52 = vadd.f32 %v1227_v54, %v3549_v50  ;;  %v3056_v50 = vunpack.i.h.bf16 %v3054_v23 }
 0x4a4   : > { %v1340_v53 = vpop.f32.mrb[28].mxu1  ;;  %v1231_v30 = vpop.f32.mrb[30].mxu0  ;;  %v1230_v40 = vadd.f32 %v1229_v47, %v1052_v59 }
 0x4a5   : > { %v1342_v12 = vpop.f32.mrb[29].mxu1  ;;  %v1233_v51 = vpop.f32.mrb[31].mxu0  ;;  %v1341_v54 = vadd.f32 %v1340_v53, %v3554_v58  ;;  %v1232_v26 = vadd.f32 %v1231_v30, %v3561_v61  ;;  %v3725_v58 = vmul.f32 %v3055_v46, %v3540_v13  ;;  %v1515_v30 = vadd.f32 %v3522_v29, %v1228_v52 }
 0x4a6   : > { %v1344_v56 = vpop.f32.mrb[30].mxu1  ;;  %v1343_v59 = vadd.f32 %v1342_v12, %v3558_v60  ;;  %v1234_v23 = vadd.f32 %v1233_v51, %v3567_v63  ;;  %v3731_v53 = vmul.f32 %v3055_v46, %v3544_v42  ;;  %v3734_v12 = vadd.f32 %v3522_v29, %v1230_v40 }
 0x4a7   : > { %v1346_v47 = vpop.f32.mrb[31].mxu1  ;;  %4682 = vst [vmem:[#allocation32_spill] sm:$0xff] %v3725_v58  ;;  %v1345_v61 = vadd.f32 %v1344_v56, %v3564_v62  ;;  %v3737_v60 = vmul.f32 %v3055_v46, %v3542_v41  ;;  %v3743_v58 = vmul.f32 %v3056_v50, %v3540_v13  ;;  %v1517_v52 = vadd.f32 %v3522_v29, %v1341_v54 }
 0x4a8   : > { %4683 = vst [vmem:[#allocation33_spill] sm:$0xff] %v3731_v53  ;;  %v1519_v56 = vadd.f32 %v3516_v20, %v1232_v26  ;;  %v3748_v63 = vmul.f32 %v3056_v50, %v3544_v42  ;;  %v3751_v40 = vmul.f32 %v3056_v50, %v3542_v41  ;;  %v3754_v51 = vadd.f32 %v3522_v29, %v1343_v59 }
 0x4a9   : > { %4684 = vst [vmem:[#allocation34_spill] sm:$0xff] %v3737_v60  ;;  %4686 = vst [vmem:[#allocation36_spill] sm:$0xff] %v3743_v58  ;;  %v1347_v46 = vadd.f32 %v1346_v47, %v3570_v0  ;;  %v3759_v58 = vmul.f32 %v3056_v50, %v3546_v43  ;;  %vm1579_vm6 = vcmp.gt.f32.partialorder %v1515_v30, 0.0  ;;  %v1643_v54 = vmul.f32 0.01, %v1515_v30 }
 0x4aa   : > { %v1237_v62 = vpop.f32.mrb[32].mxu0  ;;  %4687 = vst [vmem:[#allocation37_spill] sm:$0xff] %v3748_v63  ;;  %4688 = vst [vmem:[#allocation38_spill] sm:$0xff] %v3751_v40  ;;  %v1521_v26 = vadd.f32 %v3516_v20, %v1345_v61  ;;  %v1520_v42 = vadd.f32 %v3516_v20, %v1234_v23  ;;  %vm1580_vm7 = vcmp.gt.f32.partialorder %v3734_v12, 0.0  ;;  %v1644_v29 = vmul.f32 0.01, %v3734_v12 }
 0x4ab   : > { %v1238_v48 = vadd.f32 %v1237_v62, %v3573_v1  ;;  %v1239_v13 = vpop.f32.mrb[33].mxu0  ;;  %4689 = vst [vmem:[#allocation39_spill] sm:$0xff] %v3759_v58  ;;  %vm1581_vm8 = vcmp.gt.f32.partialorder %v1517_v52, 0.0  ;;  %v1645_v43 = vmul.f32 0.01, %v1517_v52  ;;  %vm1583_vm9 = vcmp.gt.f32.partialorder %v1519_v56, 0.0 }
 0x4ac   : > { %v1350_v63 = vpop.f32.mrb[32].mxu1  ;;  %v1241_v41 = vpop.f32.mrb[34].mxu0  ;;  %v1240_v1 = vadd.f32 %v1239_v13, %v3579_v3  ;;  %vm1582_vm10 = vcmp.gt.f32.partialorder %v3754_v51, 0.0  ;;  %v1647_v23 = vmul.f32 0.01, %v1519_v56  ;;  %v1522_v62 = vadd.f32 %v3516_v20, %v1347_v46 }
 0x4ad   : > { %v1523_v0 = vadd.f32 %v3529_v32, %v1238_v48  ;;  %v1352_v59 = vpop.f32.mrb[33].mxu1  ;;  %v1243_v47 = vpop.f32.mrb[35].mxu0  ;;  %v1351_v50 = vadd.f32 %v1350_v63, %v3576_v2  ;;  %v1707_v40 = vsel %vm1579_vm6, %v1515_v30, %v1643_v54  ;;  %vm1585_vm11 = vcmp.gt.f32.partialorder %v1521_v26, 0.0 }
 0x4ae   : > { %v1354_v61 = vpop.f32.mrb[34].mxu1  ;;  %v1353_v58 = vadd.f32 %v1352_v59, %v3582_v4  ;;  %v1649_v48 = vmul.f32 0.01, %v1521_v26  ;;  %v1648_v3 = vmul.f32 0.01, %v1520_v42  ;;  %vm1584_vm12 = vcmp.gt.f32.partialorder %v1520_v42, 0.0 }
 0x4af   : > { %v1356_v13 = vpop.f32.mrb[35].mxu1  ;;  %v1651_v60 = vmul.f32 0.01, %v1523_v0  ;;  %v1525_v53 = vadd.f32 %v3529_v32, %v1351_v50  ;;  %v3774_v2 = vadd.f32 %v3529_v32, %v1240_v1  ;;  %v1709_v63 = vsel %vm1581_vm8, %v1517_v52, %v1645_v43 }
 0x4b0   : > { %v1646_v28 = vmul.f32 0.01, %v3754_v51  ;;  %vm1587_vm13 = vcmp.gt.f32.partialorder %v1523_v0, 0.0  ;;  %v1242_v20 = vadd.f32 %v1241_v41, %v3587_v6  ;;  %v1711_v4 = vsel %vm1583_vm9, %v1519_v56, %v1647_v23 }
 0x4b1   : > { %v1650_v30 = vmul.f32 0.01, %v1522_v62  ;;  %v3781_v46 = vadd.f32 %v3529_v32, %v1353_v58  ;;  %v1355_v54 = vadd.f32 %v1354_v61, %v3590_v7  ;;  %v1713_v50 = vsel %vm1585_vm11, %v1521_v26, %v1649_v48 }
 0x4b2   : > { %v1247_v59 = vpop.f32.mrb[36].mxu0  ;;  %vm1586_vm14 = vcmp.gt.f32.partialorder %v1522_v62, 0.0  ;;  %v1244_v1 = vadd.f32 %v1243_v47, %v3593_v8  ;;  %v1712_v52 = vsel %vm1584_vm12, %v1520_v42, %v1648_v3  ;;  %v3787_v5 = vsel %vm1587_vm13, %v1523_v0, %v1651_v60 }
 0x4b3   : > { %v1249_v57 = vpop.f32.mrb[37].mxu0  ;;  %vm1589_vm15 = vcmp.gt.f32.partialorder %v1525_v53, 0.0  ;;  %v3790_v6 = vmul.f32 0.01, %v3774_v2  ;;  %v1708_v32 = vsel %vm1580_vm7, %v3734_v12, %v1644_v29  ;;  %v1653_v7 = vmul.f32 0.01, %v1525_v53 }
 0x4b4   : > { %v1360_v43 = vpop.f32.mrb[36].mxu1  ;;  %v1527_v58 = vadd.f32 %v3518_v25, %v1242_v20  ;;  %v1357_v56 = vadd.f32 %v1356_v13, %v3596_v9  ;;  %v1788_v8 = vpack.c.bf16 %v1712_v52, %v1708_v32  ;;  %v1251_v42 = vpop.f32.mrb[38].mxu0  ;;  %vm1588_vm0 = vcmp.gt.f32.partialorder %v3774_v2, 0.0 }
 0x4b5   : > { %v1362_v26 = vpop.f32.mrb[37].mxu1  ;;  %vm1590_vm1 = vcmp.gt.f32.partialorder %v3781_v46, 0.0  ;;  %v1529_v60 = vadd.f32 %v3518_v25, %v1355_v54  ;;  %v1710_v41 = vsel %vm1582_vm10, %v3754_v51, %v1646_v28  ;;  %v1714_v12 = vsel %vm1586_vm14, %v1522_v62, %v1650_v30  ;;  %v1253_v47 = vpop.f32.mrb[39].mxu0 }
 0x4b6   : > { %v1787_v29 = vpack.c.bf16 %v1711_v4, %v1707_v40  ;;  %v1364_v0 = vpop.f32.mrb[38].mxu1  ;;  %v1654_v9 = vmul.f32 0.01, %v3781_v46  ;;  %v1528_v61 = vadd.f32 %v3518_v25, %v1244_v1  ;;  %1931 = vmatprep.subr.bf16.mxu0 %v1788_v8  ;;  %v1790_v23 = vpack.c.bf16 %v1714_v12, %v1710_v41 }
 0x4b7   : > { %v1789_v48 = vpack.c.bf16 %v1713_v50, %v1709_v63  ;;  %v1366_v3 = vpop.f32.mrb[39].mxu1  ;;  %v1248_v13 = vadd.f32 %v1247_v59, %v3599_v10  ;;  %v1361_v20 = vadd.f32 %v1360_v43, %v3602_v11  ;;  %v1250_v28 = vadd.f32 %v1249_v57, %v3605_v16 }
 0x4b8   : > { %1932 = vmatpush1.bf16.msra.mxu0 %v1787_v29  ;;  %v1363_v51 = vadd.f32 %v1362_v26, %v3608_v22  ;;  %v3811_v40 = vsel %vm1589_vm15, %v1525_v53, %v1653_v7  ;;  %vm1591_vm2 = vcmp.gt.f32.partialorder %v1527_v58, 0.0  ;;  %v1655_v62 = vmul.f32 0.01, %v1527_v58  ;;  %2044 = vmatprep.subr.bf16.mxu1 %v1790_v23 }
 0x4b9   : > { %v1530_v4 = vadd.f32 %v3518_v25, %v1357_v56  ;;  %v1657_v63 = vmul.f32 0.01, %v1529_v60  ;;  %2045 = vmatpush1.bf16.msra.mxu1 %v1789_v48  ;;  %v1531_v54 = vadd.f32 %v3520_v27, %v1248_v13  ;;  %v1252_v10 = vadd.f32 %v1251_v42, %v3613_v17 }
 0x4ba   : > { %v1257_v30 = vpop.f32.mrb[40].mxu0  ;;  %v1365_v11 = vadd.f32 %v1364_v0, %v3616_v19  ;;  %vm1593_vm3 = vcmp.gt.f32.partialorder %v1529_v60, 0.0  ;;  %v3818_v22 = vadd.f32 %v3520_v27, %v1361_v20  ;;  %v1254_v57 = vadd.f32 %v1253_v47, %v3619_v21 }
 0x4bb   : > { %v1259_v16 = vpop.f32.mrb[41].mxu0  ;;  %v1367_v53 = vadd.f32 %v1366_v3, %v3622_v24  ;;  %vm1592_vm4 = vcmp.gt.f32.partialorder %v1528_v61, 0.0  ;;  %v1659_v50 = vmul.f32 0.01, %v1531_v54  ;;  %v3823_v1 = vadd.f32 %v3520_v27, %v1250_v28 }
 0x4bc   : > { %v1370_v25 = vpop.f32.mrb[40].mxu1  ;;  %v1261_v59 = vpop.f32.mrb[42].mxu0  ;;  %v3826_v17 = vadd.f32 %v3520_v27, %v1363_v51  ;;  %v1719_v19 = vsel %vm1591_vm2, %v1527_v58, %v1655_v62  ;;  %v1656_v52 = vmul.f32 0.01, %v1528_v61  ;;  %v1658_v43 = vmul.f32 0.01, %v1530_v4 }
 0x4bd   : > { %vm1595_vm5 = vcmp.gt.f32.partialorder %v1531_v54, 0.0  ;;  %v1721_v32 = vsel %vm1593_vm3, %v1529_v60, %v1657_v63  ;;  %vm1594_vm6 = vcmp.gt.f32.partialorder %v1530_v4, 0.0  ;;  %v1535_v21 = vadd.f32 %v3527_v31, %v1252_v10  ;;  %v1372_v7 = vpop.f32.mrb[41].mxu1  ;;  %v1263_v56 = vpop.f32.mrb[43].mxu0 }
 0x4be   : > { %v3831_v24 = vadd.f32 %v3527_v31, %v1365_v11  ;;  %vm1597_vm7 = vcmp.gt.f32.partialorder %v3818_v22, 0.0  ;;  %v1661_v8 = vmul.f32 0.01, %v3818_v22  ;;  %v3836_v27 = vadd.f32 %v3527_v31, %v1254_v57  ;;  %v1374_v41 = vpop.f32.mrb[42].mxu1 }
 0x4bf   : > { %v3839_v58 = vadd.f32 %v3527_v31, %v1367_v53  ;;  %v3841_v26 = vsel %vm1595_vm5, %v1531_v54, %v1659_v50  ;;  %vm1596_vm8 = vcmp.gt.f32.partialorder %v3823_v1, 0.0  ;;  %v3845_v42 = vmul.f32 0.01, %v3823_v1  ;;  %v3860_v47 = vpop.f32.mrb[43].mxu1 }
 0x4c0   : > { %v3848_v60 = vmul.f32 0.01, %v3826_v17  ;;  %vm1598_vm9 = vcmp.gt.f32.partialorder %v3826_v17, 0.0  ;;  %v1716_v12 = vsel %vm1588_vm0, %v3774_v2, %v3790_v6  ;;  %v1720_v31 = vsel %vm1592_vm4, %v1528_v61, %v1656_v52 }
 0x4c1   : > { %v1718_v29 = vsel %vm1590_vm1, %v3781_v46, %v1654_v9  ;;  %v1722_v0 = vsel %vm1594_vm6, %v1530_v4, %v1658_v43  ;;  %v1792_v48 = vpack.c.bf16 %v1720_v31, %v1716_v12  ;;  %v1791_v13 = vpack.c.bf16 %v1719_v19, %v3787_v5  ;;  %v3135_v12 = vld [vmem:[%s4640_s2 + $0x10] sm:$0xff] }
 0x4c2   : > { %v3862_v23 = vpop.f32.mrb[44].mxu0  ;;  %v1794_v3 = vpack.c.bf16 %v1722_v0, %v1718_v29  ;;  %v1793_v20 = vpack.c.bf16 %v1721_v32, %v3811_v40  ;;  %v1258_v2 = vadd.f32 %v1257_v30, %v3625_v34  ;;  %v1371_v6 = vadd.f32 %v1370_v25, %v3628_v35 }
 0x4c3   : > { %v3866_v28 = vpop.f32.mrb[45].mxu0  ;;  %v1260_v46 = vadd.f32 %v1259_v16, %v3631_v36  ;;  %v1373_v9 = vadd.f32 %v1372_v7, %v3634_v37  ;;  %vm1599_vm10 = vcmp.gt.f32.partialorder %v1535_v21, 0.0  ;;  %v1663_v62 = vmul.f32 0.01, %v1535_v21  ;;  %1933 = vmatprep.subr.bf16.mxu0 %v1792_v48 }
 0x4c4   : > { %v3872_v61 = vpop.f32.mrb[44].mxu1  ;;  %v3874_v51 = vpop.f32.mrb[46].mxu0  ;;  %2046 = vmatprep.subr.bf16.mxu1 %v1794_v3  ;;  %v1262_v5 = vadd.f32 %v1261_v59, %v3637_v14  ;;  %v1665_v34 = vmul.f32 0.01, %v3831_v24  ;;  %1934 = vmatpush1.bf16.msra.mxu0 %v1791_v13  ;;  %v1539_v35 = vadd.f32 %v3536_v38, %v1258_v2  ;;  %v3884_v36 = vadd.f32 %v3536_v38, %v1371_v6  ;;  %v4692_v6 = vld [vmem:[#allocation13_spill] sm:$0xff] }
 0x4c5   : > { %v3877_v40 = vpop.f32.mrb[45].mxu1  ;;  %v3879_v4 = vpop.f32.mrb[47].mxu0  ;;  %2047 = vmatpush1.bf16.msra.mxu1 %v1793_v20  ;;  %v1375_v37 = vadd.f32 %v1374_v41, %v3640_v45  ;;  %vm1601_vm11 = vcmp.gt.f32.partialorder %v3831_v24, 0.0  ;;  %v3891_v14 = vadd.f32 %v3536_v38, %v1260_v46  ;;  %v3894_v63 = vadd.f32 %v3536_v38, %v1373_v9  ;;  %v3133_v38 = vld [vmem:[%s4640_s2] sm:$0xff] }
 0x4c6   : > { %v3887_v30 = vpop.f32.mrb[46].mxu1  ;;  %v1264_v54 = vadd.f32 %v1263_v56, %v3643_v44  ;;  %v3174_v11 = vmov 5   ;;  %v1725_v45 = vsel %vm1597_vm7, %v3818_v22, %v1661_v8  ;;  %v1664_v16 = vmul.f32 0.01, %v3836_v27  ;;  %v3134_v22 = vld [vmem:[%s4640_s2 + $0x8] sm:$0xff] }
 0x4c7   : > { %v3897_v10 = vpop.f32.mrb[47].mxu1  ;;  %3058 = vset.pattern.permute.xlu1 %v3174_v11  ;;  %v1667_v57 = vmul.f32 0.01, %v1539_v35  ;;  %v3904_v53 = vadd.f32 %v3538_v39, %v1262_v5  ;;  %3059 = vset.pattern.permute.xlu0 %v3174_v11  ;;  %v1727_v44 = vsel %vm1599_vm10, %v1535_v21, %v1663_v62  ;;  %vm1600_vm12 = vcmp.gt.f32.partialorder %v3836_v27, 0.0  ;;  %v4693_v62 = vld [vmem:[#allocation14_spill] sm:$0xff]  ;;  %v4696_v11 = vld [vmem:[#allocation8_spill] sm:$0xff] }
 0x4c8   : > { %1820 = vperm.xlu1 %3058, %v3133_v38   ;;  %v1666_v25 = vmul.f32 0.01, %v3839_v58  ;;  %vm1603_vm13 = vcmp.gt.f32.partialorder %v1539_v35, 0.0  ;;  %1824 = vperm.xlu0 %3059, %v3134_v22   ;;  %v1729_v59 = vsel %vm1601_vm11, %v3831_v24, %v1665_v34  ;;  %vm1602_vm14 = vcmp.gt.f32.partialorder %v3839_v58, 0.0  ;;  %v4697_v38 = vld [vmem:[#allocation5_spill] sm:$0xff] }
 0x4c9   : > { %vm1605_vm15 = vcmp.gt.f32.partialorder %v3884_v36, 0.0  ;;  %v3921_v50 = vadd.f32 %v3538_v39, %v1375_v37  ;;  %v1669_v52 = vmul.f32 0.01, %v3884_v36  ;;  %v3927_v43 = vmul.f32 0.01, %v3891_v14 }
 0x4ca   : > { %v3923_v19 = vpop.f32.mrb[48].mxu0  ;;  %v3930_v32 = vmul.f32 0.01, %v3894_v63  ;;  %v3933_v21 = vadd.f32 %v3538_v39, %v1264_v54  ;;  %v3935_v24 = vsel %vm1603_vm13, %v1539_v35, %v1667_v57  ;;  %vm1607_vm0 = vcmp.gt.f32.partialorder %v3904_v53, 0.0 }
 0x4cb   : > { %v1724_v7 = vsel %vm1596_vm8, %v3823_v1, %v3845_v42  ;;  %v1728_v56 = vsel %vm1600_vm12, %v3836_v27, %v1664_v16  ;;  %v3947_v41 = vpop.f32.mrb[49].mxu0  ;;  %vm1604_vm1 = vcmp.gt.f32.partialorder %v3891_v14, 0.0  ;;  %v1377_v31 = vadd.f32 %v3860_v47, %v3646_v49 }
 0x4cc   : > { %v3945_v8 = vpop.f32.mrb[48].mxu1  ;;  %1828 = vperm.xlu1 %3058, %v3135_v12   ;;  %v1796_v29 = vpack.c.bf16 %v1728_v56, %v1724_v7  ;;  %v1726_v1 = vsel %vm1598_vm9, %v3826_v17, %v3848_v60  ;;  %v1730_v27 = vsel %vm1602_vm14, %v3839_v58, %v1666_v25  ;;  %v3964_v0 = vpop.f32.mrb[50].mxu0  ;;  %1836 = vperm.xlu0 %3059, %v3406_v15   ;;  %vm1606_vm2 = vcmp.gt.f32.partialorder %v3894_v63, 0.0  ;;  %v4690_v60 = vld [vmem:[#allocation11_spill] sm:$0xff]  ;;  %v4691_v15 = vld [vmem:[#allocation12_spill] sm:$0xff] }
 0x4cd   : > { %v3962_v42 = vpop.f32.mrb[49].mxu1  ;;  %v1671_v49 = vmul.f32 0.01, %v3904_v53  ;;  %v1798_v47 = vpack.c.bf16 %v1730_v27, %v1726_v1  ;;  %v1795_v48 = vpack.c.bf16 %v1727_v44, %v3841_v26  ;;  %v1797_v3 = vpack.c.bf16 %v1729_v59, %v1725_v45  ;;  %v3972_v17 = vpop.f32.mrb[51].mxu0  ;;  %v4698_v25 = vld [vmem:[#allocation16_spill] sm:$0xff]  ;;  %v4699_v59 = vld [vmem:[#allocation17_spill] sm:$0xff] }
 0x4ce   : > { %v3970_v13 = vpop.f32.mrb[50].mxu1  ;;  %1935 = vmatprep.subr.bf16.mxu0 %v1796_v29  ;;  %v1268_v58 = vadd.f32 %v3862_v23, %v3649_v55  ;;  %v1381_v20 = vadd.f32 %v3872_v61, %v4690_v60  ;;  %v1270_v2 = vadd.f32 %v3866_v28, %v4691_v15  ;;  %v1383_v46 = vadd.f32 %v3877_v40, %v4692_v6  ;;  %v4694_v23 = vld [vmem:[#allocation15_spill] sm:$0xff]  ;;  %v4695_v40 = vld [vmem:[#allocation9_spill] sm:$0xff] }
 0x4cf   : > { %v3982_v9 = vpop.f32.mrb[51].mxu1  ;;  %vm1609_vm3 = vcmp.gt.f32.partialorder %v3921_v50, 0.0  ;;  %v1673_v26 = vmul.f32 0.01, %v3921_v50  ;;  %2048 = vmatprep.subr.bf16.mxu1 %v1798_v47  ;;  %1936 = vmatpush1.bf16.msra.mxu0 %v1795_v48  ;;  %v1272_v55 = vadd.f32 %v3874_v51, %v4693_v62  ;;  %v1385_v61 = vadd.f32 %v3887_v30, %v4694_v23 }
 0x4d0   : > { %v1672_v5 = vmul.f32 0.01, %v3933_v21  ;;  %v1546_v28 = vadd.f32 %v3538_v39, %v1377_v31  ;;  %2049 = vmatpush1.bf16.msra.mxu1 %v1797_v3  ;;  %v1547_v34 = vadd.f32 %v4695_v40, %v1268_v58  ;;  %v1549_v35 = vadd.f32 %v4695_v40, %v1381_v20  ;;  %v3136_v39 = vld [vmem:[%s4640_s2 + $0x18] sm:$0xff]  ;;  %1844 = vperm.xlu0 %3059, %v4697_v38  }
 0x4d1   : > { %v3995_v37 = vadd.f32 %v4695_v40, %v1270_v2  ;;  %v3998_v54 = vadd.f32 %v4695_v40, %v1383_v46  ;;  %v1551_v51 = vadd.f32 %v4696_v11, %v1272_v55  ;;  %v4002_v45 = vadd.f32 %v4696_v11, %v1385_v61  ;;  %1832 = vperm.xlu1 %3058, %v3136_v39   ;;  %v4701_v58 = vld [vmem:[#allocation6_spill] sm:$0xff]  ;;  %v4703_v40 = vld [vmem:[#allocation19_spill] sm:$0xff] }
 0x4d2   : > { %v4004_v30 = vpop.f32.mrb[52].mxu0  ;;  %vm1611_vm4 = vcmp.gt.f32.partialorder %v1547_v34, 0.0  ;;  %v1675_v16 = vmul.f32 0.01, %v1547_v34  ;;  %vm1613_vm5 = vcmp.gt.f32.partialorder %v1549_v35, 0.0  ;;  %v1733_v44 = vsel %vm1605_vm15, %v3884_v36, %v1669_v52  ;;  %v4702_v61 = vld [vmem:[#allocation18_spill] sm:$0xff] }
 0x4d3   : > { %v1677_v57 = vmul.f32 0.01, %v1549_v35  ;;  %vm1608_vm6 = vcmp.gt.f32.partialorder %v3933_v21, 0.0  ;;  %v1274_v22 = vadd.f32 %v3879_v4, %v4698_v25  ;;  %v1387_v7 = vadd.f32 %v3897_v10, %v4699_v59  ;;  %v4026_v36 = vpop.f32.mrb[53].mxu0  ;;  %v4709_v38 = vld [vmem:[#allocation10_spill] sm:$0xff] }
 0x4d4   : > { %v1735_v56 = vsel %vm1607_vm0, %v3904_v53, %v1671_v49  ;;  %v1737_v12 = vsel %vm1609_vm3, %v3921_v50, %v1673_v26  ;;  %vm1610_vm7 = vcmp.gt.f32.partialorder %v1546_v28, 0.0  ;;  %v1674_v31 = vmul.f32 0.01, %v1546_v28  ;;  %v4024_v29 = vpop.f32.mrb[52].mxu1  ;;  %v4040_v27 = vpop.f32.mrb[54].mxu0  ;;  %v4700_v50 = vld [vmem:[#allocation4_spill] sm:$0xff]  ;;  %1852 = vperm.xlu0 %3059, %v4701_v58  }
 0x4d5   : > { %v4028_v52 = vsel %vm1611_vm4, %v1547_v34, %v1675_v16  ;;  %v4030_v4 = vsel %vm1613_vm5, %v1549_v35, %v1677_v57  ;;  %v4033_v10 = vmul.f32 0.01, %v3995_v37  ;;  %v4036_v1 = vmul.f32 0.01, %v3998_v54  ;;  %v4038_v53 = vpop.f32.mrb[53].mxu1  ;;  %1840 = vperm.xlu1 %3058, %v4700_v50   ;;  %v4049_v3 = vpop.f32.mrb[55].mxu0 }
 0x4d6   : > { %vm1615_vm8 = vcmp.gt.f32.partialorder %v1551_v51, 0.0  ;;  %v1679_v49 = vmul.f32 0.01, %v1551_v51  ;;  %vm1617_vm9 = vcmp.gt.f32.partialorder %v4002_v45, 0.0  ;;  %v1736_v47 = vsel %vm1608_vm6, %v3933_v21, %v1672_v5  ;;  %v4047_v48 = vpop.f32.mrb[54].mxu1  ;;  %v4704_v34 = vld [vmem:[#allocation3_spill] sm:$0xff]  ;;  %v4080_v35 = vpop.permute.xlu1 %1492 }
 0x4d7   : > { %vm1612_vm10 = vcmp.gt.f32.partialorder %v3995_v37, 0.0  ;;  %vm1614_vm11 = vcmp.gt.f32.partialorder %v3998_v54, 0.0  ;;  %v1681_v60 = vmul.f32 0.01, %v4002_v45  ;;  %v4056_v20 = vadd.f32 %v4696_v11, %v1274_v22  ;;  %v4065_v2 = vpop.f32.mrb[55].mxu1  ;;  %v4710_v22 = vld [vmem:[#allocation24_spill] sm:$0xff] }
 0x4d8   : > { %v4059_v15 = vadd.f32 %v4696_v11, %v1387_v7  ;;  %v1732_v21 = vsel %vm1604_vm1, %v3891_v14, %v3927_v43  ;;  %v1734_v46 = vsel %vm1606_vm2, %v3894_v63, %v3930_v32  ;;  %v1738_v26 = vsel %vm1610_vm7, %v1546_v28, %v1674_v31  ;;  %v4705_v63 = vld [vmem:[#allocation20_spill] sm:$0xff]  ;;  %v4706_v28 = vld [vmem:[#allocation21_spill] sm:$0xff]  ;;  %v4707_v11 = vld [vmem:[#allocation22_spill] sm:$0xff] }
 0x4d9   : > { %v1800_v6 = vpack.c.bf16 %v1736_v47, %v1732_v21  ;;  %v1799_v62 = vpack.c.bf16 %v1735_v56, %v3935_v24  ;;  %v1802_v55 = vpack.c.bf16 %v1738_v26, %v1734_v46  ;;  %v1801_v23 = vpack.c.bf16 %v1737_v12, %v1733_v44  ;;  %1848 = vperm.xlu1 %3058, %v4704_v34   ;;  %v3137_v47 = vld [vmem:[%s4640_s2 + $0x48] sm:$0xff] }
 0x4da   : > { %v1278_v5 = vadd.f32 %v3923_v19, %v4702_v61  ;;  %v1391_v14 = vadd.f32 %v3945_v8, %v4703_v40  ;;  %v4077_v43 = vpop.f32.mrb[56].mxu0  ;;  %v1280_v32 = vadd.f32 %v3947_v41, %v4705_v63  ;;  %v1393_v24 = vadd.f32 %v3962_v42, %v4706_v28  ;;  %v4708_v19 = vld [vmem:[#allocation23_spill] sm:$0xff]  ;;  %v4711_v61 = vld [vmem:[#allocation25_spill] sm:$0xff]  ;;  %v3139_v63 = vld [vmem:[%s4640_s2 + $0x58] sm:$0xff] }
 0x4db   : > { %1937 = vmatprep.subr.bf16.mxu0 %v1800_v6  ;;  %v1282_v39 = vadd.f32 %v3964_v0, %v4707_v11  ;;  %v1395_v16 = vadd.f32 %v3970_v13, %v4708_v19  ;;  %v4090_v8 = vpop.f32.mrb[57].mxu0  ;;  %v4093_v57 = vsel %vm1615_vm8, %v1551_v51, %v1679_v49  ;;  %vm1616_vm12 = vcmp.gt.f32.partialorder %v4056_v20, 0.0  ;;  %2050 = vmatprep.subr.bf16.mxu1 %v1802_v55 }
 0x4dc   : > { %1938 = vmatpush1.bf16.msra.mxu0 %v1799_v62  ;;  %v1555_v41 = vadd.f32 %v4709_v38, %v1278_v5  ;;  %v1557_v44 = vadd.f32 %v4709_v38, %v1391_v14  ;;  %v4098_v42 = vpop.f32.mrb[56].mxu1  ;;  %v4100_v25 = vpop.f32.mrb[58].mxu0  ;;  %2051 = vmatpush1.bf16.msra.mxu1 %v1801_v23  ;;  %v4103_v0 = vadd.f32 %v4709_v38, %v1280_v32  ;;  %v1680_v12 = vmul.f32 0.01, %v4056_v20 }
 0x4dd   : > { %v1559_v13 = vadd.f32 %v4080_v35, %v1282_v39  ;;  %v1561_v51 = vadd.f32 %v4080_v35, %v1395_v16  ;;  %v1284_v59 = vadd.f32 %v3972_v17, %v4710_v22  ;;  %v4109_v7 = vpop.f32.mrb[57].mxu1  ;;  %v4111_v56 = vpop.f32.mrb[59].mxu0  ;;  %v4115_v49 = vadd.f32 %v4709_v38, %v1393_v24  ;;  %1856 = vperm.xlu1 %3058, %v3137_v47   ;;  %v3138_v17 = vld [vmem:[%s4640_s2 + $0x50] sm:$0xff]  ;;  %v3140_v24 = vld [vmem:[%s4640_s2 + $0x60] sm:$0xff]  ;;  %v4716_v22 = vld [vmem:[#allocation30_spill] sm:$0xff] }
 0x4de   : > { %v1683_v31 = vmul.f32 0.01, %v1555_v41  ;;  %v1685_v50 = vmul.f32 0.01, %v1557_v44  ;;  %1860 = vperm.xlu0 %3059, %v3138_v17   ;;  %vm1618_vm13 = vcmp.gt.f32.partialorder %v4059_v15, 0.0  ;;  %vm1619_vm14 = vcmp.gt.f32.partialorder %v1555_v41, 0.0  ;;  %v1498_v62 = vpop.permute.xlu1 %1497 }
 0x4df   : > { %v1682_v58 = vmul.f32 0.01, %v4059_v15  ;;  %vm1621_vm15 = vcmp.gt.f32.partialorder %v1557_v44, 0.0  ;;  %v1745_v21 = vsel %vm1617_vm9, %v4002_v45, %v1681_v60  ;;  %v4129_v6 = vmul.f32 0.01, %v4103_v0  ;;  %v4131_v26 = vpop.f32.mrb[58].mxu1 }
 0x4e0   : > { %vm1623_vm0 = vcmp.gt.f32.partialorder %v1559_v13, 0.0  ;;  %v1687_v46 = vmul.f32 0.01, %v1559_v13  ;;  %vm1625_vm1 = vcmp.gt.f32.partialorder %v1561_v51, 0.0  ;;  %v1689_v55 = vmul.f32 0.01, %v1561_v51 }
 0x4e1   : > { %v4134_v23 = vadd.f32 %v4080_v35, %v1284_v59  ;;  %v1397_v5 = vadd.f32 %v3982_v9, %v4711_v61  ;;  %v4138_v40 = vpop.f32.mrb[59].mxu1  ;;  %v4140_v14 = vsel %vm1619_vm14, %v1555_v41, %v1683_v31  ;;  %v4142_v45 = vsel %vm1621_vm15, %v1557_v44, %v1685_v50  ;;  %1864 = vperm.xlu1 %3058, %v3139_v63   ;;  %v4713_v38 = vld [vmem:[#allocation27_spill] sm:$0xff]  ;;  %v4714_v44 = vld [vmem:[#allocation28_spill] sm:$0xff] }
 0x4e2   : > { %v4145_v60 = vmul.f32 0.01, %v4115_v49  ;;  %v1744_v34 = vsel %vm1616_vm12, %v4056_v20, %v1680_v12  ;;  %vm1620_vm2 = vcmp.gt.f32.partialorder %v4103_v0, 0.0  ;;  %vm1622_vm3 = vcmp.gt.f32.partialorder %v4115_v49, 0.0  ;;  %1868 = vperm.xlu0 %3059, %v3140_v24   ;;  %v3141_v31 = vld [vmem:[%s4640_s2 + $0x68] sm:$0xff]  ;;  %v4717_v61 = vld [vmem:[#allocation31_spill] sm:$0xff] }
 0x4e3   : > { %v4156_v9 = vsel %vm1623_vm0, %v1559_v13, %v1687_v46  ;;  %v4158_v32 = vsel %vm1625_vm1, %v1561_v51, %v1689_v55  ;;  %v1740_v28 = vsel %vm1612_vm10, %v3995_v37, %v4033_v10  ;;  %v1742_v20 = vsel %vm1614_vm11, %v3998_v54, %v4036_v1  ;;  %v4712_v1 = vld [vmem:[#allocation26_spill] sm:$0xff] }
 0x4e4   : > { %v1804_v11 = vpack.c.bf16 %v1744_v34, %v1740_v28  ;;  %v1746_v39 = vsel %vm1618_vm13, %v4059_v15, %v1682_v58  ;;  %v1803_v19 = vpack.c.bf16 %v4093_v57, %v4028_v52  ;;  %v1805_v37 = vpack.c.bf16 %v1745_v21, %v4030_v4  ;;  %v1503_v57 = vpop.permute.xlu1 %1502  ;;  %v3143_v34 = vld [vmem:[%s4640_s2 + $0x78] sm:$0xff] }
 0x4e5   : > { %vm1624_vm4 = vcmp.gt.f32.partialorder %v4134_v23, 0.0  ;;  %v1562_v10 = vadd.f32 %v4080_v35, %v1397_v5  ;;  %v1806_v54 = vpack.c.bf16 %v1746_v39, %v1742_v20  ;;  %v1288_v16 = vadd.f32 %v4004_v30, %v4712_v1  ;;  %v4715_v30 = vld [vmem:[#allocation29_spill] sm:$0xff]  ;;  %1872 = vperm.xlu1 %3058, %v3141_v31  }
 0x4e6   : > { %1939 = vmatprep.subr.bf16.mxu0 %v1804_v11  ;;  %v1401_v41 = vadd.f32 %v4024_v29, %v4713_v38  ;;  %v1290_v15 = vadd.f32 %v4026_v36, %v4714_v44  ;;  %v1403_v52 = vadd.f32 %v4038_v53, %v3707_v18  ;;  %v1292_v4 = vadd.f32 %v4040_v27, %v3712_v33  ;;  %v4719_v1 = vld [vmem:[#allocation33_spill] sm:$0xff]  ;;  %v4721_v38 = vld [vmem:[#allocation35_spill] sm:$0xff] }
 0x4e7   : > { %v1688_v35 = vmul.f32 0.01, %v4134_v23  ;;  %2052 = vmatprep.subr.bf16.mxu1 %v1806_v54  ;;  %1940 = vmatpush1.bf16.msra.mxu0 %v1803_v19  ;;  %v1563_v13 = vadd.f32 %v1498_v62, %v1288_v16  ;;  %v1405_v51 = vadd.f32 %v4047_v48, %v4715_v30  ;;  %v1294_v29 = vadd.f32 %v4049_v3, %v4716_v22  ;;  %v3142_v48 = vld [vmem:[%s4640_s2 + $0x70] sm:$0xff]  ;;  %v4725_v22 = vld [vmem:[#allocation39_spill] sm:$0xff] }
 0x4e8   : > { %2053 = vmatpush1.bf16.msra.mxu1 %v1805_v37  ;;  %v1565_v36 = vadd.f32 %v1498_v62, %v1401_v41  ;;  %v4194_v59 = vadd.f32 %v1498_v62, %v1290_v15  ;;  %v4196_v18 = vadd.f32 %v1498_v62, %v1403_v52  ;;  %v1567_v53 = vadd.f32 %v1503_v57, %v1292_v4  ;;  %v1508_v37 = vpop.permute.xlu0 %1507  ;;  %v4722_v41 = vld [vmem:[#allocation36_spill] sm:$0xff]  ;;  %v4723_v15 = vld [vmem:[#allocation37_spill] sm:$0xff]  ;;  %v4724_v4 = vld [vmem:[#allocation38_spill] sm:$0xff] }
 0x4e9   : > { %vm1627_vm5 = vcmp.gt.f32.partialorder %v1563_v13, 0.0  ;;  %v1691_v33 = vmul.f32 0.01, %v1563_v13  ;;  %v1569_v27 = vadd.f32 %v1503_v57, %v1405_v51  ;;  %v4198_v12 = vadd.f32 %v1503_v57, %v1294_v29  ;;  %1876 = vperm.xlu0 %3059, %v3142_v48   ;;  %1880 = vperm.xlu1 %3058, %v3143_v34  }
 0x4ea   : > { %vm1626_vm6 = vcmp.gt.f32.partialorder %v1562_v10, 0.0  ;;  %v1690_v3 = vmul.f32 0.01, %v1562_v10  ;;  %vm1629_vm7 = vcmp.gt.f32.partialorder %v1565_v36, 0.0  ;;  %v1693_v50 = vmul.f32 0.01, %v1565_v36 }
 0x4eb   : > { %v4206_v47 = vsel %vm1627_vm5, %v1563_v13, %v1691_v33  ;;  %vm1628_vm8 = vcmp.gt.f32.partialorder %v4194_v59, 0.0  ;;  %v1692_v17 = vmul.f32 0.01, %v4194_v59  ;;  %vm1630_vm9 = vcmp.gt.f32.partialorder %v4196_v18, 0.0 }
 0x4ec   : > { %vm1631_vm10 = vcmp.gt.f32.partialorder %v1567_v53, 0.0  ;;  %v4211_v58 = vsel %vm1629_vm7, %v1565_v36, %v1693_v50  ;;  %v1694_v21 = vmul.f32 0.01, %v4196_v18  ;;  %v1695_v46 = vmul.f32 0.01, %v1567_v53 }
 0x4ed   : > { %vm1633_vm11 = vcmp.gt.f32.partialorder %v1569_v27, 0.0  ;;  %v1697_v62 = vmul.f32 0.01, %v1569_v27  ;;  %vm1632_vm12 = vcmp.gt.f32.partialorder %v4198_v12, 0.0  ;;  %v1696_v55 = vmul.f32 0.01, %v4198_v12 }
 0x4ee   : > { %v1407_v5 = vadd.f32 %v4065_v2, %v4717_v61  ;;  %v1759_v63 = vsel %vm1631_vm10, %v1567_v53, %v1695_v46  ;;  %v1748_v28 = vsel %vm1620_vm2, %v4103_v0, %v4129_v6  ;;  %v1752_v20 = vsel %vm1624_vm4, %v4134_v23, %v1688_v35  ;;  %v4718_v6 = vld [vmem:[#allocation32_spill] sm:$0xff] }
 0x4ef   : > { %v1750_v2 = vsel %vm1622_vm3, %v4115_v49, %v4145_v60  ;;  %v1808_v11 = vpack.c.bf16 %v1752_v20, %v1748_v28  ;;  %v1754_v39 = vsel %vm1626_vm6, %v1562_v10, %v1690_v3  ;;  %v1807_v19 = vpack.c.bf16 %v4156_v9, %v4140_v14  ;;  %v4720_v60 = vld [vmem:[#allocation34_spill] sm:$0xff] }
 0x4f0   : > { %v1570_v24 = vadd.f32 %v1503_v57, %v1407_v5  ;;  %v1810_v54 = vpack.c.bf16 %v1754_v39, %v1750_v2  ;;  %v1809_v0 = vpack.c.bf16 %v4158_v32, %v4142_v45  ;;  %v1298_v23 = vadd.f32 %v4077_v43, %v4718_v6  ;;  %v1513_v57 = vpop.permute.xlu1 %1512  ;;  %v3097_v20 = vld [vmem:[%s4639_s1 + $0x74] sm:$0xff]   ;;  %v3100_v39 = vld [vmem:[%s4639_s1 + $0x8c] sm:$0xff]  }
 0x4f1   : > { %v1411_v16 = vadd.f32 %v4098_v42, %v4719_v1  ;;  %v1761_v49 = vsel %vm1633_vm11, %v1569_v27, %v1697_v62  ;;  %1941 = vmatprep.subr.bf16.mxu0 %v1808_v11  ;;  %v1300_v10 = vadd.f32 %v4090_v8, %v4720_v60  ;;  %v1413_v14 = vadd.f32 %v4109_v7, %v4721_v38  ;;  %v3099_v11 = vld [vmem:[%s4639_s1 + $0x84] sm:$0xff]   ;;  %v2359_v60 = vld [vmem:[%s4640_s2 + $0x18] sm:$0xff] }
 0x4f2   : > { %vm1634_vm13 = vcmp.gt.f32.partialorder %v1570_v24, 0.0  ;;  %v1698_v9 = vmul.f32 0.01, %v1570_v24  ;;  %2054 = vmatprep.subr.bf16.mxu1 %v1810_v54  ;;  %1942 = vmatpush1.bf16.msra.mxu0 %v1807_v19  ;;  %v1571_v45 = vadd.f32 %v1508_v37, %v1298_v23  ;;  %v1302_v43 = vadd.f32 %v4100_v25, %v4722_v41  ;;  %v3101_v19 = vld [vmem:[%s4639_s1 + $0x94] sm:$0xff]   ;;  %v3103_v54 = vld [vmem:[%s4639_s1 + $0xa4] sm:$0xff]  }
 0x4f3   : > { %v1573_v32 = vadd.f32 %v1508_v37, %v1411_v16  ;;  %2055 = vmatpush1.bf16.msra.mxu1 %v1809_v0  ;;  %v1572_v42 = vadd.f32 %v1508_v37, %v1300_v10  ;;  %v1574_v44 = vadd.f32 %v1508_v37, %v1413_v14  ;;  %v1415_v52 = vadd.f32 %v4131_v26, %v4723_v15  ;;  %v3102_v37 = vld [vmem:[%s4639_s1 + $0x9c] sm:$0xff]   ;;  %v3104_v0 = vld [vmem:[%s4639_s1 + $0xac] sm:$0xff]  }
 0x4f4   : > { %v1304_v8 = vadd.f32 %v4111_v56, %v4724_v4  ;;  %vm1635_vm14 = vcmp.gt.f32.partialorder %v1571_v45, 0.0  ;;  %v1699_v7 = vmul.f32 0.01, %v1571_v45  ;;  %v1575_v13 = vadd.f32 %v1513_v57, %v1302_v43  ;;  %v2357_v6 = vld [vmem:[%s4640_s2 + $0x8] sm:$0xff]  ;;  %v2356_v23 = vld [vmem:[%s4640_s2] sm:$0xff]  ;;  %v2960_v16 = vld [vmem:[%s4639_s1 + $0xd0] sm:$0xff]  }
 0x4f5   : > { %vm1637_vm15 = vcmp.gt.f32.partialorder %v1573_v32, 0.0  ;;  %v1701_v35 = vmul.f32 0.01, %v1573_v32  ;;  %v1577_v30 = vadd.f32 %v1513_v57, %v1415_v52  ;;  %v1417_v25 = vadd.f32 %v4138_v40, %v4725_v22  ;;  %v2961_v14 = vld [vmem:[%s4639_s1 + $0xd8] sm:$0xff]   ;;  %v2962_v43 = vld [vmem:[%s4639_s1 + $0xe0] sm:$0xff]  }
 0x4f6   : > { %v1576_v51 = vadd.f32 %v1513_v57, %v1304_v8  ;;  %v1756_v29 = vsel %vm1628_vm8, %v4194_v59, %v1692_v17  ;;  %v1760_v26 = vsel %vm1632_vm12, %v4198_v12, %v1696_v55  ;;  %v1758_v56 = vsel %vm1630_vm9, %v4196_v18, %v1694_v21 }
 0x4f7   : > { %v1762_v36 = vsel %vm1634_vm13, %v1570_v24, %v1698_v9  ;;  %vm1639_vm0 = vcmp.gt.f32.partialorder %v1575_v13, 0.0  ;;  %v1703_v53 = vmul.f32 0.01, %v1575_v13  ;;  %vm1641_vm1 = vcmp.gt.f32.partialorder %v1577_v30, 0.0  ;;  %v3098_v24 = vld [vmem:[%s4639_s1 + $0x7c] sm:$0xff]  }
 0x4f8   : > { %v1705_v33 = vmul.f32 0.01, %v1577_v30  ;;  %vm1640_vm2 = vcmp.gt.f32.partialorder %v1576_v51, 0.0  ;;  %v1704_v40 = vmul.f32 0.01, %v1576_v51  ;;  %v1578_v27 = vadd.f32 %v1513_v57, %v1417_v25 }
 0x4f9   : > { %v1812_v31 = vpack.c.bf16 %v1760_v26, %v1756_v29  ;;  %v1767_v48 = vsel %vm1639_vm0, %v1575_v13, %v1703_v53  ;;  %v1814_v3 = vpack.c.bf16 %v1762_v36, %v1758_v56  ;;  %v1811_v50 = vpack.c.bf16 %v1759_v63, %v4206_v47  ;;  %v2362_v57 = vld [vmem:[%s4640_s2 + $0x30] sm:$0x3] }
 0x4fa   : > { %v1769_v59 = vsel %vm1641_vm1, %v1577_v30, %v1705_v33  ;;  %vm1642_vm3 = vcmp.gt.f32.partialorder %v1578_v27, 0.0  ;;  %v1706_v12 = vmul.f32 0.01, %v1578_v27  ;;  %v1813_v18 = vpack.c.bf16 %v1761_v49, %v4211_v58  ;;  %v2358_v49 = vld [vmem:[%s4640_s2 + $0x10] sm:$0xff] }
 0x4fb   : > { %1943 = vmatprep.subr.bf16.mxu0 %v1812_v31  ;;  %vm1636_vm4 = vcmp.gt.f32.partialorder %v1572_v42, 0.0  ;;  %2056 = vmatprep.subr.bf16.mxu1 %v1814_v3  ;;  %v1700_v17 = vmul.f32 0.01, %v1572_v42  ;;  %v1768_v21 = vsel %vm1640_vm2, %v1576_v51, %v1704_v40  ;;  %vm1638_vm5 = vcmp.gt.f32.partialorder %v1574_v44, 0.0 }
 0x4fc   : > { %1944 = vmatpush1.bf16.msra.mxu0 %v1811_v50  ;;  %v1702_v46 = vmul.f32 0.01, %v1574_v44  ;;  %2057 = vmatpush1.bf16.msra.mxu1 %v1813_v18  ;;  %v1770_v62 = vsel %vm1642_vm3, %v1578_v27, %v1706_v12  ;;  %v1763_v55 = vsel %vm1635_vm14, %v1571_v45, %v1699_v7  ;;  %v1765_v61 = vsel %vm1637_vm15, %v1573_v32, %v1701_v35  ;;  %v2360_v45 = vld [vmem:[%s4640_s2 + $0x20] sm:$0xff]  ;;  %v2628_v7 = vld [vmem:[%s4639_s1 + $0xe8] sm:$0x1] }
 0x4fd   : > { %v1764_v47 = vsel %vm1636_vm4, %v1572_v42, %v1700_v17  ;;  %v1815_v34 = vpack.c.bf16 %v1767_v48, %v1763_v55  ;;  %v1817_v63 = vpack.c.bf16 %v1769_v59, %v1765_v61  ;;  %v4726_v2 = vmov 0  }
 0x4fe   : > { %v1766_v5 = vsel %vm1638_vm5, %v1574_v44, %v1702_v46  ;;  %v1816_v28 = vpack.c.bf16 %v1768_v21, %v1764_v47  ;;  %v3175_v1 = vmov 6   ;;  %v2950_v10 = vunpack.c.l.bf16 %v2960_v16  ;;  %v2361_v44 = vld [vmem:[%s4640_s2 + $0x28] sm:$0xff] }
 0x4ff   : > { %v1818_v58 = vpack.c.bf16 %v1770_v62, %v1766_v5  ;;  %3061 = vset.pattern.permute.xlu1 %v3175_v1  ;;  %3060 = vset.pattern.permute.xlu0 %v3175_v1  ;;  %v2951_v38 = vunpack.c.h.bf16 %v2960_v16  ;;  %v2954_v32 = vunpack.c.l.bf16 %v2961_v14  ;;  %v2955_v41 = vunpack.c.h.bf16 %v2961_v14  ;;  %v2752_v62 = vld [vmem:[%s4640_s2] sm:$0x1] }
 0x500   : > { %1945 = vmatprep.subr.bf16.mxu0 %v1816_v28  ;;  %2402 = vperm.xlu1 %3061, %v2357_v6   ;;  %v2958_v15 = vunpack.c.l.bf16 %v2962_v43  ;;  %v2959_v52 = vunpack.c.h.bf16 %v2962_v43  ;;  %v2635_v22 = vunpack.c.l.bf16 %v2628_v7  ;;  %v3176_v27 = vmov 7  }
 0x501   : > { %2058 = vmatprep.subr.bf16.mxu1 %v1818_v58  ;;  %1946 = vmatpush1.bf16.msra.mxu0 %v1815_v34  ;;  %v3063_v9 = vpack.i.bf16 %v2951_v38, %v2950_v10  ;;  %v3068_v42 = vpack.i.bf16 %v2955_v41, %v2954_v32 }
 0x502   : > { %2059 = vmatpush1.bf16.msra.mxu1 %v1817_v63  ;;  %2397 = vperm.xlu0 %3060, %v2356_v23   ;;  %v3075_v8 = vpack.i.bf16 %v2959_v52, %v2958_v15 }
 0x504   : > { %1964 = vmatmul.mubr.bf16.vlgmr.msra.gmra.mrb[60].mxu0 %v3097_v20  ;;  %2407 = vperm.xlu1 %3061, %v2358_v49  }
 0x505   : > { %2077 = vmatmul.mubr.bf16.vlgmr.msra.gmra.mrb[60].mxu1 %v3097_v20  ;;  %1973 = vmatprep.mubr.bf16.mxu0 %v4726_v2 }
 0x506   : > { %2086 = vmatprep.mubr.bf16.mxu1 %v4726_v2  ;;  %2412 = vperm.xlu0 %3060, %v2359_v60  }
 0x508   : > { %3062 = vset.pattern.permute.xlu1 %v4726_v2 }
 0x509   : > { %3064 = vperm.xlu1 %3062, %v3063_v9  }
 0x50a   : > { %2417 = vperm.xlu0 %3060, %v2360_v45  }
 0x50c   : > { %1974 = vmatmul.mubr.bf16.gmra.mrb[64].mxu0 %v3098_v24 }
 0x50d   : > { %2087 = vmatmul.mubr.bf16.gmra.mrb[64].mxu1 %v3098_v24  ;;  %1983 = vmatprep.mubr.bf16.mxu0 %v4726_v2 }
 0x50e   : > { %2096 = vmatprep.mubr.bf16.mxu1 %v4726_v2  ;;  %2422 = vperm.xlu0 %3060, %v2361_v44  }
 0x50f   : > { %3069 = vperm.xlu1 %3062, %v3068_v42  }
 0x512   : > { %3074 = vset.pattern.permute.xlu0 %v4726_v2 }
 0x513   : > { %3076 = vperm.xlu0 %3074, %v3075_v8   ;;  %3073 = vset.pattern.permute.xlu1 %v3175_v1 }
 0x514   : > { %1984 = vmatmul.mubr.bf16.gmra.mrb[68].mxu0 %v3099_v11  ;;  %2427 = vperm.xlu1 %3073, %v2362_v57  }
 0x515   : > { %2097 = vmatmul.mubr.bf16.gmra.mrb[68].mxu1 %v3099_v11  ;;  %1993 = vmatprep.mubr.bf16.mxu0 %v4726_v2 }
 0x516   : > { %2106 = vmatprep.mubr.bf16.mxu1 %v4726_v2 }
 0x517   : > { %3082 = vset.pattern.permute.xlu0 %v3176_v27 }
 0x518   : > { %3080 = vset.pattern.permute.xlu1 %v4726_v2 }
 0x519   : > { %2668 = vperm.xlu1 %3080, %v2635_v22  }
 0x51c   : > { %1994 = vmatmul.mubr.bf16.gmra.mrb[72].mxu0 %v3100_v39 }
 0x51d   : > { %2107 = vmatmul.mubr.bf16.gmra.mrb[72].mxu1 %v3100_v39  ;;  %2003 = vmatprep.mubr.bf16.mxu0 %v4726_v2 }
 0x51e   : > { %2116 = vmatprep.mubr.bf16.mxu1 %v4726_v2  ;;  %3081 = vset.pattern.permute.xlu1 %v3176_v27 }
 0x51f   : > { %2755 = vperm.xlu1 %3081, %v2752_v62  }
 0x524   : > { %2004 = vmatmul.mubr.bf16.gmra.mrb[76].mxu0 %v3101_v19 }
 0x525   : > { %2117 = vmatmul.mubr.bf16.gmra.mrb[76].mxu1 %v3101_v19  ;;  %2013 = vmatprep.mubr.bf16.mxu0 %v4726_v2 }
 0x526   : > { %2126 = vmatprep.mubr.bf16.mxu1 %v4726_v2 }
 0x52c   : > { %2014 = vmatmul.mubr.bf16.gmra.mrb[80].mxu0 %v3102_v37 }
 0x52d   : > { %2127 = vmatmul.mubr.bf16.gmra.mrb[80].mxu1 %v3102_v37  ;;  %2023 = vmatprep.mubr.bf16.mxu0 %v4726_v2 }
 0x52e   : > { %2136 = vmatprep.mubr.bf16.mxu1 %v4726_v2 }
 0x534   : > { %2024 = vmatmul.mubr.bf16.gmra.mrb[84].mxu0 %v3103_v54 }
 0x535   : > { %2137 = vmatmul.mubr.bf16.gmra.mrb[84].mxu1 %v3103_v54  ;;  %2033 = vmatprep.mubr.bf16.mxu0 %v4726_v2 }
 0x536   : > { %2146 = vmatprep.mubr.bf16.mxu1 %v4726_v2 }
 0x53c   : > { %2034 = vmatmul.mubr.bf16.gmra.mrb[88].mxu0 %v3104_v0 }
 0x53d   : > { %2147 = vmatmul.mubr.bf16.gmra.mrb[88].mxu1 %v3104_v0  ;;  %2484 = vmatprep.mubr.bf16.mxu0 %v4726_v2 }
 0x53e   : > { %2555 = vmatprep.mubr.bf16.mxu1 %v4726_v2 }
 0x547   : > { %v1821_v4 = vpop.permute.xlu1 %1820  ;;  %v1825_v13 = vpop.permute.xlu0 %1824 }
 0x54b   : > { %v1829_v35 = vpop.permute.xlu1 %1828 }
 0x550   : > { %v1833_v47 = vpop.permute.xlu1 %1832 }
 0x5d7   : > { %v1965_v30 = vpop.f32.mrb[60].mxu0 }
 0x5d8   : > { %v2078_v51 = vpop.f32.mrb[60].mxu1  ;;  %v1966_v25 = vadd.f32 %v1965_v30, %v1821_v4  ;;  %v1967_v26 = vpop.f32.mrb[61].mxu0 }
 0x5d9   : > { %v2079_v29 = vadd.f32 %v2078_v51, %v1821_v4  ;;  %v2080_v56 = vpop.f32.mrb[61].mxu1  ;;  %v1968_v36 = vadd.f32 %v1967_v26, %v1821_v4  ;;  %v1969_v33 = vpop.f32.mrb[62].mxu0 }
 0x5da   : > { %v2081_v53 = vadd.f32 %v2080_v56, %v1821_v4  ;;  %v2082_v40 = vpop.f32.mrb[62].mxu1  ;;  %vm2157_vm6 = vcmp.gt.f32.partialorder %v1966_v25, 0.0  ;;  %v2221_v31 = vmul.f32 0.01, %v1966_v25  ;;  %v1970_v3 = vadd.f32 %v1969_v33, %v1825_v13  ;;  %v1971_v12 = vpop.f32.mrb[63].mxu0 }
 0x5db   : > { %vm2159_vm7 = vcmp.gt.f32.partialorder %v2079_v29, 0.0  ;;  %v2223_v48 = vmul.f32 0.01, %v2079_v29  ;;  %vm2158_vm8 = vcmp.gt.f32.partialorder %v1968_v36, 0.0  ;;  %v2222_v59 = vmul.f32 0.01, %v1968_v36 }
 0x5dc   : > { %v2083_v50 = vadd.f32 %v2082_v40, %v1825_v13  ;;  %v2084_v18 = vpop.f32.mrb[63].mxu1  ;;  %vm2160_vm9 = vcmp.gt.f32.partialorder %v2081_v53, 0.0  ;;  %v2224_v17 = vmul.f32 0.01, %v2081_v53  ;;  %v1972_v21 = vadd.f32 %v1971_v12, %v1825_v13 }
 0x5dd   : > { %v2085_v46 = vadd.f32 %v2084_v18, %v1825_v13  ;;  %vm2161_vm10 = vcmp.gt.f32.partialorder %v1970_v3, 0.0  ;;  %v2225_v55 = vmul.f32 0.01, %v1970_v3  ;;  %v2285_v5 = vsel %vm2157_vm6, %v1966_v25, %v2221_v31  ;;  %v1837_v13 = vpop.permute.xlu0 %1836 }
 0x5de   : > { %vm2163_vm11 = vcmp.gt.f32.partialorder %v2083_v50, 0.0  ;;  %v2227_v61 = vmul.f32 0.01, %v2083_v50  ;;  %v2287_v34 = vsel %vm2159_vm7, %v2079_v29, %v2223_v48  ;;  %v2226_v63 = vmul.f32 0.01, %v1972_v21 }
 0x5df   : > { %v2228_v28 = vmul.f32 0.01, %v2085_v46  ;;  %v2289_v58 = vsel %vm2161_vm10, %v1970_v3, %v2225_v55  ;;  %vm2162_vm12 = vcmp.gt.f32.partialorder %v1972_v21, 0.0  ;;  %vm2164_vm13 = vcmp.gt.f32.partialorder %v2085_v46, 0.0  ;;  %v1975_v24 = vpop.f32.mrb[64].mxu0 }
 0x5e0   : > { %v2291_v20 = vsel %vm2163_vm11, %v2083_v50, %v2227_v61  ;;  %v2088_v11 = vpop.f32.mrb[64].mxu1  ;;  %v2363_v39 = vpack.c.bf16 %v2289_v58, %v2285_v5  ;;  %v1976_v37 = vadd.f32 %v1975_v24, %v1829_v35  ;;  %v1977_v0 = vpop.f32.mrb[65].mxu0  ;;  %v2286_v49 = vsel %vm2158_vm8, %v1968_v36, %v2222_v59 }
 0x5e1   : > { %v2365_v19 = vpack.c.bf16 %v2291_v20, %v2287_v34  ;;  %v2089_v54 = vadd.f32 %v2088_v11, %v1829_v35  ;;  %v2090_v6 = vpop.f32.mrb[65].mxu1  ;;  %v1978_v23 = vadd.f32 %v1977_v0, %v1829_v35  ;;  %v1979_v1 = vpop.f32.mrb[66].mxu0  ;;  %v2290_v10 = vsel %vm2162_vm12, %v1972_v21, %v2226_v63 }
 0x5e2   : > { %v2092_v16 = vpop.f32.mrb[66].mxu1  ;;  %v2091_v60 = vadd.f32 %v2090_v6, %v1829_v35  ;;  %v2288_v38 = vsel %vm2160_vm9, %v2081_v53, %v2224_v17  ;;  %v2292_v14 = vsel %vm2164_vm13, %v2085_v46, %v2228_v28  ;;  %vm2165_vm14 = vcmp.gt.f32.partialorder %v1976_v37, 0.0  ;;  %v1981_v42 = vpop.f32.mrb[67].mxu0 }
 0x5e3   : > { %v2229_v9 = vmul.f32 0.01, %v1976_v37  ;;  %vm2167_vm15 = vcmp.gt.f32.partialorder %v2089_v54, 0.0  ;;  %v2231_v45 = vmul.f32 0.01, %v2089_v54  ;;  %vm2166_vm0 = vcmp.gt.f32.partialorder %v1978_v23, 0.0  ;;  %v1841_v35 = vpop.permute.xlu1 %1840 }
 0x5e4   : > { %v2230_v32 = vmul.f32 0.01, %v1978_v23  ;;  %v1980_v41 = vadd.f32 %v1979_v1, %v1833_v47  ;;  %v2093_v43 = vadd.f32 %v2092_v16, %v1833_v47  ;;  %v2094_v44 = vpop.f32.mrb[67].mxu1  ;;  %v1982_v15 = vadd.f32 %v1981_v42, %v1833_v47 }
 0x5e5   : > { %v2095_v52 = vadd.f32 %v2094_v44, %v1833_v47  ;;  %v2364_v4 = vpack.c.bf16 %v2290_v10, %v2286_v49  ;;  %v2366_v8 = vpack.c.bf16 %v2292_v14, %v2288_v38  ;;  %v2293_v30 = vsel %vm2165_vm14, %v1976_v37, %v2229_v9 }
 0x5e6   : > { %vm2169_vm1 = vcmp.gt.f32.partialorder %v1980_v41, 0.0  ;;  %v2233_v57 = vmul.f32 0.01, %v1980_v41  ;;  %vm2171_vm2 = vcmp.gt.f32.partialorder %v2093_v43, 0.0  ;;  %v2235_v7 = vmul.f32 0.01, %v2093_v43 }
 0x5e7   : > { %vm2168_vm3 = vcmp.gt.f32.partialorder %v2091_v60, 0.0  ;;  %v2232_v51 = vmul.f32 0.01, %v2091_v60  ;;  %v2234_v22 = vmul.f32 0.01, %v1982_v15  ;;  %2452 = vmatprep.subr.bf16.mxu0 %v2364_v4  ;;  %2523 = vmatprep.subr.bf16.mxu1 %v2366_v8  ;;  %v4356_v25 = vsel %vm2167_vm15, %v2089_v54, %v2231_v45  ;;  %v1985_v56 = vpop.f32.mrb[68].mxu0  ;;  %v1849_v37 = vpop.permute.xlu1 %1848 }
 0x5e8   : > { %v2297_v29 = vsel %vm2169_vm1, %v1980_v41, %v2233_v57  ;;  %v4358_v26 = vsel %vm2171_vm2, %v2093_v43, %v2235_v7  ;;  %vm2170_vm4 = vcmp.gt.f32.partialorder %v1982_v15, 0.0  ;;  %2453 = vmatpush1.bf16.msra.mxu0 %v2363_v39  ;;  %2524 = vmatpush1.bf16.msra.mxu1 %v2365_v19  ;;  %v2098_v36 = vpop.f32.mrb[68].mxu1  ;;  %v1986_v40 = vadd.f32 %v1985_v56, %v1837_v13  ;;  %v1987_v31 = vpop.f32.mrb[69].mxu0 }
 0x5e9   : > { %v2367_v53 = vpack.c.bf16 %v2297_v29, %v2293_v30  ;;  %v2369_v33 = vpack.c.bf16 %v4358_v26, %v4356_v25  ;;  %v2099_v27 = vadd.f32 %v2098_v36, %v1837_v13  ;;  %v2100_v48 = vpop.f32.mrb[69].mxu1  ;;  %v2236_v59 = vmul.f32 0.01, %v2095_v52  ;;  %v1989_v12 = vpop.f32.mrb[70].mxu0 }
 0x5ea   : > { %v4362_v3 = vadd.f32 %v1987_v31, %v1837_v13  ;;  %v4364_v50 = vadd.f32 %v2100_v48, %v1837_v13  ;;  %v2102_v18 = vpop.f32.mrb[70].mxu1  ;;  %vm2172_vm5 = vcmp.gt.f32.partialorder %v2095_v52, 0.0  ;;  %v2294_v17 = vsel %vm2166_vm0, %v1978_v23, %v2230_v32  ;;  %v1991_v34 = vpop.f32.mrb[71].mxu0 }
 0x5eb   : > { %v2298_v21 = vsel %vm2170_vm4, %v1982_v15, %v2234_v22  ;;  %vm2173_vm6 = vcmp.gt.f32.partialorder %v1986_v40, 0.0  ;;  %v2237_v46 = vmul.f32 0.01, %v1986_v40  ;;  %v2239_v62 = vmul.f32 0.01, %v2099_v27  ;;  %v2104_v63 = vpop.f32.mrb[71].mxu1  ;;  %v1845_v54 = vpop.permute.xlu0 %1844 }
 0x5ec   : > { %v2296_v55 = vsel %vm2168_vm3, %v2091_v60, %v2232_v51  ;;  %vm2175_vm7 = vcmp.gt.f32.partialorder %v2099_v27, 0.0  ;;  %v4370_v61 = vmul.f32 0.01, %v4362_v3  ;;  %v1990_v47 = vadd.f32 %v1989_v12, %v1841_v35 }
 0x5ed   : > { %v2103_v5 = vadd.f32 %v2102_v18, %v1841_v35  ;;  %vm2174_vm8 = vcmp.gt.f32.partialorder %v4362_v3, 0.0  ;;  %vm2176_vm9 = vcmp.gt.f32.partialorder %v4364_v50, 0.0  ;;  %v1992_v28 = vadd.f32 %v1991_v34, %v1841_v35 }
 0x5ee   : > { %v2368_v58 = vpack.c.bf16 %v2298_v21, %v2294_v17  ;;  %v2300_v20 = vsel %vm2172_vm5, %v2095_v52, %v2236_v59  ;;  %vm2177_vm10 = vcmp.gt.f32.partialorder %v1990_v47, 0.0  ;;  %v2241_v39 = vmul.f32 0.01, %v1990_v47 }
 0x5ef   : > { %v1995_v24 = vpop.f32.mrb[72].mxu0  ;;  %vm2179_vm11 = vcmp.gt.f32.partialorder %v2103_v5, 0.0  ;;  %v2243_v19 = vmul.f32 0.01, %v2103_v5  ;;  %v4376_v0 = vsel %vm2173_vm6, %v1986_v40, %v2237_v46  ;;  %v4379_v6 = vsel %vm2175_vm7, %v2099_v27, %v2239_v62  ;;  %v1853_v18 = vpop.permute.xlu0 %1852 }
 0x5f0   : > { %v2108_v11 = vpop.f32.mrb[72].mxu1  ;;  %v2242_v23 = vmul.f32 0.01, %v1992_v28  ;;  %v2105_v1 = vadd.f32 %v2104_v63, %v1841_v35  ;;  %2454 = vmatprep.subr.bf16.mxu0 %v2368_v58  ;;  %v4381_v16 = vsel %vm2177_vm10, %v1990_v47, %v2241_v39  ;;  %v2370_v60 = vpack.c.bf16 %v2300_v20, %v2296_v55  ;;  %v1997_v38 = vpop.f32.mrb[73].mxu0 }
 0x5f1   : > { %v4383_v49 = vsel %vm2179_vm11, %v2103_v5, %v2243_v19  ;;  %2455 = vmatpush1.bf16.msra.mxu0 %v2367_v53  ;;  %v1996_v10 = vadd.f32 %v1995_v24, %v1845_v54  ;;  %v2110_v14 = vpop.f32.mrb[73].mxu1  ;;  %v2371_v9 = vpack.c.bf16 %v4381_v16, %v4376_v0  ;;  %v2109_v32 = vadd.f32 %v2108_v11, %v1845_v54  ;;  %v1999_v43 = vpop.f32.mrb[74].mxu0 }
 0x5f2   : > { %v2373_v45 = vpack.c.bf16 %v4383_v49, %v4379_v6  ;;  %v4389_v41 = vadd.f32 %v1997_v38, %v1845_v54  ;;  %v2112_v42 = vpop.f32.mrb[74].mxu1  ;;  %2525 = vmatprep.subr.bf16.mxu1 %v2370_v60  ;;  %v4391_v15 = vadd.f32 %v2110_v14, %v1845_v54  ;;  %v2000_v52 = vadd.f32 %v1999_v43, %v1849_v37  ;;  %v2001_v4 = vpop.f32.mrb[75].mxu0 }
 0x5f3   : > { %vm2181_vm12 = vcmp.gt.f32.partialorder %v1996_v10, 0.0  ;;  %v2245_v44 = vmul.f32 0.01, %v1996_v10  ;;  %v2114_v8 = vpop.f32.mrb[75].mxu1  ;;  %v2240_v57 = vmul.f32 0.01, %v4364_v50  ;;  %2526 = vmatpush1.bf16.msra.mxu1 %v2369_v33  ;;  %v2113_v22 = vadd.f32 %v2112_v42, %v1849_v37  ;;  %v1857_v58 = vpop.permute.xlu1 %1856 }
 0x5f4   : > { %vm2178_vm13 = vcmp.gt.f32.partialorder %v1992_v28, 0.0  ;;  %vm2183_vm14 = vcmp.gt.f32.partialorder %v2109_v32, 0.0  ;;  %v2247_v7 = vmul.f32 0.01, %v2109_v32  ;;  %vm2180_vm15 = vcmp.gt.f32.partialorder %v2105_v1, 0.0 }
 0x5f5   : > { %v2244_v35 = vmul.f32 0.01, %v2105_v1  ;;  %v4395_v13 = vmul.f32 0.01, %v4389_v41  ;;  %vm2185_vm0 = vcmp.gt.f32.partialorder %v2000_v52, 0.0  ;;  %v4397_v30 = vsel %vm2181_vm12, %v1996_v10, %v2245_v44 }
 0x5f6   : > { %vm2182_vm1 = vcmp.gt.f32.partialorder %v4389_v41, 0.0  ;;  %v2249_v51 = vmul.f32 0.01, %v2000_v52  ;;  %v2002_v25 = vadd.f32 %v2001_v4, %v1849_v37  ;;  %v4400_v56 = vsel %vm2183_vm14, %v2109_v32, %v2247_v7 }
 0x5f7   : > { %v2005_v29 = vpop.f32.mrb[76].mxu0  ;;  %vm2184_vm2 = vcmp.gt.f32.partialorder %v4391_v15, 0.0  ;;  %v4404_v36 = vmul.f32 0.01, %v4391_v15  ;;  %v2306_v53 = vsel %vm2178_vm13, %v1992_v28, %v2242_v23  ;;  %vm2187_vm3 = vcmp.gt.f32.partialorder %v2113_v22, 0.0 }
 0x5f8   : > { %v2118_v26 = vpop.f32.mrb[76].mxu1  ;;  %v2007_v33 = vpop.f32.mrb[77].mxu0  ;;  %v4407_v27 = vsel %vm2185_vm0, %v2000_v52, %v2249_v51  ;;  %v2251_v31 = vmul.f32 0.01, %v2113_v22  ;;  %v4409_v48 = vadd.f32 %v2114_v8, %v1849_v37  ;;  %v2250_v21 = vmul.f32 0.01, %v2002_v25 }
 0x5f9   : > { %v2120_v40 = vpop.f32.mrb[77].mxu1  ;;  %v2009_v59 = vpop.f32.mrb[78].mxu0  ;;  %v2375_v17 = vpack.c.bf16 %v4407_v27, %v4397_v30  ;;  %v2302_v46 = vsel %vm2174_vm8, %v4362_v3, %v4370_v61  ;;  %v2304_v62 = vsel %vm2176_vm9, %v4364_v50, %v2240_v57  ;;  %v2308_v34 = vsel %vm2180_vm15, %v2105_v1, %v2244_v35 }
 0x5fa   : > { %v2122_v12 = vpop.f32.mrb[78].mxu1  ;;  %v2011_v55 = vpop.f32.mrb[79].mxu0  ;;  %v4420_v47 = vsel %vm2187_vm3, %v2113_v22, %v2251_v31  ;;  %v2372_v5 = vpack.c.bf16 %v2306_v53, %v2302_v46  ;;  %v2006_v63 = vadd.f32 %v2005_v29, %v1853_v18  ;;  %v2374_v24 = vpack.c.bf16 %v2308_v34, %v2304_v62 }
 0x5fb   : > { %v2124_v28 = vpop.f32.mrb[79].mxu1  ;;  %v2377_v20 = vpack.c.bf16 %v4420_v47, %v4400_v56  ;;  %v2119_v11 = vadd.f32 %v2118_v26, %v1853_v18  ;;  %v4425_v39 = vadd.f32 %v2007_v33, %v1853_v18  ;;  %v4427_v50 = vadd.f32 %v2120_v40, %v1853_v18  ;;  %v1861_v57 = vpop.permute.xlu0 %1860 }
 0x5fc   : > { %2456 = vmatprep.subr.bf16.mxu0 %v2372_v5  ;;  %vm2189_vm4 = vcmp.gt.f32.partialorder %v2006_v63, 0.0  ;;  %v2253_v3 = vmul.f32 0.01, %v2006_v63  ;;  %v2010_v61 = vadd.f32 %v2009_v59, %v1857_v58  ;;  %vm2186_vm5 = vcmp.gt.f32.partialorder %v2002_v25, 0.0  ;;  %2527 = vmatprep.subr.bf16.mxu1 %v2374_v24  ;;  %v1865_v29 = vpop.permute.xlu1 %1864 }
 0x5fd   : > { %v2252_v19 = vmul.f32 0.01, %v4409_v48  ;;  %2457 = vmatpush1.bf16.msra.mxu0 %v2371_v9  ;;  %vm2191_vm6 = vcmp.gt.f32.partialorder %v2119_v11, 0.0  ;;  %v2255_v37 = vmul.f32 0.01, %v2119_v11  ;;  %vm2188_vm7 = vcmp.gt.f32.partialorder %v4409_v48, 0.0  ;;  %2528 = vmatpush1.bf16.msra.mxu1 %v2373_v45 }
 0x5fe   : > { %v4438_v54 = vmul.f32 0.01, %v4425_v39  ;;  %vm2193_vm8 = vcmp.gt.f32.partialorder %v2010_v61, 0.0  ;;  %v4441_v60 = vsel %vm2189_vm4, %v2006_v63, %v2253_v3  ;;  %vm2190_vm9 = vcmp.gt.f32.partialorder %v4425_v39, 0.0 }
 0x5ff   : > { %v2015_v23 = vpop.f32.mrb[80].mxu0  ;;  %v2257_v0 = vmul.f32 0.01, %v2010_v61  ;;  %v2123_v16 = vadd.f32 %v2122_v12, %v1857_v58  ;;  %v2012_v10 = vadd.f32 %v2011_v55, %v1857_v58  ;;  %v4444_v9 = vsel %vm2191_vm6, %v2119_v11, %v2255_v37 }
 0x600   : > { %v2128_v1 = vpop.f32.mrb[80].mxu1  ;;  %v2017_v38 = vpop.f32.mrb[81].mxu0  ;;  %vm2192_vm10 = vcmp.gt.f32.partialorder %v4427_v50, 0.0  ;;  %v4448_v6 = vmul.f32 0.01, %v4427_v50  ;;  %v4450_v49 = vadd.f32 %v2124_v28, %v1857_v58  ;;  %v2314_v45 = vsel %vm2186_vm5, %v2002_v25, %v2250_v21 }
 0x601   : > { %v2130_v14 = vpop.f32.mrb[81].mxu1  ;;  %v2019_v32 = vpop.f32.mrb[82].mxu0  ;;  %v4454_v42 = vsel %vm2193_vm8, %v2010_v61, %v2257_v0  ;;  %vm2195_vm11 = vcmp.gt.f32.partialorder %v2123_v16, 0.0  ;;  %v2259_v44 = vmul.f32 0.01, %v2123_v16  ;;  %v2310_v52 = vsel %vm2182_vm1, %v4389_v41, %v4395_v13 }
 0x602   : > { %v2132_v43 = vpop.f32.mrb[82].mxu1  ;;  %v2021_v4 = vpop.f32.mrb[83].mxu0  ;;  %v2379_v7 = vpack.c.bf16 %v4454_v42, %v4441_v60  ;;  %vm2194_vm12 = vcmp.gt.f32.partialorder %v2012_v10, 0.0  ;;  %v2258_v35 = vmul.f32 0.01, %v2012_v10  ;;  %v2312_v51 = vsel %vm2184_vm2, %v4391_v15, %v4404_v36 }
 0x603   : > { %v2134_v8 = vpop.f32.mrb[83].mxu1  ;;  %v4466_v22 = vsel %vm2195_vm11, %v2123_v16, %v2259_v44  ;;  %v2376_v25 = vpack.c.bf16 %v2314_v45, %v2310_v52  ;;  %v2316_v41 = vsel %vm2188_vm7, %v4409_v48, %v2252_v19  ;;  %v2016_v13 = vadd.f32 %v2015_v23, %v1861_v57  ;;  %v1869_v61 = vpop.permute.xlu0 %1868 }
 0x604   : > { %v2381_v26 = vpack.c.bf16 %v4466_v22, %v4444_v9  ;;  %v2378_v53 = vpack.c.bf16 %v2316_v41, %v2312_v51  ;;  %v2129_v33 = vadd.f32 %v2128_v1, %v1861_v57  ;;  %v4473_v40 = vadd.f32 %v2017_v38, %v1861_v57  ;;  %v1873_v16 = vpop.permute.xlu1 %1872 }
 0x605   : > { %2458 = vmatprep.subr.bf16.mxu0 %v2376_v25  ;;  %vm2197_vm13 = vcmp.gt.f32.partialorder %v2016_v13, 0.0  ;;  %v2261_v31 = vmul.f32 0.01, %v2016_v13  ;;  %v4475_v15 = vadd.f32 %v2130_v14, %v1861_v57  ;;  %v2020_v36 = vadd.f32 %v2019_v32, %v1865_v29 }
 0x606   : > { %vm2196_vm14 = vcmp.gt.f32.partialorder %v4450_v49, 0.0  ;;  %v2260_v59 = vmul.f32 0.01, %v4450_v49  ;;  %2529 = vmatprep.subr.bf16.mxu1 %v2378_v53  ;;  %2459 = vmatpush1.bf16.msra.mxu0 %v2375_v17  ;;  %vm2199_vm15 = vcmp.gt.f32.partialorder %v2129_v33, 0.0  ;;  %v2263_v48 = vmul.f32 0.01, %v2129_v33 }
 0x607   : > { %2530 = vmatpush1.bf16.msra.mxu1 %v2377_v20  ;;  %v4485_v12 = vsel %vm2197_vm13, %v2016_v13, %v2261_v31  ;;  %vm2198_vm0 = vcmp.gt.f32.partialorder %v4473_v40, 0.0  ;;  %v4489_v18 = vmul.f32 0.01, %v4473_v40  ;;  %vm2201_vm1 = vcmp.gt.f32.partialorder %v2020_v36, 0.0  ;;  %v2025_v21 = vpop.f32.mrb[84].mxu0 }
 0x608   : > { %v2138_v46 = vpop.f32.mrb[84].mxu1  ;;  %vm2200_vm2 = vcmp.gt.f32.partialorder %v4475_v15, 0.0  ;;  %v2265_v30 = vmul.f32 0.01, %v2020_v36  ;;  %v2133_v27 = vadd.f32 %v2132_v43, %v1865_v29  ;;  %v2022_v17 = vadd.f32 %v2021_v4, %v1865_v29  ;;  %v2027_v62 = vpop.f32.mrb[85].mxu0 }
 0x609   : > { %v2140_v55 = vpop.f32.mrb[85].mxu1  ;;  %v4492_v5 = vsel %vm2199_vm15, %v2129_v33, %v2263_v48  ;;  %v2264_v56 = vmul.f32 0.01, %v4475_v15  ;;  %v4495_v47 = vadd.f32 %v2134_v8, %v1865_v29  ;;  %v2322_v34 = vsel %vm2194_vm12, %v2012_v10, %v2258_v35  ;;  %v2029_v63 = vpop.f32.mrb[86].mxu0 }
 0x60a   : > { %v2142_v28 = vpop.f32.mrb[86].mxu1  ;;  %v4498_v58 = vsel %vm2201_vm1, %v2020_v36, %v2265_v30  ;;  %vm2203_vm3 = vcmp.gt.f32.partialorder %v2133_v27, 0.0  ;;  %v2267_v20 = vmul.f32 0.01, %v2133_v27  ;;  %v2318_v24 = vsel %vm2190_vm9, %v4425_v39, %v4438_v54  ;;  %v2031_v11 = vpop.f32.mrb[87].mxu0 }
 0x60b   : > { %v2144_v3 = vpop.f32.mrb[87].mxu1  ;;  %v2383_v19 = vpack.c.bf16 %v4498_v58, %v4485_v12  ;;  %vm2202_vm4 = vcmp.gt.f32.partialorder %v2022_v17, 0.0  ;;  %v2266_v37 = vmul.f32 0.01, %v2022_v17  ;;  %v2320_v23 = vsel %vm2192_vm10, %v4427_v50, %v4448_v6 }
 0x60c   : > { %v4510_v1 = vsel %vm2203_vm3, %v2133_v27, %v2267_v20  ;;  %v2380_v0 = vpack.c.bf16 %v2322_v34, %v2318_v24  ;;  %v2324_v39 = vsel %vm2196_vm14, %v4450_v49, %v2260_v59  ;;  %v2026_v54 = vadd.f32 %v2025_v21, %v1869_v61  ;;  %v1877_v59 = vpop.permute.xlu0 %1876  ;;  %v1881_v27 = vpop.permute.xlu1 %1880 }
 0x60d   : > { %v2385_v10 = vpack.c.bf16 %v4510_v1, %v4492_v5  ;;  %v2382_v38 = vpack.c.bf16 %v2324_v39, %v2320_v23  ;;  %v2139_v14 = vadd.f32 %v2138_v46, %v1869_v61  ;;  %v4517_v45 = vadd.f32 %v2027_v62, %v1869_v61 }
 0x60e   : > { %2460 = vmatprep.subr.bf16.mxu0 %v2380_v0  ;;  %vm2205_vm5 = vcmp.gt.f32.partialorder %v2026_v54, 0.0  ;;  %v2269_v32 = vmul.f32 0.01, %v2026_v54  ;;  %v4519_v50 = vadd.f32 %v2140_v55, %v1869_v61  ;;  %v2030_v6 = vadd.f32 %v2029_v63, %v1873_v16 }
 0x60f   : > { %v2035_v43 = vpop.f32.mrb[88].mxu0  ;;  %vm2204_vm6 = vcmp.gt.f32.partialorder %v4495_v47, 0.0  ;;  %v2268_v49 = vmul.f32 0.01, %v4495_v47  ;;  %2531 = vmatprep.subr.bf16.mxu1 %v2382_v38  ;;  %2461 = vmatpush1.bf16.msra.mxu0 %v2379_v7  ;;  %vm2207_vm7 = vcmp.gt.f32.partialorder %v2139_v14, 0.0  ;;  %vm2206_vm8 = vcmp.gt.f32.partialorder %v4517_v45, 0.0 }
 0x610   : > { %v2148_v44 = vpop.f32.mrb[88].mxu1  ;;  %v2271_v52 = vmul.f32 0.01, %v2139_v14  ;;  %2532 = vmatpush1.bf16.msra.mxu1 %v2381_v26  ;;  %v4529_v4 = vsel %vm2205_vm5, %v2026_v54, %v2269_v32  ;;  %v2270_v8 = vmul.f32 0.01, %v4517_v45  ;;  %vm2209_vm9 = vcmp.gt.f32.partialorder %v2030_v6, 0.0 }
 0x611   : > { %v2037_v57 = vpop.f32.mrb[89].mxu0  ;;  %v2150_v35 = vpop.f32.mrb[89].mxu1  ;;  %v4534_v51 = vmul.f32 0.01, %v4519_v50  ;;  %v2273_v60 = vmul.f32 0.01, %v2030_v6  ;;  %v2143_v42 = vadd.f32 %v2142_v28, %v1873_v16  ;;  %v2032_v7 = vadd.f32 %v2031_v11, %v1873_v16 }
 0x612   : > { %v2039_v25 = vpop.f32.mrb[90].mxu0  ;;  %v2152_v41 = vpop.f32.mrb[90].mxu1  ;;  %v4536_v13 = vsel %vm2207_vm7, %v2139_v14, %v2271_v52  ;;  %v2145_v9 = vadd.f32 %v2144_v3, %v1873_v16  ;;  %v2326_v22 = vsel %vm2198_vm0, %v4473_v40, %v4489_v18  ;;  %v2330_v29 = vsel %vm2202_vm4, %v2022_v17, %v2266_v37 }
 0x613   : > { %v2041_v26 = vpop.f32.mrb[91].mxu0  ;;  %v2154_v53 = vpop.f32.mrb[91].mxu1  ;;  %vm2208_vm10 = vcmp.gt.f32.partialorder %v4519_v50, 0.0  ;;  %v4545_v33 = vsel %vm2209_vm9, %v2030_v6, %v2273_v60  ;;  %vm2211_vm11 = vcmp.gt.f32.partialorder %v2143_v42, 0.0  ;;  %v2275_v31 = vmul.f32 0.01, %v2143_v42 }
 0x614   : > { %v2328_v36 = vsel %vm2200_vm2, %v4475_v15, %v2264_v56  ;;  %v2387_v48 = vpack.c.bf16 %v4545_v33, %v4529_v4  ;;  %vm2210_vm12 = vcmp.gt.f32.partialorder %v2032_v7, 0.0  ;;  %v2274_v40 = vmul.f32 0.01, %v2032_v7  ;;  %v2403_v60 = vpop.permute.xlu1 %2402 }
 0x615   : > { %vm2212_vm13 = vcmp.gt.f32.partialorder %v2145_v9, 0.0  ;;  %v2339_v18 = vsel %vm2211_vm11, %v2143_v42, %v2275_v31  ;;  %v2384_v21 = vpack.c.bf16 %v2330_v29, %v2326_v22  ;;  %v2332_v46 = vsel %vm2204_vm6, %v4495_v47, %v2268_v49 }
 0x616   : > { %v2036_v30 = vadd.f32 %v2035_v43, %v1877_v59  ;;  %v2389_v17 = vpack.c.bf16 %v2339_v18, %v4536_v13  ;;  %v2386_v62 = vpack.c.bf16 %v2332_v46, %v2328_v36  ;;  %v2149_v55 = vadd.f32 %v2148_v44, %v1877_v59 }
 0x617   : > { %v2038_v15 = vadd.f32 %v2037_v57, %v1877_v59  ;;  %2462 = vmatprep.subr.bf16.mxu0 %v2384_v21  ;;  %v2151_v34 = vadd.f32 %v2150_v35, %v1877_v59  ;;  %v2040_v63 = vadd.f32 %v2039_v25, %v1881_v27  ;;  %v2276_v28 = vmul.f32 0.01, %v2145_v9  ;;  %v3107_v57 = vld [vmem:[%s4639_s1 + $0xc4] sm:$0xff]   ;;  %v3108_v35 = vld [vmem:[%s4639_s1 + $0xcc] ss:$0 sps:$4 sm:$0x11]  }
 0x618   : > { %vm2213_vm14 = vcmp.gt.f32.partialorder %v2036_v30, 0.0  ;;  %v2277_v56 = vmul.f32 0.01, %v2036_v30  ;;  %2533 = vmatprep.subr.bf16.mxu1 %v2386_v62  ;;  %2463 = vmatpush1.bf16.msra.mxu0 %v2383_v19  ;;  %vm2215_vm15 = vcmp.gt.f32.partialorder %v2149_v55, 0.0  ;;  %v2279_v47 = vmul.f32 0.01, %v2149_v55 }
 0x619   : > { %vm2214_vm0 = vcmp.gt.f32.partialorder %v2038_v15, 0.0  ;;  %2534 = vmatpush1.bf16.msra.mxu1 %v2385_v10  ;;  %v2278_v24 = vmul.f32 0.01, %v2038_v15  ;;  %vm2216_vm1 = vcmp.gt.f32.partialorder %v2151_v34, 0.0  ;;  %vm2217_vm2 = vcmp.gt.f32.partialorder %v2040_v63, 0.0 }
 0x61a   : > { %v2341_v20 = vsel %vm2213_vm14, %v2036_v30, %v2277_v56  ;;  %v2280_v11 = vmul.f32 0.01, %v2151_v34  ;;  %v2281_v3 = vmul.f32 0.01, %v2040_v63  ;;  %v2153_v61 = vadd.f32 %v2152_v41, %v1881_v27 }
 0x61b   : > { %v2042_v37 = vadd.f32 %v2041_v26, %v1881_v27  ;;  %v2343_v23 = vsel %vm2215_vm15, %v2149_v55, %v2279_v47  ;;  %v2155_v0 = vadd.f32 %v2154_v53, %v1881_v27  ;;  %v2334_v12 = vsel %vm2206_vm8, %v4517_v45, %v2270_v8  ;;  %v3106_v8 = vld [vmem:[%s4639_s1 + $0xbc] sm:$0xff]  }
 0x61c   : > { %v2338_v58 = vsel %vm2210_vm12, %v2032_v7, %v2274_v40  ;;  %v2345_v19 = vsel %vm2217_vm2, %v2040_v63, %v2281_v3  ;;  %vm2219_vm3 = vcmp.gt.f32.partialorder %v2153_v61, 0.0  ;;  %v2283_v5 = vmul.f32 0.01, %v2153_v61  ;;  %v2408_v7 = vpop.permute.xlu1 %2407 }
 0x61d   : > { %vm2218_vm4 = vcmp.gt.f32.partialorder %v2042_v37, 0.0  ;;  %v2391_v1 = vpack.c.bf16 %v2345_v19, %v2341_v20  ;;  %v2282_v39 = vmul.f32 0.01, %v2042_v37  ;;  %vm2220_vm5 = vcmp.gt.f32.partialorder %v2155_v0, 0.0 }
 0x61e   : > { %v2284_v54 = vmul.f32 0.01, %v2155_v0  ;;  %v2347_v16 = vsel %vm2219_vm3, %v2153_v61, %v2283_v5  ;;  %v2388_v10 = vpack.c.bf16 %v2338_v58, %v2334_v12  ;;  %v2336_v38 = vsel %vm2208_vm10, %v4519_v50, %v4534_v51  ;;  %v3105_v50 = vld [vmem:[%s4639_s1 + $0xb4] sm:$0xff]   ;;  %v2398_v51 = vpop.permute.xlu0 %2397 }
 0x61f   : > { %v2340_v14 = vsel %vm2212_vm13, %v2145_v9, %v2276_v28  ;;  %v2393_v45 = vpack.c.bf16 %v2347_v16, %v2343_v23  ;;  %v2342_v6 = vsel %vm2214_vm0, %v2038_v15, %v2278_v24  ;;  %v2346_v43 = vsel %vm2218_vm4, %v2042_v37, %v2282_v39 }
 0x620   : > { %v2390_v32 = vpack.c.bf16 %v2340_v14, %v2336_v38  ;;  %2464 = vmatprep.subr.bf16.mxu0 %v2388_v10  ;;  %v2392_v44 = vpack.c.bf16 %v2346_v43, %v2342_v6  ;;  %v2344_v49 = vsel %vm2216_vm1, %v2151_v34, %v2280_v11  ;;  %v2348_v52 = vsel %vm2220_vm5, %v2155_v0, %v2284_v54  ;;  %v3065_v41 = vpop.permute.xlu1 %3064 }
 0x621   : > { %2465 = vmatpush1.bf16.msra.mxu0 %v2387_v48  ;;  %v2394_v4 = vpack.c.bf16 %v2348_v52, %v2344_v49  ;;  %v3067_v59 = vunpack.i.h.bf16 %v3065_v41  ;;  %v3066_v30 = vunpack.i.l.bf16 %v3065_v41  ;;  %vm2704_vm6 = vcmask 1041408  }
 0x622   : > { %2535 = vmatprep.subr.bf16.mxu1 %v2390_v32  ;;  %2466 = vmatprep.subr.bf16.mxu0 %v2392_v44  ;;  %v4591_v42 = vpop.permute.xlu0 %2412 }
 0x623   : > { %2536 = vmatpush1.bf16.msra.mxu1 %v2389_v17 }
 0x624   : > { %2537 = vmatprep.subr.bf16.mxu1 %v2394_v4  ;;  %v3070_v22 = vpop.permute.xlu1 %3069 }
 0x625   : > { %2467 = vmatpush1.bf16.msra.mxu0 %v2391_v1  ;;  %v3072_v47 = vunpack.i.h.bf16 %v3070_v22  ;;  %v3071_v11 = vunpack.i.l.bf16 %v3070_v22 }
 0x626   : > { %v4593_v25 = vpop.permute.xlu0 %2417 }
 0x627   : > { %2538 = vmatpush1.bf16.msra.mxu1 %v2393_v45 }
 0x628   : > { %2485 = vmatmul.mubr.bf16.vlgmr.msra.gmra.mrb[92].mxu0 %v3105_v50 }
 0x629   : > { %2494 = vmatprep.mubr.bf16.mxu0 %v4726_v2 }
 0x62a   : > { %2556 = vmatmul.mubr.bf16.vlgmr.msra.gmra.mrb[92].mxu1 %v3105_v50  ;;  %v4595_v13 = vpop.permute.xlu0 %2422 }
 0x62b   : > { %2565 = vmatprep.mubr.bf16.mxu1 %v4726_v2 }
 0x62e   : > { %v3077_v56 = vpop.permute.xlu0 %3076 }
 0x62f   : > { %v4597_v3 = vunpack.i.h.bf16 %v3077_v56  ;;  %v4599_v0 = vunpack.i.l.bf16 %v3077_v56 }
 0x630   : > { %2495 = vmatmul.mubr.bf16.gmra.mrb[96].mxu0 %v3106_v8 }
 0x631   : > { %2504 = vmatprep.mubr.bf16.mxu0 %v4726_v2 }
 0x632   : > { %2566 = vmatmul.mubr.bf16.gmra.mrb[96].mxu1 %v3106_v8 }
 0x633   : > { %2575 = vmatprep.mubr.bf16.mxu1 %v4726_v2 }
 0x638   : > { %2505 = vmatmul.mubr.bf16.gmra.mrb[100].mxu0 %v3107_v57 }
 0x639   : > { %2514 = vmatprep.mubr.bf16.mxu0 %v4726_v2 }
 0x63a   : > { %2576 = vmatmul.mubr.bf16.gmra.mrb[100].mxu1 %v3107_v57 }
 0x63b   : > { %2585 = vmatprep.mubr.bf16.mxu1 %v4726_v2 }
 0x640   : > { %2515 = vmatmul.mubr.bf16.gmra.mrb[104].mxu0 %v3108_v35 }
 0x642   : > { %2586 = vmatmul.mubr.bf16.gmra.mrb[104].mxu1 %v3108_v35 }
 0x6fb   : > { %v2486_v9 = vpop.f32.mrb[92].mxu0 }
 0x6fc   : > { %v2487_v29 = vadd.f32 %v2486_v9, %v2398_v51  ;;  %v2488_v26 = vpop.f32.mrb[93].mxu0 }
 0x6fd   : > { %v2557_v2 = vpop.f32.mrb[92].mxu1  ;;  %v2489_v33 = vadd.f32 %v2488_v26, %v2398_v51  ;;  %v2490_v36 = vpop.f32.mrb[94].mxu0 }
 0x6fe   : > { %v2558_v53 = vadd.f32 %v2557_v2, %v2398_v51  ;;  %v2559_v31 = vpop.f32.mrb[93].mxu1  ;;  %v2594_v48 = vmax.f32 %v2487_v29, 0.0  ;;  %v2491_v18 = vadd.f32 %v2490_v36, %v2403_v60  ;;  %v2492_v46 = vpop.f32.mrb[95].mxu0 }
 0x6ff   : > { %v2560_v40 = vadd.f32 %v2559_v31, %v2398_v51  ;;  %v2561_v21 = vpop.f32.mrb[94].mxu1  ;;  %v2595_v17 = vmax.f32 %v2489_v33, 0.0  ;;  %v2493_v55 = vadd.f32 %v2492_v46, %v2403_v60 }
 0x700   : > { %v2596_v27 = vmax.f32 %v2558_v53, 0.0  ;;  %v2562_v62 = vadd.f32 %v2561_v21, %v2403_v60  ;;  %v2563_v15 = vpop.f32.mrb[95].mxu1  ;;  %v2598_v63 = vmax.f32 %v2491_v18, 0.0  ;;  %v2671_v37 = vmul.f32 %v3066_v30, %v2594_v48 }
 0x701   : > { %v2597_v34 = vmax.f32 %v2560_v40, 0.0  ;;  %v2564_v28 = vadd.f32 %v2563_v15, %v2403_v60  ;;  %v2599_v24 = vmax.f32 %v2493_v55, 0.0  ;;  %v2672_v12 = vmul.f32 %v3066_v30, %v2595_v17 }
 0x702   : > { %v2600_v20 = vmax.f32 %v2562_v62, 0.0  ;;  %v2675_v23 = vmul.f32 %v3067_v59, %v2598_v63  ;;  %v2673_v58 = vmul.f32 %v3066_v30, %v2596_v27  ;;  %v2428_v62 = vpop.permute.xlu1 %2427 }
 0x703   : > { %v2601_v61 = vmax.f32 %v2564_v28, 0.0  ;;  %v2676_v19 = vmul.f32 %v3067_v59, %v2599_v24  ;;  %v2496_v1 = vpop.f32.mrb[96].mxu0  ;;  %v2674_v39 = vmul.f32 %v3066_v30, %v2597_v34 }
 0x704   : > { %v2677_v5 = vmul.f32 %v3067_v59, %v2600_v20  ;;  %v2497_v16 = vadd.f32 %v2496_v1, %v2408_v7  ;;  %v2498_v38 = vpop.f32.mrb[97].mxu0  ;;  %v2699_v14 = vadd.f32 %v2675_v23, %v2671_v37 }
 0x705   : > { %v2678_v54 = vmul.f32 %v3067_v59, %v2601_v61  ;;  %v2567_v10 = vpop.f32.mrb[96].mxu1  ;;  %v2499_v32 = vadd.f32 %v2498_v38, %v2408_v7  ;;  %v2500_v43 = vpop.f32.mrb[98].mxu0  ;;  %v2713_v49 = vadd.f32 %v2676_v19, %v2672_v12 }
 0x706   : > { %v2568_v45 = vadd.f32 %v2567_v10, %v2408_v7  ;;  %v2569_v6 = vpop.f32.mrb[97].mxu1  ;;  %v2726_v44 = vadd.f32 %v2677_v5, %v2673_v58  ;;  %v2602_v52 = vmax.f32 %v2497_v16, 0.0  ;;  %v2501_v50 = vadd.f32 %v2500_v43, %v4591_v42  ;;  %v2502_v57 = vpop.f32.mrb[99].mxu0 }
 0x707   : > { %v2570_v4 = vadd.f32 %v2569_v6, %v2408_v7  ;;  %v2571_v8 = vpop.f32.mrb[98].mxu1  ;;  %v2739_v35 = vadd.f32 %v2678_v54, %v2674_v39  ;;  %v2603_v60 = vmax.f32 %v2499_v32, 0.0  ;;  %v2503_v9 = vadd.f32 %v2502_v57, %v4591_v42 }
 0x708   : > { %v2604_v51 = vmax.f32 %v2568_v45, 0.0  ;;  %v2572_v41 = vadd.f32 %v2571_v8, %v4591_v42  ;;  %v2573_v22 = vpop.f32.mrb[99].mxu1  ;;  %v2606_v2 = vmax.f32 %v2501_v50, 0.0  ;;  %v2679_v26 = vmul.f32 %v3071_v11, %v2602_v52 }
 0x709   : > { %v2605_v29 = vmax.f32 %v2570_v4, 0.0  ;;  %v2574_v53 = vadd.f32 %v2573_v22, %v4591_v42  ;;  %v2607_v7 = vmax.f32 %v2503_v9, 0.0  ;;  %v2680_v36 = vmul.f32 %v3071_v11, %v2603_v60 }
 0x70a   : > { %v2608_v33 = vmax.f32 %v2572_v41, 0.0  ;;  %v2681_v31 = vmul.f32 %v3071_v11, %v2604_v51  ;;  %v2683_v59 = vmul.f32 %v3072_v47, %v2606_v2  ;;  %v2700_v48 = vadd.f32 %v2699_v14, %v2679_v26 }
 0x70b   : > { %v2609_v40 = vmax.f32 %v2574_v53, 0.0  ;;  %v2682_v18 = vmul.f32 %v3071_v11, %v2605_v29  ;;  %v2684_v30 = vmul.f32 %v3072_v47, %v2607_v7  ;;  %v2714_v27 = vadd.f32 %v2713_v49, %v2680_v36  ;;  %v2506_v17 = vpop.f32.mrb[100].mxu0 }
 0x70c   : > { %v2685_v21 = vmul.f32 %v3072_v47, %v2608_v33  ;;  %v2727_v46 = vadd.f32 %v2726_v44, %v2681_v31  ;;  %v2701_v55 = vadd.f32 %v2700_v48, %v2683_v59  ;;  %v2507_v34 = vadd.f32 %v2506_v17, %v4593_v25  ;;  %v2508_v63 = vpop.f32.mrb[101].mxu0 }
 0x70d   : > { %v2686_v15 = vmul.f32 %v3072_v47, %v2609_v40  ;;  %v2740_v56 = vadd.f32 %v2739_v35, %v2682_v18  ;;  %v2577_v42 = vpop.f32.mrb[100].mxu1  ;;  %v2715_v20 = vadd.f32 %v2714_v27, %v2684_v30  ;;  %v2509_v61 = vadd.f32 %v2508_v63, %v4593_v25  ;;  %v2510_v37 = vpop.f32.mrb[102].mxu0 }
 0x70e   : > { %v2728_v28 = vadd.f32 %v2727_v46, %v2685_v21  ;;  %v2578_v24 = vadd.f32 %v2577_v42, %v4593_v25  ;;  %v2579_v11 = vpop.f32.mrb[101].mxu1  ;;  %v2610_v12 = vmax.f32 %v2507_v34, 0.0  ;;  %v2511_v19 = vadd.f32 %v2510_v37, %v4595_v13  ;;  %v2512_v5 = vpop.f32.mrb[103].mxu0 }
 0x70f   : > { %v2741_v23 = vadd.f32 %v2740_v56, %v2686_v15  ;;  %v2580_v58 = vadd.f32 %v2579_v11, %v4593_v25  ;;  %v2581_v47 = vpop.f32.mrb[102].mxu1  ;;  %v2611_v39 = vmax.f32 %v2509_v61, 0.0  ;;  %v2513_v16 = vadd.f32 %v2512_v5, %v4595_v13 }
 0x710   : > { %v2612_v1 = vmax.f32 %v2578_v24, 0.0  ;;  %v2582_v54 = vadd.f32 %v2581_v47, %v4595_v13  ;;  %v2583_v10 = vpop.f32.mrb[103].mxu1  ;;  %v2687_v14 = vmul.f32 %v4599_v0, %v2610_v12  ;;  %v2614_v45 = vmax.f32 %v2511_v19, 0.0 }
 0x711   : > { %v2613_v38 = vmax.f32 %v2580_v58, 0.0  ;;  %v2584_v32 = vadd.f32 %v2583_v10, %v4595_v13  ;;  %v2688_v6 = vmul.f32 %v4599_v0, %v2611_v39  ;;  %v2615_v44 = vmax.f32 %v2513_v16, 0.0  ;;  %v2669_v13 = vpop.permute.xlu1 %2668 }
 0x712   : > { %v2689_v25 = vmul.f32 %v4599_v0, %v2612_v1  ;;  %v2616_v43 = vmax.f32 %v2582_v54, 0.0  ;;  %v2691_v52 = vmul.f32 %v4597_v3, %v2614_v45  ;;  %v2702_v4 = vadd.f32 %v2701_v55, %v2687_v14 }
 0x713   : > { %v2690_v49 = vmul.f32 %v4599_v0, %v2613_v38  ;;  %v2617_v50 = vmax.f32 %v2584_v32, 0.0  ;;  %v2692_v35 = vmul.f32 %v4597_v3, %v2615_v44  ;;  %v2716_v51 = vadd.f32 %v2715_v20, %v2688_v6  ;;  %v2516_v60 = vpop.f32.mrb[104].mxu0 }
 0x714   : > { %v2693_v8 = vmul.f32 %v4597_v3, %v2616_v43  ;;  %v2729_v57 = vadd.f32 %v2728_v28, %v2689_v25  ;;  %v2703_v41 = vadd.f32 %v2702_v4, %v2691_v52  ;;  %v2517_v29 = vadd.f32 %v2516_v60, %v2428_v62  ;;  %v2518_v26 = vpop.f32.mrb[105].mxu0 }
 0x715   : > { %v2694_v9 = vmul.f32 %v4597_v3, %v2617_v50  ;;  %v2742_v22 = vadd.f32 %v2741_v23, %v2690_v49  ;;  %v2587_v2 = vpop.f32.mrb[104].mxu1  ;;  %v2717_v53 = vadd.f32 %v2716_v51, %v2692_v35  ;;  %v2519_v31 = vadd.f32 %v2518_v26, %v2428_v62  ;;  %v2520_v36 = vpop.f32.mrb[106].mxu0 }
 0x716   : > { %v2730_v0 = vadd.f32 %v2729_v57, %v2693_v8  ;;  %v2588_v33 = vadd.f32 %v2587_v2, %v2428_v62  ;;  %v2589_v7 = vpop.f32.mrb[105].mxu1  ;;  %v2618_v48 = vmax.f32 %v2517_v29, 0.0  ;;  %v2521_v21 = vpop.f32.mrb[107].mxu0 }
 0x717   : > { %v2743_v59 = vadd.f32 %v2742_v22, %v2694_v9  ;;  %v2590_v40 = vadd.f32 %v2589_v7, %v2428_v62  ;;  %v2591_v18 = vpop.f32.mrb[106].mxu1  ;;  %v2619_v30 = vmax.f32 %v2519_v31, 0.0  ;;  %v2756_v6 = vpop.permute.xlu1 %2755 }
 0x718   : > { %v2620_v46 = vmax.f32 %v2588_v33, 0.0  ;;  %v2592_v27 = vpop.f32.mrb[107].mxu1  ;;  %v2695_v17 = vmul.f32 %v2669_v13, %v2618_v48 }
 0x719   : > { %v2621_v3 = vmax.f32 %v2590_v40, 0.0  ;;  %v2696_v55 = vmul.f32 %v2669_v13, %v2619_v30  ;;  %v3177_v40 = vmov 1966171168   ;;  %v4727_v30 = vld [vmem:[#allocation7_spill] sm:$0xff] }
 0x71a   : > { %v2697_v15 = vmul.f32 %v2669_v13, %v2620_v46  ;;  %v2705_v34 = vsel %vm2704_vm6, %v2695_v17, 0.0  ;;  %v2793_v18 = vunpack.c.l.s4 %v3177_v40 }
 0x71b   : > { %v2698_v56 = vmul.f32 %v2669_v13, %v2621_v3  ;;  %v2706_v42 = vadd.f32 %v2705_v34, %v2703_v41  ;;  %v2718_v63 = vsel %vm2704_vm6, %v2696_v55, 0.0 }
 0x71c   : > { %v2731_v28 = vsel %vm2704_vm6, %v2697_v15, 0.0  ;;  %v2719_v20 = vadd.f32 %v2718_v63, %v2717_v53  ;;  %v2794_v21 = vunpack.c.0.s8 %v2793_v18 }
 0x71d   : > { %v2732_v24 = vadd.f32 %v2731_v28, %v2730_v0  ;;  %v2744_v61 = vsel %vm2704_vm6, %v2698_v56, 0.0  ;;  %v2707_v11 = vrot.slane %v2706_v42, 4  ;;  %v4728_v28 = vlaneseq }
 0x71e   : > { %v2745_v62 = vadd.f32 %v2744_v61, %v2743_v59  ;;  %v2720_v37 = vrot.slane %v2719_v20, 4  ;;  %v2797_v27 = vsub.s32 %v2794_v21, %v4727_v30 }
 0x71f   : > { %v2733_v23 = vrot.slane %v2732_v24, 4  ;;  %v2708_v58 = vadd.f32 %v2707_v11, %v2706_v42  ;;  %vm2817_vm7 = vcmp.lt.s32.totalorder %v4728_v28, 512 }
 0x720   : > { %v2746_v12 = vrot.slane %v2745_v62, 4  ;;  %v2721_v19 = vadd.f32 %v2720_v37, %v2719_v20 }
 0x721   : > { %v2734_v47 = vadd.f32 %v2733_v23, %v2732_v24  ;;  %v2709_v5 = vrot.slane %v2708_v58, 2 }
 0x722   : > { %v2747_v1 = vadd.f32 %v2746_v12, %v2745_v62  ;;  %v2722_v39 = vrot.slane %v2721_v19, 2 }
 0x723   : > { %v2735_v54 = vrot.slane %v2734_v47, 2  ;;  %v2710_v16 = vadd.f32 %v2709_v5, %v2708_v58 }
 0x724   : > { %v2748_v10 = vrot.slane %v2747_v1, 2  ;;  %v2723_v38 = vadd.f32 %v2722_v39, %v2721_v19 }
 0x725   : > { %v2736_v14 = vadd.f32 %v2735_v54, %v2734_v47  ;;  %v2711_v45 = vrot.slane %v2710_v16, 1 }
 0x726   : > { %v2749_v32 = vadd.f32 %v2748_v10, %v2747_v1  ;;  %v2724_v25 = vrot.slane %v2723_v38, 1 }
 0x727   : > { %v2737_v43 = vrot.slane %v2736_v14, 1  ;;  %v2712_v44 = vadd.f32 %v2711_v45, %v2710_v16 }
 0x728   : > { %v2750_v49 = vrot.slane %v2749_v32, 1  ;;  %v2725_v52 = vadd.f32 %v2724_v25, %v2723_v38 }
 0x729   : > { %v2738_v4 = vadd.f32 %v2737_v43, %v2736_v14  ;;  %v2758_v8 = vadd.f32 %v2756_v6, %v2712_v44 }
 0x72a   : > { %v2751_v50 = vadd.f32 %v2750_v49, %v2749_v32  ;;  %v2759_v57 = vadd.f32 %v2756_v6, %v2725_v52 }
 0x72b   : > { %v2760_v35 = vadd.f32 %v2756_v6, %v2738_v4  ;;  %v2762_v60 = vsub.f32 0.0, %v2758_v8 }
 0x72c   : > { %v2761_v51 = vadd.f32 %v2756_v6, %v2751_v50  ;;  %v2763_v13 = vsub.f32 0.0, %v2759_v57 }
 0x72d   : > { %v2764_v41 = vsub.f32 0.0, %v2760_v35  ;;  %v2766_v22 = vmul.f32 1.442695, %v2762_v60 }
 0x72e   : > { %v2765_v9 = vsub.f32 0.0, %v2761_v51  ;;  %v2768_v29 = vmul.f32 1.442695, %v2763_v13 }
 0x72f   : > { %v2770_v2 = vmul.f32 1.442695, %v2764_v41  ;;  %3117 = vpow2.f32 %v2766_v22 }
 0x730   : > { %v2772_v26 = vmul.f32 1.442695, %v2765_v9  ;;  %3119 = vpow2.f32 %v2768_v29 }
 0x731   : > { %3121 = vpow2.f32 %v2770_v2 }
 0x732   : > { %3123 = vpow2.f32 %v2772_v26 }
 0x739   : > { %v3118_v0 = vpop.eup %3117 }
 0x73a   : > { %v3120_v53 = vpop.eup %3119  ;;  %v2774_v33 = vadd.f32 1.0, %v3118_v0 }
 0x73b   : > { %v3122_v31 = vpop.eup %3121  ;;  %v2775_v7 = vadd.f32 1.0, %v3120_v53 }
 0x73c   : > { %v3124_v36 = vpop.eup %3123  ;;  %v2776_v59 = vadd.f32 1.0, %v3122_v31  ;;  %3125 = vrcp.f32 %v2774_v33 }
 0x73d   : > { %v2777_v48 = vadd.f32 1.0, %v3124_v36  ;;  %3127 = vrcp.f32 %v2775_v7 }
 0x73e   : > { %3129 = vrcp.f32 %v2776_v59 }
 0x73f   : > { %3131 = vrcp.f32 %v2777_v48 }
 0x746   : > { %v3126_v46 = vpop.eup %3125 }
 0x747   : > { %v3128_v3 = vpop.eup %3127 }
 0x748   : > { %v3130_v17 = vpop.eup %3129  ;;  %v2790_v55 = vcombine.low %v3126_v46, %v3128_v3 }
 0x749   : > { %v3132_v15 = vpop.eup %3131 }
 0x74a   : > { %v2791_v56 = vcombine.low %v3130_v17, %v3132_v15  ;;  %v2798_v34 = vrot.slane %v2790_v55, %v2797_v27 }
 0x74c   : > { %v2805_v42 = vrot.slane %v2791_v56, %v2797_v27 }
 0x74e   : > { %v2806_v63 = vcombine.low %v2798_v34, %v2805_v42 }
 0x750   : > { %v2813_v20 = vrot.slane %v2806_v63, %v2797_v27 }
 0x752   : > { %2819 = vst.msk [vmem:[%s211_s14] sm:$0xf] %vm2817_vm7, %v2813_v20 }
 0x753 PF: > { %p10_p9 = scmp.ge.s32.totalorder %s3215_s16, 4   ;;  %s4729_s12 = smov %s3162_s13 }
 0x754   : > { %s4730_s13 = smov %s3224_s19  ;;  %s4731_s14 = smov %s3215_s16 }
 0x755   :  { %12 = sbr.rel (!%p10_p9) target bundleno = 2 (0x2), region = 91 }

</bundles_post_ra>
